<compile_context>
chip_gen: v5e
topology: v5e:2x2
jax: 0.10.0
libtpu: 0.0.40
codegen_flags: <defaults>
</compile_context>

<pallas_src>
from functools import partial

import numpy as np
import jax
import jax.numpy as jnp
from jax import lax
from jax.experimental import pallas as pl
from jax.experimental.pallas import tpu as pltpu


# ---------------------------------------------------------------------------
# Host-side parameter packing (done once, outside the jitted forward pass)
# ---------------------------------------------------------------------------
def _conv_blockdiag(w_oihw, out_w):
    """Per-(kh,kw) block-diagonal matrices so conv == sum_k x_slice @ M[k].

    M[k][w*Cin + ci, w*Cout + co] = W[co, ci, kh, kw]  (zero off the diagonal blocks)
    """
    w = np.asarray(w_oihw, dtype=np.float32)
    Cout, Cin, KH, KW = w.shape
    eye = np.eye(out_w, dtype=np.float32)
    mats = []
    for kh in range(KH):
        for kw in range(KW):
            mats.append(np.kron(eye, w[:, :, kh, kw].T))   # [out_w*Cin, out_w*Cout]
    return jnp.asarray(np.stack(mats, axis=0))


def _pool_row_select(h_in, h_out):
    """MaxPool(k=2, s=2, pad=1) row pairs: RU[p,h]=1 iff h==2p-1, RL[p,h]=1 iff h==2p."""
    p = np.arange(h_out)[:, None]
    h = np.arange(h_in)[None, :]
    ru = (h == 2 * p - 1).astype(np.float32)
    rl = (h == 2 * p).astype(np.float32)
    return jnp.asarray(ru), jnp.asarray(rl)


def _pool_col_select(w_in, w_out, channels):
    """Column selectors, expanded for the interleaved [.., w*C + c] lane layout."""
    w = np.arange(w_in)[:, None]
    k = np.arange(w_out)[None, :]
    su = (w == 2 * k - 1).astype(np.float32)
    sl = (w == 2 * k).astype(np.float32)
    eye = np.eye(channels, dtype=np.float32)
    return jnp.asarray(np.kron(su, eye)), jnp.asarray(np.kron(sl, eye))


def prepare_params(params, in_hw=(28, 28)):
    w_conv1, w_conv2, w_fc1, w_fc2 = params
    C1, Cin, KH, KW = w_conv1.shape
    C2 = w_conv2.shape[0]
    H, W = in_hw

    # conv(pad=1, stride=1, k=5) / pool(k=2, s=2, pad=1) geometry
    H1, W1 = H + 2 - KH + 1, W + 2 - KW + 1            # 26, 26
    P1h, P1w = H1 // 2 + 1, W1 // 2 + 1                # 14, 14
    H2, W2 = P1h + 2 - KH + 1, P1w + 2 - KW + 1        # 12, 12
    P2h, P2w = H2 // 2 + 1, W2 // 2 + 1                # 7, 7

    nh = w_fc1.shape[0]
    assert w_fc1.shape[1] == C2 * P2h * P2w

    m1 = _conv_blockdiag(w_conv1, W1)                  # [25, W1*Cin, W1*C1]
    m2 = _conv_blockdiag(w_conv2, W2)                  # [25, W2*C1,  W2*C2]
    ru1, rl1 = _pool_row_select(H1, P1h)               # [P1h, H1]
    cu1, cl1 = _pool_col_select(W1, P1w, C1)           # [W1*C1, P1w*C1]
    ru2, rl2 = _pool_row_select(H2, P2h)               # [P2h, H2]
    cu2, cl2 = _pool_col_select(W2, P2w, C2)           # [W2*C2, P2w*C2]

    # fc1: PyTorch flatten order is (c, h, w); our activation layout is (h, w*C2 + c).
    w1p = np.asarray(w_fc1, np.float32).reshape(nh, C2, P2h, P2w)
    w1p = jnp.asarray(w1p.transpose(2, 3, 1, 0).reshape(P2h, P2w * C2, nh))
    w2p = jnp.asarray(np.asarray(w_fc2, np.float32).T)   # [nh, ncls]

    dims = (Cin, C1, C2, KH, KW, H, W, H1, W1, P1h, P1w, H2, W2, P2h, P2w)
    consts = (m1, m2, cu1, cl1, ru1, rl1, cu2, cl2, ru2, rl2, w1p, w2p)
    return consts, dims


# ---------------------------------------------------------------------------
# Fused whole-network Pallas kernel (one grid step == one sample)
# ---------------------------------------------------------------------------
def _cnn_kernel(x_ref, m1_ref, m2_ref, cu1_ref, cl1_ref, ru1_ref, rl1_ref,
                cu2_ref, cl2_ref, ru2_ref, rl2_ref, w1p_ref, w2p_ref,
                o_ref, xpad1_ref, xpad2_ref, *, dims):
    (Cin, C1, C2, KH, KW, H, W, H1, W1, P1h, P1w, H2, W2, P2h, P2w) = dims
    f32 = jnp.float32

    def mm(a, b):
        return jnp.dot(a, b, preferred_element_type=f32)

    # -- zero-pad the input image into VMEM scratch (layout [Hp, Wp*Cin]) --------
    xpad1_ref[...] = jnp.zeros_like(xpad1_ref)
    xpad1_ref[1:H + 1, Cin:(W + 1) * Cin] = x_ref[0]

    # -- conv1 + ReLU: 25 shifted matmuls against block-diagonal packed weights --
    acc1 = jnp.zeros((H1, W1 * C1), f32)
    for kh in range(KH):
        for kw in range(KW):
            xs = xpad1_ref[kh:kh + H1, kw * Cin:(kw + W1) * Cin]
            acc1 = acc1 + mm(xs, m1_ref[kh * KW + kw])
    y1 = jnp.maximum(acc1, 0.0)                                   # [H1, W1*C1]

    # -- maxpool1 (k=2, s=2, pad=1): 0/1 selection matmuls + elementwise max -----
    z1 = jnp.maximum(mm(y1, cu1_ref[...]), mm(y1, cl1_ref[...]))  # [H1, P1w*C1]
    p1 = jnp.maximum(mm(ru1_ref[...], z1), mm(rl1_ref[...], z1))  # [P1h, P1w*C1]

    # -- zero-pad pool1 output for conv2 ------------------------------------------
    xpad2_ref[...] = jnp.zeros_like(xpad2_ref)
    xpad2_ref[1:P1h + 1, C1:(P1w + 1) * C1] = p1

    # -- conv2 + ReLU --------------------------------------------------------------
    acc2 = jnp.zeros((H2, W2 * C2), f32)
    for kh in range(KH):
        for kw in range(KW):
            xs = xpad2_ref[kh:kh + H2, kw * C1:(kw + W2) * C1]
            acc2 = acc2 + mm(xs, m2_ref[kh * KW + kw])
    y2 = jnp.maximum(acc2, 0.0)                                   # [H2, W2*C2]

    # -- maxpool2 ------------------------------------------------------------------
    z2 = jnp.maximum(mm(y2, cu2_ref[...]), mm(y2, cl2_ref[...]))  # [H2, P2w*C2]
    p2 = jnp.maximum(mm(ru2_ref[...], z2), mm(rl2_ref[...], z2))  # [P2h, P2w*C2]

    # -- flatten + fc1 + ReLU + fc2 (weights pre-packed to the in-kernel layout) --
    fc1 = mm(p2[0:1, :], w1p_ref[0])
    for h in range(1, P2h):
        fc1 = fc1 + mm(p2[h:h + 1, :], w1p_ref[h])
    fc1 = jnp.maximum(fc1, 0.0)                                   # [1, nh]
    o_ref[0] = mm(fc1, w2p_ref[...])                              # [1, ncls]


def cnn_forward(x_nchw, consts, dims):
    (Cin, C1, C2, KH, KW, H, W, H1, W1, P1h, P1w, H2, W2, P2h, P2w) = dims
    (m1, m2, cu1, cl1, ru1, rl1, cu2, cl2, ru2, rl2, w1p, w2p) = consts
    N = x_nchw.shape[0]
    ncls = w2p.shape[1]

    # NCHW -> [N, H, W*Cin] (channels interleaved on the lane axis); free for Cin==1.
    x2d = jnp.transpose(x_nchw, (0, 2, 3, 1)).reshape(N, H, W * Cin)

    def const_spec(a):
        nd = a.ndim
        return pl.BlockSpec(a.shape, lambda n: (0,) * nd)

    out = pl.pallas_call(
        partial(_cnn_kernel, dims=dims),
        out_shape=jax.ShapeDtypeStruct((N, 1, ncls), jnp.float32),
        grid=(N,),
        in_specs=[pl.BlockSpec((1, H, W * Cin), lambda n: (n, 0, 0))]
                 + [const_spec(a) for a in consts],
        out_specs=pl.BlockSpec((1, 1, ncls), lambda n: (n, 0, 0)),
        scratch_shapes=[
            pltpu.VMEM((H + 2, (W + 2) * Cin), jnp.float32),       # padded input
            pltpu.VMEM((P1h + 2, (P1w + 2) * C1), jnp.float32),    # padded pool1 out
        ],
        compiler_params=pltpu.CompilerParams(
            dimension_semantics=("parallel",)),
    )(x2d, m1, m2, cu1, cl1, ru1, rl1, cu2, cl2, ru2, rl2, w1p, w2p)
    return out.reshape(N, ncls)


# ---------------------------------------------------------------------------
# Pure-JAX reference (mirrors the PyTorch forward exactly)
# ---------------------------------------------------------------------------
def cnn_reference(x_nchw, params):
    w_conv1, w_conv2, w_fc1, w_fc2 = params
    dn = ("NCHW", "OIHW", "NCHW")

    def conv(x, w):
        return lax.conv_general_dilated(
            x, w, window_strides=(1, 1), padding=((1, 1), (1, 1)),
            dimension_numbers=dn, precision=lax.Precision.HIGHEST)

    def pool(x):
        return lax.reduce_window(
            x, -jnp.inf, lax.max,
            window_dimensions=(1, 1, 2, 2), window_strides=(1, 1, 2, 2),
            padding=((0, 0), (0, 0), (1, 1), (1, 1)))

    x = jnp.maximum(conv(x_nchw, w_conv1), 0.0)
    x = pool(x)
    x = jnp.maximum(conv(x, w_conv2), 0.0)
    x = pool(x)
    x = x.reshape(x.shape[0], -1)
    x = jnp.maximum(jnp.dot(x, w_fc1.T, precision=lax.Precision.HIGHEST), 0.0)
    x = jnp.dot(x, w_fc2.T, precision=lax.Precision.HIGHEST)
    return x


# ---------------------------------------------------------------------------
if __name__ == "__main__":
    key = jax.random.PRNGKey(0)
    batch = 2
    in_channels, hidden_channels, num_hiddens, num_classes = 1, 4, 32, 10
    H = W = 28  # fc1 in_features = hidden_channels*2*7*7 implies 28x28 spatial input

    k1, k2, k3, k4, kx = jax.random.split(key, 5)
    w_conv1 = jax.random.normal(k1, (hidden_channels, in_channels, 5, 5), jnp.float32) * 0.10
    w_conv2 = jax.random.normal(k2, (hidden_channels * 2, hidden_channels, 5, 5), jnp.float32) * 0.10
    w_fc1 = jax.random.normal(k3, (num_hiddens, hidden_channels * 2 * 7 * 7), jnp.float32) * 0.05
    w_fc2 = jax.random.normal(k4, (num_classes, num_hiddens), jnp.float32) * 0.10
    params = (w_conv1, w_conv2, w_fc1, w_fc2)

    x = jax.random.normal(kx, (batch, in_channels, H, W), jnp.float32)

    # One-time host-side weight packing (outside the jitted graph).
    consts, dims = prepare_params(params, in_hw=(H, W))

    fwd = jax.jit(partial(cnn_forward, dims=dims))
    out = jax.block_until_ready(fwd(x, consts))
    assert out.shape == (batch, num_classes), out.shape

    ref = cnn_reference(x, params)
    max_err = float(jnp.max(jnp.abs(out - ref)))
    if not jnp.allclose(out, ref, atol=5e-3, rtol=2e-2):
        raise AssertionError(f"Pallas/reference mismatch, max abs diff = {max_err}")

    print("KERNEL_OK")
</pallas_src>

<mosaic_0001>
module attributes {stable_mosaic.version = 11 : i64} {
  func.func @_cnn_kernel(%arg0: i32, %arg1: memref<1x28x28xf32, #tpu.memory_space<vmem>>, %arg2: memref<25x26x104xf32, #tpu.memory_space<vmem>>, %arg3: memref<25x48x96xf32, #tpu.memory_space<vmem>>, %arg4: memref<104x56xf32, #tpu.memory_space<vmem>>, %arg5: memref<104x56xf32, #tpu.memory_space<vmem>>, %arg6: memref<14x26xf32, #tpu.memory_space<vmem>>, %arg7: memref<14x26xf32, #tpu.memory_space<vmem>>, %arg8: memref<96x56xf32, #tpu.memory_space<vmem>>, %arg9: memref<96x56xf32, #tpu.memory_space<vmem>>, %arg10: memref<7x12xf32, #tpu.memory_space<vmem>>, %arg11: memref<7x12xf32, #tpu.memory_space<vmem>>, %arg12: memref<7x56x32xf32, #tpu.memory_space<vmem>>, %arg13: memref<32x10xf32, #tpu.memory_space<vmem>>, %arg14: memref<1x1x10xf32, #tpu.memory_space<vmem>>, %arg15: memref<30x30xf32, #tpu.memory_space<vmem>>, %arg16: memref<16x64xf32, #tpu.memory_space<vmem>>) attributes {dimension_semantics = [#tpu.dimension_semantics<parallel>], iteration_bounds = array<i64: 2>, scalar_prefetch = 0 : i64, scratch_operands = 2 : i64, tpu.core_type = #tpu.core_type<tc>, window_params = [{transform_indices = @transform_0, window_bounds = array<i64: 1, 28, 28>}, {pipeline_mode = #tpu.pipeline_mode<synchronous>, transform_indices = @transform_1, window_bounds = array<i64: 25, 26, 104>}, {pipeline_mode = #tpu.pipeline_mode<synchronous>, transform_indices = @transform_2, window_bounds = array<i64: 25, 48, 96>}, {pipeline_mode = #tpu.pipeline_mode<synchronous>, transform_indices = @transform_3, window_bounds = array<i64: 104, 56>}, {pipeline_mode = #tpu.pipeline_mode<synchronous>, transform_indices = @transform_4, window_bounds = array<i64: 104, 56>}, {pipeline_mode = #tpu.pipeline_mode<synchronous>, transform_indices = @transform_5, window_bounds = array<i64: 14, 26>}, {pipeline_mode = #tpu.pipeline_mode<synchronous>, transform_indices = @transform_6, window_bounds = array<i64: 14, 26>}, {pipeline_mode = #tpu.pipeline_mode<synchronous>, transform_indices = @transform_7, window_bounds = array<i64: 96, 56>}, {pipeline_mode = #tpu.pipeline_mode<synchronous>, transform_indices = @transform_8, window_bounds = array<i64: 96, 56>}, {pipeline_mode = #tpu.pipeline_mode<synchronous>, transform_indices = @transform_9, window_bounds = array<i64: 7, 12>}, {pipeline_mode = #tpu.pipeline_mode<synchronous>, transform_indices = @transform_10, window_bounds = array<i64: 7, 12>}, {pipeline_mode = #tpu.pipeline_mode<synchronous>, transform_indices = @transform_11, window_bounds = array<i64: 7, 56, 32>}, {pipeline_mode = #tpu.pipeline_mode<synchronous>, transform_indices = @transform_12, window_bounds = array<i64: 32, 10>}, {transform_indices = @transform_13, window_bounds = array<i64: 1, 1, 10>}]} {
    %cst = arith.constant 0.000000e+00 : f32
    %0 = vector.broadcast %cst : f32 to vector<30x30xf32>
    %c0 = arith.constant 0 : index
    %c0_0 = arith.constant 0 : index
    %1 = vector.load %arg15[%c0, %c0_0] : memref<30x30xf32, #tpu.memory_space<vmem>>, vector<30x30xf32>
    tpu.vector_store %arg15[%c0, %c0_0], %0 {strides = array<i32>} : memref<30x30xf32, #tpu.memory_space<vmem>>, vector<30x30xf32>,
    %c0_1 = arith.constant 0 : index
    %c0_2 = arith.constant 0 : index
    %c0_3 = arith.constant 0 : index
    %2 = vector.load %arg1[%c0_1, %c0_2, %c0_3] : memref<1x28x28xf32, #tpu.memory_space<vmem>>, vector<1x28x28xf32>
    %3 = vector.shape_cast %2 : vector<1x28x28xf32> to vector<28x28xf32>
    %c1 = arith.constant 1 : index
    %c1_4 = arith.constant 1 : index
    %4 = vector.load %arg15[%c1, %c1_4] : memref<30x30xf32, #tpu.memory_space<vmem>>, vector<28x28xf32>
    tpu.vector_store %arg15[%c1, %c1_4], %3 {strides = array<i32>} : memref<30x30xf32, #tpu.memory_space<vmem>>, vector<28x28xf32>,
    %cst_5 = arith.constant 0.000000e+00 : f32
    %5 = vector.broadcast %cst_5 : f32 to vector<26x104xf32>
    %c0_6 = arith.constant 0 : index
    %c0_7 = arith.constant 0 : index
    %6 = vector.load %arg15[%c0_6, %c0_7] : memref<30x30xf32, #tpu.memory_space<vmem>>, vector<26x26xf32>
    %c0_8 = arith.constant 0 : index
    %c0_9 = arith.constant 0 : index
    %c0_10 = arith.constant 0 : index
    %7 = vector.load %arg2[%c0_8, %c0_9, %c0_10] : memref<25x26x104xf32, #tpu.memory_space<vmem>>, vector<1x26x104xf32>
    %8 = vector.shape_cast %7 : vector<1x26x104xf32> to vector<26x104xf32>
    %cst_11 = arith.constant dense<0.000000e+00> : vector<26x104xf32>
    %9 = tpu.matmul %6, %8, %cst_11 {dimension_numbers = #tpu.dot_dimension_numbers<[1], [0], [0], [1], [0, 0, 1, 1], [], []>} : vector<26x26xf32>, vector<26x104xf32>, vector<26x104xf32> -> vector<26x104xf32>
    %10 = arith.addf %5, %9 : vector<26x104xf32>
    %c0_12 = arith.constant 0 : index
    %c1_13 = arith.constant 1 : index
    %11 = vector.load %arg15[%c0_12, %c1_13] : memref<30x30xf32, #tpu.memory_space<vmem>>, vector<26x26xf32>
    %c1_14 = arith.constant 1 : index
    %c0_15 = arith.constant 0 : index
    %c0_16 = arith.constant 0 : index
    %12 = vector.load %arg2[%c1_14, %c0_15, %c0_16] : memref<25x26x104xf32, #tpu.memory_space<vmem>>, vector<1x26x104xf32>
    %13 = vector.shape_cast %12 : vector<1x26x104xf32> to vector<26x104xf32>
    %cst_17 = arith.constant dense<0.000000e+00> : vector<26x104xf32>
    %14 = tpu.matmul %11, %13, %cst_17 {dimension_numbers = #tpu.dot_dimension_numbers<[1], [0], [0], [1], [0, 0, 1, 1], [], []>} : vector<26x26xf32>, vector<26x104xf32>, vector<26x104xf32> -> vector<26x104xf32>
    %15 = arith.addf %10, %14 : vector<26x104xf32>
    %c0_18 = arith.constant 0 : index
    %c2 = arith.constant 2 : index
    %16 = vector.load %arg15[%c0_18, %c2] : memref<30x30xf32, #tpu.memory_space<vmem>>, vector<26x26xf32>
    %c2_19 = arith.constant 2 : index
    %c0_20 = arith.constant 0 : index
    %c0_21 = arith.constant 0 : index
    %17 = vector.load %arg2[%c2_19, %c0_20, %c0_21] : memref<25x26x104xf32, #tpu.memory_space<vmem>>, vector<1x26x104xf32>
    %18 = vector.shape_cast %17 : vector<1x26x104xf32> to vector<26x104xf32>
    %cst_22 = arith.constant dense<0.000000e+00> : vector<26x104xf32>
    %19 = tpu.matmul %16, %18, %cst_22 {dimension_numbers = #tpu.dot_dimension_numbers<[1], [0], [0], [1], [0, 0, 1, 1], [], []>} : vector<26x26xf32>, vector<26x104xf32>, vector<26x104xf32> -> vector<26x104xf32>
    %20 = arith.addf %15, %19 : vector<26x104xf32>
    %c0_23 = arith.constant 0 : index
    %c3 = arith.constant 3 : index
    %21 = vector.load %arg15[%c0_23, %c3] : memref<30x30xf32, #tpu.memory_space<vmem>>, vector<26x26xf32>
    %c3_24 = arith.constant 3 : index
    %c0_25 = arith.constant 0 : index
    %c0_26 = arith.constant 0 : index
    %22 = vector.load %arg2[%c3_24, %c0_25, %c0_26] : memref<25x26x104xf32, #tpu.memory_space<vmem>>, vector<1x26x104xf32>
    %23 = vector.shape_cast %22 : vector<1x26x104xf32> to vector<26x104xf32>
    %cst_27 = arith.constant dense<0.000000e+00> : vector<26x104xf32>
    %24 = tpu.matmul %21, %23, %cst_27 {dimension_numbers = #tpu.dot_dimension_numbers<[1], [0], [0], [1], [0, 0, 1, 1], [], []>} : vector<26x26xf32>, vector<26x104xf32>, vector<26x104xf32> -> vector<26x104xf32>
    %25 = arith.addf %20, %24 : vector<26x104xf32>
    %c0_28 = arith.constant 0 : index
    %c4 = arith.constant 4 : index
    %26 = vector.load %arg15[%c0_28, %c4] : memref<30x30xf32, #tpu.memory_space<vmem>>, vector<26x26xf32>
    %c4_29 = arith.constant 4 : index
    %c0_30 = arith.constant 0 : index
    %c0_31 = arith.constant 0 : index
    %27 = vector.load %arg2[%c4_29, %c0_30, %c0_31] : memref<25x26x104xf32, #tpu.memory_space<vmem>>, vector<1x26x104xf32>
    %28 = vector.shape_cast %27 : vector<1x26x104xf32> to vector<26x104xf32>
    %cst_32 = arith.constant dense<0.000000e+00> : vector<26x104xf32>
    %29 = tpu.matmul %26, %28, %cst_32 {dimension_numbers = #tpu.dot_dimension_numbers<[1], [0], [0], [1], [0, 0, 1, 1], [], []>} : vector<26x26xf32>, vector<26x104xf32>, vector<26x104xf32> -> vector<26x104xf32>
    %30 = arith.addf %25, %29 : vector<26x104xf32>
    %c1_33 = arith.constant 1 : index
    %c0_34 = arith.constant 0 : index
    %31 = vector.load %arg15[%c1_33, %c0_34] : memref<30x30xf32, #tpu.memory_space<vmem>>, vector<26x26xf32>
    %c5 = arith.constant 5 : index
    %c0_35 = arith.constant 0 : index
    %c0_36 = arith.constant 0 : index
    %32 = vector.load %arg2[%c5, %c0_35, %c0_36] : memref<25x26x104xf32, #tpu.memory_space<vmem>>, vector<1x26x104xf32>
    %33 = vector.shape_cast %32 : vector<1x26x104xf32> to vector<26x104xf32>
    %cst_37 = arith.constant dense<0.000000e+00> : vector<26x104xf32>
    %34 = tpu.matmul %31, %33, %cst_37 {dimension_numbers = #tpu.dot_dimension_numbers<[1], [0], [0], [1], [0, 0, 1, 1], [], []>} : vector<26x26xf32>, vector<26x104xf32>, vector<26x104xf32> -> vector<26x104xf32>
    %35 = arith.addf %30, %34 : vector<26x104xf32>
    %c1_38 = arith.constant 1 : index
    %c1_39 = arith.constant 1 : index
    %36 = vector.load %arg15[%c1_38, %c1_39] : memref<30x30xf32, #tpu.memory_space<vmem>>, vector<26x26xf32>
    %c6 = arith.constant 6 : index
    %c0_40 = arith.constant 0 : index
    %c0_41 = arith.constant 0 : index
    %37 = vector.load %arg2[%c6, %c0_40, %c0_41] : memref<25x26x104xf32, #tpu.memory_space<vmem>>, vector<1x26x104xf32>
    %38 = vector.shape_cast %37 : vector<1x26x104xf32> to vector<26x104xf32>
    %cst_42 = arith.constant dense<0.000000e+00> : vector<26x104xf32>
    %39 = tpu.matmul %36, %38, %cst_42 {dimension_numbers = #tpu.dot_dimension_numbers<[1], [0], [0], [1], [0, 0, 1, 1], [], []>} : vector<26x26xf32>, vector<26x104xf32>, vector<26x104xf32> -> vector<26x104xf32>
    %40 = arith.addf %35, %39 : vector<26x104xf32>
    %c1_43 = arith.constant 1 : index
    %c2_44 = arith.constant 2 : index
    %41 = vector.load %arg15[%c1_43, %c2_44] : memref<30x30xf32, #tpu.memory_space<vmem>>, vector<26x26xf32>
    %c7 = arith.constant 7 : index
    %c0_45 = arith.constant 0 : index
    %c0_46 = arith.constant 0 : index
    %42 = vector.load %arg2[%c7, %c0_45, %c0_46] : memref<25x26x104xf32, #tpu.memory_space<vmem>>, vector<1x26x104xf32>
    %43 = vector.shape_cast %42 : vector<1x26x104xf32> to vector<26x104xf32>
    %cst_47 = arith.constant dense<0.000000e+00> : vector<26x104xf32>
    %44 = tpu.matmul %41, %43, %cst_47 {dimension_numbers = #tpu.dot_dimension_numbers<[1], [0], [0], [1], [0, 0, 1, 1], [], []>} : vector<26x26xf32>, vector<26x104xf32>, vector<26x104xf32> -> vector<26x104xf32>
    %45 = arith.addf %40, %44 : vector<26x104xf32>
    %c1_48 = arith.constant 1 : index
    %c3_49 = arith.constant 3 : index
    %46 = vector.load %arg15[%c1_48, %c3_49] : memref<30x30xf32, #tpu.memory_space<vmem>>, vector<26x26xf32>
    %c8 = arith.constant 8 : index
    %c0_50 = arith.constant 0 : index
    %c0_51 = arith.constant 0 : index
    %47 = vector.load %arg2[%c8, %c0_50, %c0_51] : memref<25x26x104xf32, #tpu.memory_space<vmem>>, vector<1x26x104xf32>
    %48 = vector.shape_cast %47 : vector<1x26x104xf32> to vector<26x104xf32>
    %cst_52 = arith.constant dense<0.000000e+00> : vector<26x104xf32>
    %49 = tpu.matmul %46, %48, %cst_52 {dimension_numbers = #tpu.dot_dimension_numbers<[1], [0], [0], [1], [0, 0, 1, 1], [], []>} : vector<26x26xf32>, vector<26x104xf32>, vector<26x104xf32> -> vector<26x104xf32>
    %50 = arith.addf %45, %49 : vector<26x104xf32>
    %c1_53 = arith.constant 1 : index
    %c4_54 = arith.constant 4 : index
    %51 = vector.load %arg15[%c1_53, %c4_54] : memref<30x30xf32, #tpu.memory_space<vmem>>, vector<26x26xf32>
    %c9 = arith.constant 9 : index
    %c0_55 = arith.constant 0 : index
    %c0_56 = arith.constant 0 : index
    %52 = vector.load %arg2[%c9, %c0_55, %c0_56] : memref<25x26x104xf32, #tpu.memory_space<vmem>>, vector<1x26x104xf32>
    %53 = vector.shape_cast %52 : vector<1x26x104xf32> to vector<26x104xf32>
    %cst_57 = arith.constant dense<0.000000e+00> : vector<26x104xf32>
    %54 = tpu.matmul %51, %53, %cst_57 {dimension_numbers = #tpu.dot_dimension_numbers<[1], [0], [0], [1], [0, 0, 1, 1], [], []>} : vector<26x26xf32>, vector<26x104xf32>, vector<26x104xf32> -> vector<26x104xf32>
    %55 = arith.addf %50, %54 : vector<26x104xf32>
    %c2_58 = arith.constant 2 : index
    %c0_59 = arith.constant 0 : index
    %56 = vector.load %arg15[%c2_58, %c0_59] : memref<30x30xf32, #tpu.memory_space<vmem>>, vector<26x26xf32>
    %c10 = arith.constant 10 : index
    %c0_60 = arith.constant 0 : index
    %c0_61 = arith.constant 0 : index
    %57 = vector.load %arg2[%c10, %c0_60, %c0_61] : memref<25x26x104xf32, #tpu.memory_space<vmem>>, vector<1x26x104xf32>
    %58 = vector.shape_cast %57 : vector<1x26x104xf32> to vector<26x104xf32>
    %cst_62 = arith.constant dense<0.000000e+00> : vector<26x104xf32>
    %59 = tpu.matmul %56, %58, %cst_62 {dimension_numbers = #tpu.dot_dimension_numbers<[1], [0], [0], [1], [0, 0, 1, 1], [], []>} : vector<26x26xf32>, vector<26x104xf32>, vector<26x104xf32> -> vector<26x104xf32>
    %60 = arith.addf %55, %59 : vector<26x104xf32>
    %c2_63 = arith.constant 2 : index
    %c1_64 = arith.constant 1 : index
    %61 = vector.load %arg15[%c2_63, %c1_64] : memref<30x30xf32, #tpu.memory_space<vmem>>, vector<26x26xf32>
    %c11 = arith.constant 11 : index
    %c0_65 = arith.constant 0 : index
    %c0_66 = arith.constant 0 : index
    %62 = vector.load %arg2[%c11, %c0_65, %c0_66] : memref<25x26x104xf32, #tpu.memory_space<vmem>>, vector<1x26x104xf32>
    %63 = vector.shape_cast %62 : vector<1x26x104xf32> to vector<26x104xf32>
    %cst_67 = arith.constant dense<0.000000e+00> : vector<26x104xf32>
    %64 = tpu.matmul %61, %63, %cst_67 {dimension_numbers = #tpu.dot_dimension_numbers<[1], [0], [0], [1], [0, 0, 1, 1], [], []>} : vector<26x26xf32>, vector<26x104xf32>, vector<26x104xf32> -> vector<26x104xf32>
    %65 = arith.addf %60, %64 : vector<26x104xf32>
    %c2_68 = arith.constant 2 : index
    %c2_69 = arith.constant 2 : index
    %66 = vector.load %arg15[%c2_68, %c2_69] : memref<30x30xf32, #tpu.memory_space<vmem>>, vector<26x26xf32>
    %c12 = arith.constant 12 : index
    %c0_70 = arith.constant 0 : index
    %c0_71 = arith.constant 0 : index
    %67 = vector.load %arg2[%c12, %c0_70, %c0_71] : memref<25x26x104xf32, #tpu.memory_space<vmem>>, vector<1x26x104xf32>
    %68 = vector.shape_cast %67 : vector<1x26x104xf32> to vector<26x104xf32>
    %cst_72 = arith.constant dense<0.000000e+00> : vector<26x104xf32>
    %69 = tpu.matmul %66, %68, %cst_72 {dimension_numbers = #tpu.dot_dimension_numbers<[1], [0], [0], [1], [0, 0, 1, 1], [], []>} : vector<26x26xf32>, vector<26x104xf32>, vector<26x104xf32> -> vector<26x104xf32>
    %70 = arith.addf %65, %69 : vector<26x104xf32>
    %c2_73 = arith.constant 2 : index
    %c3_74 = arith.constant 3 : index
    %71 = vector.load %arg15[%c2_73, %c3_74] : memref<30x30xf32, #tpu.memory_space<vmem>>, vector<26x26xf32>
    %c13 = arith.constant 13 : index
    %c0_75 = arith.constant 0 : index
    %c0_76 = arith.constant 0 : index
    %72 = vector.load %arg2[%c13, %c0_75, %c0_76] : memref<25x26x104xf32, #tpu.memory_space<vmem>>, vector<1x26x104xf32>
    %73 = vector.shape_cast %72 : vector<1x26x104xf32> to vector<26x104xf32>
    %cst_77 = arith.constant dense<0.000000e+00> : vector<26x104xf32>
    %74 = tpu.matmul %71, %73, %cst_77 {dimension_numbers = #tpu.dot_dimension_numbers<[1], [0], [0], [1], [0, 0, 1, 1], [], []>} : vector<26x26xf32>, vector<26x104xf32>, vector<26x104xf32> -> vector<26x104xf32>
    %75 = arith.addf %70, %74 : vector<26x104xf32>
    %c2_78 = arith.constant 2 : index
    %c4_79 = arith.constant 4 : index
    %76 = vector.load %arg15[%c2_78, %c4_79] : memref<30x30xf32, #tpu.memory_space<vmem>>, vector<26x26xf32>
    %c14 = arith.constant 14 : index
    %c0_80 = arith.constant 0 : index
    %c0_81 = arith.constant 0 : index
    %77 = vector.load %arg2[%c14, %c0_80, %c0_81] : memref<25x26x104xf32, #tpu.memory_space<vmem>>, vector<1x26x104xf32>
    %78 = vector.shape_cast %77 : vector<1x26x104xf32> to vector<26x104xf32>
    %cst_82 = arith.constant dense<0.000000e+00> : vector<26x104xf32>
    %79 = tpu.matmul %76, %78, %cst_82 {dimension_numbers = #tpu.dot_dimension_numbers<[1], [0], [0], [1], [0, 0, 1, 1], [], []>} : vector<26x26xf32>, vector<26x104xf32>, vector<26x104xf32> -> vector<26x104xf32>
    %80 = arith.addf %75, %79 : vector<26x104xf32>
    %c3_83 = arith.constant 3 : index
    %c0_84 = arith.constant 0 : index
    %81 = vector.load %arg15[%c3_83, %c0_84] : memref<30x30xf32, #tpu.memory_space<vmem>>, vector<26x26xf32>
    %c15 = arith.constant 15 : index
    %c0_85 = arith.constant 0 : index
    %c0_86 = arith.constant 0 : index
    %82 = vector.load %arg2[%c15, %c0_85, %c0_86] : memref<25x26x104xf32, #tpu.memory_space<vmem>>, vector<1x26x104xf32>
    %83 = vector.shape_cast %82 : vector<1x26x104xf32> to vector<26x104xf32>
    %cst_87 = arith.constant dense<0.000000e+00> : vector<26x104xf32>
    %84 = tpu.matmul %81, %83, %cst_87 {dimension_numbers = #tpu.dot_dimension_numbers<[1], [0], [0], [1], [0, 0, 1, 1], [], []>} : vector<26x26xf32>, vector<26x104xf32>, vector<26x104xf32> -> vector<26x104xf32>
    %85 = arith.addf %80, %84 : vector<26x104xf32>
    %c3_88 = arith.constant 3 : index
    %c1_89 = arith.constant 1 : index
    %86 = vector.load %arg15[%c3_88, %c1_89] : memref<30x30xf32, #tpu.memory_space<vmem>>, vector<26x26xf32>
    %c16 = arith.constant 16 : index
    %c0_90 = arith.constant 0 : index
    %c0_91 = arith.constant 0 : index
    %87 = vector.load %arg2[%c16, %c0_90, %c0_91] : memref<25x26x104xf32, #tpu.memory_space<vmem>>, vector<1x26x104xf32>
    %88 = vector.shape_cast %87 : vector<1x26x104xf32> to vector<26x104xf32>
    %cst_92 = arith.constant dense<0.000000e+00> : vector<26x104xf32>
    %89 = tpu.matmul %86, %88, %cst_92 {dimension_numbers = #tpu.dot_dimension_numbers<[1], [0], [0], [1], [0, 0, 1, 1], [], []>} : vector<26x26xf32>, vector<26x104xf32>, vector<26x104xf32> -> vector<26x104xf32>
    %90 = arith.addf %85, %89 : vector<26x104xf32>
    %c3_93 = arith.constant 3 : index
    %c2_94 = arith.constant 2 : index
    %91 = vector.load %arg15[%c3_93, %c2_94] : memref<30x30xf32, #tpu.memory_space<vmem>>, vector<26x26xf32>
    %c17 = arith.constant 17 : index
    %c0_95 = arith.constant 0 : index
    %c0_96 = arith.constant 0 : index
    %92 = vector.load %arg2[%c17, %c0_95, %c0_96] : memref<25x26x104xf32, #tpu.memory_space<vmem>>, vector<1x26x104xf32>
    %93 = vector.shape_cast %92 : vector<1x26x104xf32> to vector<26x104xf32>
    %cst_97 = arith.constant dense<0.000000e+00> : vector<26x104xf32>
    %94 = tpu.matmul %91, %93, %cst_97 {dimension_numbers = #tpu.dot_dimension_numbers<[1], [0], [0], [1], [0, 0, 1, 1], [], []>} : vector<26x26xf32>, vector<26x104xf32>, vector<26x104xf32> -> vector<26x104xf32>
    %95 = arith.addf %90, %94 : vector<26x104xf32>
    %c3_98 = arith.constant 3 : index
    %c3_99 = arith.constant 3 : index
    %96 = vector.load %arg15[%c3_98, %c3_99] : memref<30x30xf32, #tpu.memory_space<vmem>>, vector<26x26xf32>
    %c18 = arith.constant 18 : index
    %c0_100 = arith.constant 0 : index
    %c0_101 = arith.constant 0 : index
    %97 = vector.load %arg2[%c18, %c0_100, %c0_101] : memref<25x26x104xf32, #tpu.memory_space<vmem>>, vector<1x26x104xf32>
    %98 = vector.shape_cast %97 : vector<1x26x104xf32> to vector<26x104xf32>
    %cst_102 = arith.constant dense<0.000000e+00> : vector<26x104xf32>
    %99 = tpu.matmul %96, %98, %cst_102 {dimension_numbers = #tpu.dot_dimension_numbers<[1], [0], [0], [1], [0, 0, 1, 1], [], []>} : vector<26x26xf32>, vector<26x104xf32>, vector<26x104xf32> -> vector<26x104xf32>
    %100 = arith.addf %95, %99 : vector<26x104xf32>
    %c3_103 = arith.constant 3 : index
    %c4_104 = arith.constant 4 : index
    %101 = vector.load %arg15[%c3_103, %c4_104] : memref<30x30xf32, #tpu.memory_space<vmem>>, vector<26x26xf32>
    %c19 = arith.constant 19 : index
    %c0_105 = arith.constant 0 : index
    %c0_106 = arith.constant 0 : index
    %102 = vector.load %arg2[%c19, %c0_105, %c0_106] : memref<25x26x104xf32, #tpu.memory_space<vmem>>, vector<1x26x104xf32>
    %103 = vector.shape_cast %102 : vector<1x26x104xf32> to vector<26x104xf32>
    %cst_107 = arith.constant dense<0.000000e+00> : vector<26x104xf32>
    %104 = tpu.matmul %101, %103, %cst_107 {dimension_numbers = #tpu.dot_dimension_numbers<[1], [0], [0], [1], [0, 0, 1, 1], [], []>} : vector<26x26xf32>, vector<26x104xf32>, vector<26x104xf32> -> vector<26x104xf32>
    %105 = arith.addf %100, %104 : vector<26x104xf32>
    %c4_108 = arith.constant 4 : index
    %c0_109 = arith.constant 0 : index
    %106 = vector.load %arg15[%c4_108, %c0_109] : memref<30x30xf32, #tpu.memory_space<vmem>>, vector<26x26xf32>
    %c20 = arith.constant 20 : index
    %c0_110 = arith.constant 0 : index
    %c0_111 = arith.constant 0 : index
    %107 = vector.load %arg2[%c20, %c0_110, %c0_111] : memref<25x26x104xf32, #tpu.memory_space<vmem>>, vector<1x26x104xf32>
    %108 = vector.shape_cast %107 : vector<1x26x104xf32> to vector<26x104xf32>
    %cst_112 = arith.constant dense<0.000000e+00> : vector<26x104xf32>
    %109 = tpu.matmul %106, %108, %cst_112 {dimension_numbers = #tpu.dot_dimension_numbers<[1], [0], [0], [1], [0, 0, 1, 1], [], []>} : vector<26x26xf32>, vector<26x104xf32>, vector<26x104xf32> -> vector<26x104xf32>
    %110 = arith.addf %105, %109 : vector<26x104xf32>
    %c4_113 = arith.constant 4 : index
    %c1_114 = arith.constant 1 : index
    %111 = vector.load %arg15[%c4_113, %c1_114] : memref<30x30xf32, #tpu.memory_space<vmem>>, vector<26x26xf32>
    %c21 = arith.constant 21 : index
    %c0_115 = arith.constant 0 : index
    %c0_116 = arith.constant 0 : index
    %112 = vector.load %arg2[%c21, %c0_115, %c0_116] : memref<25x26x104xf32, #tpu.memory_space<vmem>>, vector<1x26x104xf32>
    %113 = vector.shape_cast %112 : vector<1x26x104xf32> to vector<26x104xf32>
    %cst_117 = arith.constant dense<0.000000e+00> : vector<26x104xf32>
    %114 = tpu.matmul %111, %113, %cst_117 {dimension_numbers = #tpu.dot_dimension_numbers<[1], [0], [0], [1], [0, 0, 1, 1], [], []>} : vector<26x26xf32>, vector<26x104xf32>, vector<26x104xf32> -> vector<26x104xf32>
    %115 = arith.addf %110, %114 : vector<26x104xf32>
    %c4_118 = arith.constant 4 : index
    %c2_119 = arith.constant 2 : index
    %116 = vector.load %arg15[%c4_118, %c2_119] : memref<30x30xf32, #tpu.memory_space<vmem>>, vector<26x26xf32>
    %c22 = arith.constant 22 : index
    %c0_120 = arith.constant 0 : index
    %c0_121 = arith.constant 0 : index
    %117 = vector.load %arg2[%c22, %c0_120, %c0_121] : memref<25x26x104xf32, #tpu.memory_space<vmem>>, vector<1x26x104xf32>
    %118 = vector.shape_cast %117 : vector<1x26x104xf32> to vector<26x104xf32>
    %cst_122 = arith.constant dense<0.000000e+00> : vector<26x104xf32>
    %119 = tpu.matmul %116, %118, %cst_122 {dimension_numbers = #tpu.dot_dimension_numbers<[1], [0], [0], [1], [0, 0, 1, 1], [], []>} : vector<26x26xf32>, vector<26x104xf32>, vector<26x104xf32> -> vector<26x104xf32>
    %120 = arith.addf %115, %119 : vector<26x104xf32>
    %c4_123 = arith.constant 4 : index
    %c3_124 = arith.constant 3 : index
    %121 = vector.load %arg15[%c4_123, %c3_124] : memref<30x30xf32, #tpu.memory_space<vmem>>, vector<26x26xf32>
    %c23 = arith.constant 23 : index
    %c0_125 = arith.constant 0 : index
    %c0_126 = arith.constant 0 : index
    %122 = vector.load %arg2[%c23, %c0_125, %c0_126] : memref<25x26x104xf32, #tpu.memory_space<vmem>>, vector<1x26x104xf32>
    %123 = vector.shape_cast %122 : vector<1x26x104xf32> to vector<26x104xf32>
    %cst_127 = arith.constant dense<0.000000e+00> : vector<26x104xf32>
    %124 = tpu.matmul %121, %123, %cst_127 {dimension_numbers = #tpu.dot_dimension_numbers<[1], [0], [0], [1], [0, 0, 1, 1], [], []>} : vector<26x26xf32>, vector<26x104xf32>, vector<26x104xf32> -> vector<26x104xf32>
    %125 = arith.addf %120, %124 : vector<26x104xf32>
    %c4_128 = arith.constant 4 : index
    %c4_129 = arith.constant 4 : index
    %126 = vector.load %arg15[%c4_128, %c4_129] : memref<30x30xf32, #tpu.memory_space<vmem>>, vector<26x26xf32>
    %c24 = arith.constant 24 : index
    %c0_130 = arith.constant 0 : index
    %c0_131 = arith.constant 0 : index
    %127 = vector.load %arg2[%c24, %c0_130, %c0_131] : memref<25x26x104xf32, #tpu.memory_space<vmem>>, vector<1x26x104xf32>
    %128 = vector.shape_cast %127 : vector<1x26x104xf32> to vector<26x104xf32>
    %cst_132 = arith.constant dense<0.000000e+00> : vector<26x104xf32>
    %129 = tpu.matmul %126, %128, %cst_132 {dimension_numbers = #tpu.dot_dimension_numbers<[1], [0], [0], [1], [0, 0, 1, 1], [], []>} : vector<26x26xf32>, vector<26x104xf32>, vector<26x104xf32> -> vector<26x104xf32>
    %130 = arith.addf %125, %129 : vector<26x104xf32>
    %cst_133 = arith.constant 0.000000e+00 : f32
    %131 = vector.broadcast %cst_133 : f32 to vector<26x104xf32>
    %132 = arith.maximumf %130, %131 : vector<26x104xf32>
    %c0_134 = arith.constant 0 : index
    %c0_135 = arith.constant 0 : index
    %133 = vector.load %arg4[%c0_134, %c0_135] : memref<104x56xf32, #tpu.memory_space<vmem>>, vector<104x56xf32>
    %cst_136 = arith.constant dense<0.000000e+00> : vector<26x56xf32>
    %134 = tpu.matmul %132, %133, %cst_136 {dimension_numbers = #tpu.dot_dimension_numbers<[1], [0], [0], [1], [0, 0, 1, 1], [], []>} : vector<26x104xf32>, vector<104x56xf32>, vector<26x56xf32> -> vector<26x56xf32>
    %c0_137 = arith.constant 0 : index
    %c0_138 = arith.constant 0 : index
    %135 = vector.load %arg5[%c0_137, %c0_138] : memref<104x56xf32, #tpu.memory_space<vmem>>, vector<104x56xf32>
    %cst_139 = arith.constant dense<0.000000e+00> : vector<26x56xf32>
    %136 = tpu.matmul %132, %135, %cst_139 {dimension_numbers = #tpu.dot_dimension_numbers<[1], [0], [0], [1], [0, 0, 1, 1], [], []>} : vector<26x104xf32>, vector<104x56xf32>, vector<26x56xf32> -> vector<26x56xf32>
    %137 = arith.maximumf %134, %136 : vector<26x56xf32>
    %c0_140 = arith.constant 0 : index
    %c0_141 = arith.constant 0 : index
    %138 = vector.load %arg6[%c0_140, %c0_141] : memref<14x26xf32, #tpu.memory_space<vmem>>, vector<14x26xf32>
    %cst_142 = arith.constant dense<0.000000e+00> : vector<14x56xf32>
    %139 = tpu.matmul %138, %137, %cst_142 {dimension_numbers = #tpu.dot_dimension_numbers<[1], [0], [0], [1], [0, 0, 1, 1], [], []>} : vector<14x26xf32>, vector<26x56xf32>, vector<14x56xf32> -> vector<14x56xf32>
    %c0_143 = arith.constant 0 : index
    %c0_144 = arith.constant 0 : index
    %140 = vector.load %arg7[%c0_143, %c0_144] : memref<14x26xf32, #tpu.memory_space<vmem>>, vector<14x26xf32>
    %cst_145 = arith.constant dense<0.000000e+00> : vector<14x56xf32>
    %141 = tpu.matmul %140, %137, %cst_145 {dimension_numbers = #tpu.dot_dimension_numbers<[1], [0], [0], [1], [0, 0, 1, 1], [], []>} : vector<14x26xf32>, vector<26x56xf32>, vector<14x56xf32> -> vector<14x56xf32>
    %142 = arith.maximumf %139, %141 : vector<14x56xf32>
    %cst_146 = arith.constant 0.000000e+00 : f32
    %143 = vector.broadcast %cst_146 : f32 to vector<16x64xf32>
    %c0_147 = arith.constant 0 : index
    %c0_148 = arith.constant 0 : index
    %144 = vector.load %arg16[%c0_147, %c0_148] : memref<16x64xf32, #tpu.memory_space<vmem>>, vector<16x64xf32>
    tpu.vector_store %arg16[%c0_147, %c0_148], %143 {strides = array<i32>} : memref<16x64xf32, #tpu.memory_space<vmem>>, vector<16x64xf32>,
    %c1_149 = arith.constant 1 : index
    %c4_150 = arith.constant 4 : index
    %145 = vector.load %arg16[%c1_149, %c4_150] : memref<16x64xf32, #tpu.memory_space<vmem>>, vector<14x56xf32>
    tpu.vector_store %arg16[%c1_149, %c4_150], %142 {strides = array<i32>} : memref<16x64xf32, #tpu.memory_space<vmem>>, vector<14x56xf32>,
    %cst_151 = arith.constant 0.000000e+00 : f32
    %146 = vector.broadcast %cst_151 : f32 to vector<12x96xf32>
    %c0_152 = arith.constant 0 : index
    %c0_153 = arith.constant 0 : index
    %147 = vector.load %arg16[%c0_152, %c0_153] : memref<16x64xf32, #tpu.memory_space<vmem>>, vector<12x48xf32>
    %c0_154 = arith.constant 0 : index
    %c0_155 = arith.constant 0 : index
    %c0_156 = arith.constant 0 : index
    %148 = vector.load %arg3[%c0_154, %c0_155, %c0_156] : memref<25x48x96xf32, #tpu.memory_space<vmem>>, vector<1x48x96xf32>
    %149 = vector.shape_cast %148 : vector<1x48x96xf32> to vector<48x96xf32>
    %cst_157 = arith.constant dense<0.000000e+00> : vector<12x96xf32>
    %150 = tpu.matmul %147, %149, %cst_157 {dimension_numbers = #tpu.dot_dimension_numbers<[1], [0], [0], [1], [0, 0, 1, 1], [], []>} : vector<12x48xf32>, vector<48x96xf32>, vector<12x96xf32> -> vector<12x96xf32>
    %151 = arith.addf %146, %150 : vector<12x96xf32>
    %c0_158 = arith.constant 0 : index
    %c4_159 = arith.constant 4 : index
    %152 = vector.load %arg16[%c0_158, %c4_159] : memref<16x64xf32, #tpu.memory_space<vmem>>, vector<12x48xf32>
    %c1_160 = arith.constant 1 : index
    %c0_161 = arith.constant 0 : index
    %c0_162 = arith.constant 0 : index
    %153 = vector.load %arg3[%c1_160, %c0_161, %c0_162] : memref<25x48x96xf32, #tpu.memory_space<vmem>>, vector<1x48x96xf32>
    %154 = vector.shape_cast %153 : vector<1x48x96xf32> to vector<48x96xf32>
    %cst_163 = arith.constant dense<0.000000e+00> : vector<12x96xf32>
    %155 = tpu.matmul %152, %154, %cst_163 {dimension_numbers = #tpu.dot_dimension_numbers<[1], [0], [0], [1], [0, 0, 1, 1], [], []>} : vector<12x48xf32>, vector<48x96xf32>, vector<12x96xf32> -> vector<12x96xf32>
    %156 = arith.addf %151, %155 : vector<12x96xf32>
    %c0_164 = arith.constant 0 : index
    %c8_165 = arith.constant 8 : index
    %157 = vector.load %arg16[%c0_164, %c8_165] : memref<16x64xf32, #tpu.memory_space<vmem>>, vector<12x48xf32>
    %c2_166 = arith.constant 2 : index
    %c0_167 = arith.constant 0 : index
    %c0_168 = arith.constant 0 : index
    %158 = vector.load %arg3[%c2_166, %c0_167, %c0_168] : memref<25x48x96xf32, #tpu.memory_space<vmem>>, vector<1x48x96xf32>
    %159 = vector.shape_cast %158 : vector<1x48x96xf32> to vector<48x96xf32>
    %cst_169 = arith.constant dense<0.000000e+00> : vector<12x96xf32>
    %160 = tpu.matmul %157, %159, %cst_169 {dimension_numbers = #tpu.dot_dimension_numbers<[1], [0], [0], [1], [0, 0, 1, 1], [], []>} : vector<12x48xf32>, vector<48x96xf32>, vector<12x96xf32> -> vector<12x96xf32>
    %161 = arith.addf %156, %160 : vector<12x96xf32>
    %c0_170 = arith.constant 0 : index
    %c12_171 = arith.constant 12 : index
    %162 = vector.load %arg16[%c0_170, %c12_171] : memref<16x64xf32, #tpu.memory_space<vmem>>, vector<12x48xf32>
    %c3_172 = arith.constant 3 : index
    %c0_173 = arith.constant 0 : index
    %c0_174 = arith.constant 0 : index
    %163 = vector.load %arg3[%c3_172, %c0_173, %c0_174] : memref<25x48x96xf32, #tpu.memory_space<vmem>>, vector<1x48x96xf32>
    %164 = vector.shape_cast %163 : vector<1x48x96xf32> to vector<48x96xf32>
    %cst_175 = arith.constant dense<0.000000e+00> : vector<12x96xf32>
    %165 = tpu.matmul %162, %164, %cst_175 {dimension_numbers = #tpu.dot_dimension_numbers<[1], [0], [0], [1], [0, 0, 1, 1], [], []>} : vector<12x48xf32>, vector<48x96xf32>, vector<12x96xf32> -> vector<12x96xf32>
    %166 = arith.addf %161, %165 : vector<12x96xf32>
    %c0_176 = arith.constant 0 : index
    %c16_177 = arith.constant 16 : index
    %167 = vector.load %arg16[%c0_176, %c16_177] : memref<16x64xf32, #tpu.memory_space<vmem>>, vector<12x48xf32>
    %c4_178 = arith.constant 4 : index
    %c0_179 = arith.constant 0 : index
    %c0_180 = arith.constant 0 : index
    %168 = vector.load %arg3[%c4_178, %c0_179, %c0_180] : memref<25x48x96xf32, #tpu.memory_space<vmem>>, vector<1x48x96xf32>
    %169 = vector.shape_cast %168 : vector<1x48x96xf32> to vector<48x96xf32>
    %cst_181 = arith.constant dense<0.000000e+00> : vector<12x96xf32>
    %170 = tpu.matmul %167, %169, %cst_181 {dimension_numbers = #tpu.dot_dimension_numbers<[1], [0], [0], [1], [0, 0, 1, 1], [], []>} : vector<12x48xf32>, vector<48x96xf32>, vector<12x96xf32> -> vector<12x96xf32>
    %171 = arith.addf %166, %170 : vector<12x96xf32>
    %c1_182 = arith.constant 1 : index
    %c0_183 = arith.constant 0 : index
    %172 = vector.load %arg16[%c1_182, %c0_183] : memref<16x64xf32, #tpu.memory_space<vmem>>, vector<12x48xf32>
    %c5_184 = arith.constant 5 : index
    %c0_185 = arith.constant 0 : index
    %c0_186 = arith.constant 0 : index
    %173 = vector.load %arg3[%c5_184, %c0_185, %c0_186] : memref<25x48x96xf32, #tpu.memory_space<vmem>>, vector<1x48x96xf32>
    %174 = vector.shape_cast %173 : vector<1x48x96xf32> to vector<48x96xf32>
    %cst_187 = arith.constant dense<0.000000e+00> : vector<12x96xf32>
    %175 = tpu.matmul %172, %174, %cst_187 {dimension_numbers = #tpu.dot_dimension_numbers<[1], [0], [0], [1], [0, 0, 1, 1], [], []>} : vector<12x48xf32>, vector<48x96xf32>, vector<12x96xf32> -> vector<12x96xf32>
    %176 = arith.addf %171, %175 : vector<12x96xf32>
    %c1_188 = arith.constant 1 : index
    %c4_189 = arith.constant 4 : index
    %177 = vector.load %arg16[%c1_188, %c4_189] : memref<16x64xf32, #tpu.memory_space<vmem>>, vector<12x48xf32>
    %c6_190 = arith.constant 6 : index
    %c0_191 = arith.constant 0 : index
    %c0_192 = arith.constant 0 : index
    %178 = vector.load %arg3[%c6_190, %c0_191, %c0_192] : memref<25x48x96xf32, #tpu.memory_space<vmem>>, vector<1x48x96xf32>
    %179 = vector.shape_cast %178 : vector<1x48x96xf32> to vector<48x96xf32>
    %cst_193 = arith.constant dense<0.000000e+00> : vector<12x96xf32>
    %180 = tpu.matmul %177, %179, %cst_193 {dimension_numbers = #tpu.dot_dimension_numbers<[1], [0], [0], [1], [0, 0, 1, 1], [], []>} : vector<12x48xf32>, vector<48x96xf32>, vector<12x96xf32> -> vector<12x96xf32>
    %181 = arith.addf %176, %180 : vector<12x96xf32>
    %c1_194 = arith.constant 1 : index
    %c8_195 = arith.constant 8 : index
    %182 = vector.load %arg16[%c1_194, %c8_195] : memref<16x64xf32, #tpu.memory_space<vmem>>, vector<12x48xf32>
    %c7_196 = arith.constant 7 : index
    %c0_197 = arith.constant 0 : index
    %c0_198 = arith.constant 0 : index
    %183 = vector.load %arg3[%c7_196, %c0_197, %c0_198] : memref<25x48x96xf32, #tpu.memory_space<vmem>>, vector<1x48x96xf32>
    %184 = vector.shape_cast %183 : vector<1x48x96xf32> to vector<48x96xf32>
    %cst_199 = arith.constant dense<0.000000e+00> : vector<12x96xf32>
    %185 = tpu.matmul %182, %184, %cst_199 {dimension_numbers = #tpu.dot_dimension_numbers<[1], [0], [0], [1], [0, 0, 1, 1], [], []>} : vector<12x48xf32>, vector<48x96xf32>, vector<12x96xf32> -> vector<12x96xf32>
    %186 = arith.addf %181, %185 : vector<12x96xf32>
    %c1_200 = arith.constant 1 : index
    %c12_201 = arith.constant 12 : index
    %187 = vector.load %arg16[%c1_200, %c12_201] : memref<16x64xf32, #tpu.memory_space<vmem>>, vector<12x48xf32>
    %c8_202 = arith.constant 8 : index
    %c0_203 = arith.constant 0 : index
    %c0_204 = arith.constant 0 : index
    %188 = vector.load %arg3[%c8_202, %c0_203, %c0_204] : memref<25x48x96xf32, #tpu.memory_space<vmem>>, vector<1x48x96xf32>
    %189 = vector.shape_cast %188 : vector<1x48x96xf32> to vector<48x96xf32>
    %cst_205 = arith.constant dense<0.000000e+00> : vector<12x96xf32>
    %190 = tpu.matmul %187, %189, %cst_205 {dimension_numbers = #tpu.dot_dimension_numbers<[1], [0], [0], [1], [0, 0, 1, 1], [], []>} : vector<12x48xf32>, vector<48x96xf32>, vector<12x96xf32> -> vector<12x96xf32>
    %191 = arith.addf %186, %190 : vector<12x96xf32>
    %c1_206 = arith.constant 1 : index
    %c16_207 = arith.constant 16 : index
    %192 = vector.load %arg16[%c1_206, %c16_207] : memref<16x64xf32, #tpu.memory_space<vmem>>, vector<12x48xf32>
    %c9_208 = arith.constant 9 : index
    %c0_209 = arith.constant 0 : index
    %c0_210 = arith.constant 0 : index
    %193 = vector.load %arg3[%c9_208, %c0_209, %c0_210] : memref<25x48x96xf32, #tpu.memory_space<vmem>>, vector<1x48x96xf32>
    %194 = vector.shape_cast %193 : vector<1x48x96xf32> to vector<48x96xf32>
    %cst_211 = arith.constant dense<0.000000e+00> : vector<12x96xf32>
    %195 = tpu.matmul %192, %194, %cst_211 {dimension_numbers = #tpu.dot_dimension_numbers<[1], [0], [0], [1], [0, 0, 1, 1], [], []>} : vector<12x48xf32>, vector<48x96xf32>, vector<12x96xf32> -> vector<12x96xf32>
    %196 = arith.addf %191, %195 : vector<12x96xf32>
    %c2_212 = arith.constant 2 : index
    %c0_213 = arith.constant 0 : index
    %197 = vector.load %arg16[%c2_212, %c0_213] : memref<16x64xf32, #tpu.memory_space<vmem>>, vector<12x48xf32>
    %c10_214 = arith.constant 10 : index
    %c0_215 = arith.constant 0 : index
    %c0_216 = arith.constant 0 : index
    %198 = vector.load %arg3[%c10_214, %c0_215, %c0_216] : memref<25x48x96xf32, #tpu.memory_space<vmem>>, vector<1x48x96xf32>
    %199 = vector.shape_cast %198 : vector<1x48x96xf32> to vector<48x96xf32>
    %cst_217 = arith.constant dense<0.000000e+00> : vector<12x96xf32>
    %200 = tpu.matmul %197, %199, %cst_217 {dimension_numbers = #tpu.dot_dimension_numbers<[1], [0], [0], [1], [0, 0, 1, 1], [], []>} : vector<12x48xf32>, vector<48x96xf32>, vector<12x96xf32> -> vector<12x96xf32>
    %201 = arith.addf %196, %200 : vector<12x96xf32>
    %c2_218 = arith.constant 2 : index
    %c4_219 = arith.constant 4 : index
    %202 = vector.load %arg16[%c2_218, %c4_219] : memref<16x64xf32, #tpu.memory_space<vmem>>, vector<12x48xf32>
    %c11_220 = arith.constant 11 : index
    %c0_221 = arith.constant 0 : index
    %c0_222 = arith.constant 0 : index
    %203 = vector.load %arg3[%c11_220, %c0_221, %c0_222] : memref<25x48x96xf32, #tpu.memory_space<vmem>>, vector<1x48x96xf32>
    %204 = vector.shape_cast %203 : vector<1x48x96xf32> to vector<48x96xf32>
    %cst_223 = arith.constant dense<0.000000e+00> : vector<12x96xf32>
    %205 = tpu.matmul %202, %204, %cst_223 {dimension_numbers = #tpu.dot_dimension_numbers<[1], [0], [0], [1], [0, 0, 1, 1], [], []>} : vector<12x48xf32>, vector<48x96xf32>, vector<12x96xf32> -> vector<12x96xf32>
    %206 = arith.addf %201, %205 : vector<12x96xf32>
    %c2_224 = arith.constant 2 : index
    %c8_225 = arith.constant 8 : index
    %207 = vector.load %arg16[%c2_224, %c8_225] : memref<16x64xf32, #tpu.memory_space<vmem>>, vector<12x48xf32>
    %c12_226 = arith.constant 12 : index
    %c0_227 = arith.constant 0 : index
    %c0_228 = arith.constant 0 : index
    %208 = vector.load %arg3[%c12_226, %c0_227, %c0_228] : memref<25x48x96xf32, #tpu.memory_space<vmem>>, vector<1x48x96xf32>
    %209 = vector.shape_cast %208 : vector<1x48x96xf32> to vector<48x96xf32>
    %cst_229 = arith.constant dense<0.000000e+00> : vector<12x96xf32>
    %210 = tpu.matmul %207, %209, %cst_229 {dimension_numbers = #tpu.dot_dimension_numbers<[1], [0], [0], [1], [0, 0, 1, 1], [], []>} : vector<12x48xf32>, vector<48x96xf32>, vector<12x96xf32> -> vector<12x96xf32>
    %211 = arith.addf %206, %210 : vector<12x96xf32>
    %c2_230 = arith.constant 2 : index
    %c12_231 = arith.constant 12 : index
    %212 = vector.load %arg16[%c2_230, %c12_231] : memref<16x64xf32, #tpu.memory_space<vmem>>, vector<12x48xf32>
    %c13_232 = arith.constant 13 : index
    %c0_233 = arith.constant 0 : index
    %c0_234 = arith.constant 0 : index
    %213 = vector.load %arg3[%c13_232, %c0_233, %c0_234] : memref<25x48x96xf32, #tpu.memory_space<vmem>>, vector<1x48x96xf32>
    %214 = vector.shape_cast %213 : vector<1x48x96xf32> to vector<48x96xf32>
    %cst_235 = arith.constant dense<0.000000e+00> : vector<12x96xf32>
    %215 = tpu.matmul %212, %214, %cst_235 {dimension_numbers = #tpu.dot_dimension_numbers<[1], [0], [0], [1], [0, 0, 1, 1], [], []>} : vector<12x48xf32>, vector<48x96xf32>, vector<12x96xf32> -> vector<12x96xf32>
    %216 = arith.addf %211, %215 : vector<12x96xf32>
    %c2_236 = arith.constant 2 : index
    %c16_237 = arith.constant 16 : index
    %217 = vector.load %arg16[%c2_236, %c16_237] : memref<16x64xf32, #tpu.memory_space<vmem>>, vector<12x48xf32>
    %c14_238 = arith.constant 14 : index
    %c0_239 = arith.constant 0 : index
    %c0_240 = arith.constant 0 : index
    %218 = vector.load %arg3[%c14_238, %c0_239, %c0_240] : memref<25x48x96xf32, #tpu.memory_space<vmem>>, vector<1x48x96xf32>
    %219 = vector.shape_cast %218 : vector<1x48x96xf32> to vector<48x96xf32>
    %cst_241 = arith.constant dense<0.000000e+00> : vector<12x96xf32>
    %220 = tpu.matmul %217, %219, %cst_241 {dimension_numbers = #tpu.dot_dimension_numbers<[1], [0], [0], [1], [0, 0, 1, 1], [], []>} : vector<12x48xf32>, vector<48x96xf32>, vector<12x96xf32> -> vector<12x96xf32>
    %221 = arith.addf %216, %220 : vector<12x96xf32>
    %c3_242 = arith.constant 3 : index
    %c0_243 = arith.constant 0 : index
    %222 = vector.load %arg16[%c3_242, %c0_243] : memref<16x64xf32, #tpu.memory_space<vmem>>, vector<12x48xf32>
    %c15_244 = arith.constant 15 : index
    %c0_245 = arith.constant 0 : index
    %c0_246 = arith.constant 0 : index
    %223 = vector.load %arg3[%c15_244, %c0_245, %c0_246] : memref<25x48x96xf32, #tpu.memory_space<vmem>>, vector<1x48x96xf32>
    %224 = vector.shape_cast %223 : vector<1x48x96xf32> to vector<48x96xf32>
    %cst_247 = arith.constant dense<0.000000e+00> : vector<12x96xf32>
    %225 = tpu.matmul %222, %224, %cst_247 {dimension_numbers = #tpu.dot_dimension_numbers<[1], [0], [0], [1], [0, 0, 1, 1], [], []>} : vector<12x48xf32>, vector<48x96xf32>, vector<12x96xf32> -> vector<12x96xf32>
    %226 = arith.addf %221, %225 : vector<12x96xf32>
    %c3_248 = arith.constant 3 : index
    %c4_249 = arith.constant 4 : index
    %227 = vector.load %arg16[%c3_248, %c4_249] : memref<16x64xf32, #tpu.memory_space<vmem>>, vector<12x48xf32>
    %c16_250 = arith.constant 16 : index
    %c0_251 = arith.constant 0 : index
    %c0_252 = arith.constant 0 : index
    %228 = vector.load %arg3[%c16_250, %c0_251, %c0_252] : memref<25x48x96xf32, #tpu.memory_space<vmem>>, vector<1x48x96xf32>
    %229 = vector.shape_cast %228 : vector<1x48x96xf32> to vector<48x96xf32>
    %cst_253 = arith.constant dense<0.000000e+00> : vector<12x96xf32>
    %230 = tpu.matmul %227, %229, %cst_253 {dimension_numbers = #tpu.dot_dimension_numbers<[1], [0], [0], [1], [0, 0, 1, 1], [], []>} : vector<12x48xf32>, vector<48x96xf32>, vector<12x96xf32> -> vector<12x96xf32>
    %231 = arith.addf %226, %230 : vector<12x96xf32>
    %c3_254 = arith.constant 3 : index
    %c8_255 = arith.constant 8 : index
    %232 = vector.load %arg16[%c3_254, %c8_255] : memref<16x64xf32, #tpu.memory_space<vmem>>, vector<12x48xf32>
    %c17_256 = arith.constant 17 : index
    %c0_257 = arith.constant 0 : index
    %c0_258 = arith.constant 0 : index
    %233 = vector.load %arg3[%c17_256, %c0_257, %c0_258] : memref<25x48x96xf32, #tpu.memory_space<vmem>>, vector<1x48x96xf32>
    %234 = vector.shape_cast %233 : vector<1x48x96xf32> to vector<48x96xf32>
    %cst_259 = arith.constant dense<0.000000e+00> : vector<12x96xf32>
    %235 = tpu.matmul %232, %234, %cst_259 {dimension_numbers = #tpu.dot_dimension_numbers<[1], [0], [0], [1], [0, 0, 1, 1], [], []>} : vector<12x48xf32>, vector<48x96xf32>, vector<12x96xf32> -> vector<12x96xf32>
    %236 = arith.addf %231, %235 : vector<12x96xf32>
    %c3_260 = arith.constant 3 : index
    %c12_261 = arith.constant 12 : index
    %237 = vector.load %arg16[%c3_260, %c12_261] : memref<16x64xf32, #tpu.memory_space<vmem>>, vector<12x48xf32>
    %c18_262 = arith.constant 18 : index
    %c0_263 = arith.constant 0 : index
    %c0_264 = arith.constant 0 : index
    %238 = vector.load %arg3[%c18_262, %c0_263, %c0_264] : memref<25x48x96xf32, #tpu.memory_space<vmem>>, vector<1x48x96xf32>
    %239 = vector.shape_cast %238 : vector<1x48x96xf32> to vector<48x96xf32>
    %cst_265 = arith.constant dense<0.000000e+00> : vector<12x96xf32>
    %240 = tpu.matmul %237, %239, %cst_265 {dimension_numbers = #tpu.dot_dimension_numbers<[1], [0], [0], [1], [0, 0, 1, 1], [], []>} : vector<12x48xf32>, vector<48x96xf32>, vector<12x96xf32> -> vector<12x96xf32>
    %241 = arith.addf %236, %240 : vector<12x96xf32>
    %c3_266 = arith.constant 3 : index
    %c16_267 = arith.constant 16 : index
    %242 = vector.load %arg16[%c3_266, %c16_267] : memref<16x64xf32, #tpu.memory_space<vmem>>, vector<12x48xf32>
    %c19_268 = arith.constant 19 : index
    %c0_269 = arith.constant 0 : index
    %c0_270 = arith.constant 0 : index
    %243 = vector.load %arg3[%c19_268, %c0_269, %c0_270] : memref<25x48x96xf32, #tpu.memory_space<vmem>>, vector<1x48x96xf32>
    %244 = vector.shape_cast %243 : vector<1x48x96xf32> to vector<48x96xf32>
    %cst_271 = arith.constant dense<0.000000e+00> : vector<12x96xf32>
    %245 = tpu.matmul %242, %244, %cst_271 {dimension_numbers = #tpu.dot_dimension_numbers<[1], [0], [0], [1], [0, 0, 1, 1], [], []>} : vector<12x48xf32>, vector<48x96xf32>, vector<12x96xf32> -> vector<12x96xf32>
    %246 = arith.addf %241, %245 : vector<12x96xf32>
    %c4_272 = arith.constant 4 : index
    %c0_273 = arith.constant 0 : index
    %247 = vector.load %arg16[%c4_272, %c0_273] : memref<16x64xf32, #tpu.memory_space<vmem>>, vector<12x48xf32>
    %c20_274 = arith.constant 20 : index
    %c0_275 = arith.constant 0 : index
    %c0_276 = arith.constant 0 : index
    %248 = vector.load %arg3[%c20_274, %c0_275, %c0_276] : memref<25x48x96xf32, #tpu.memory_space<vmem>>, vector<1x48x96xf32>
    %249 = vector.shape_cast %248 : vector<1x48x96xf32> to vector<48x96xf32>
    %cst_277 = arith.constant dense<0.000000e+00> : vector<12x96xf32>
    %250 = tpu.matmul %247, %249, %cst_277 {dimension_numbers = #tpu.dot_dimension_numbers<[1], [0], [0], [1], [0, 0, 1, 1], [], []>} : vector<12x48xf32>, vector<48x96xf32>, vector<12x96xf32> -> vector<12x96xf32>
    %251 = arith.addf %246, %250 : vector<12x96xf32>
    %c4_278 = arith.constant 4 : index
    %c4_279 = arith.constant 4 : index
    %252 = vector.load %arg16[%c4_278, %c4_279] : memref<16x64xf32, #tpu.memory_space<vmem>>, vector<12x48xf32>
    %c21_280 = arith.constant 21 : index
    %c0_281 = arith.constant 0 : index
    %c0_282 = arith.constant 0 : index
    %253 = vector.load %arg3[%c21_280, %c0_281, %c0_282] : memref<25x48x96xf32, #tpu.memory_space<vmem>>, vector<1x48x96xf32>
    %254 = vector.shape_cast %253 : vector<1x48x96xf32> to vector<48x96xf32>
    %cst_283 = arith.constant dense<0.000000e+00> : vector<12x96xf32>
    %255 = tpu.matmul %252, %254, %cst_283 {dimension_numbers = #tpu.dot_dimension_numbers<[1], [0], [0], [1], [0, 0, 1, 1], [], []>} : vector<12x48xf32>, vector<48x96xf32>, vector<12x96xf32> -> vector<12x96xf32>
    %256 = arith.addf %251, %255 : vector<12x96xf32>
    %c4_284 = arith.constant 4 : index
    %c8_285 = arith.constant 8 : index
    %257 = vector.load %arg16[%c4_284, %c8_285] : memref<16x64xf32, #tpu.memory_space<vmem>>, vector<12x48xf32>
    %c22_286 = arith.constant 22 : index
    %c0_287 = arith.constant 0 : index
    %c0_288 = arith.constant 0 : index
    %258 = vector.load %arg3[%c22_286, %c0_287, %c0_288] : memref<25x48x96xf32, #tpu.memory_space<vmem>>, vector<1x48x96xf32>
    %259 = vector.shape_cast %258 : vector<1x48x96xf32> to vector<48x96xf32>
    %cst_289 = arith.constant dense<0.000000e+00> : vector<12x96xf32>
    %260 = tpu.matmul %257, %259, %cst_289 {dimension_numbers = #tpu.dot_dimension_numbers<[1], [0], [0], [1], [0, 0, 1, 1], [], []>} : vector<12x48xf32>, vector<48x96xf32>, vector<12x96xf32> -> vector<12x96xf32>
    %261 = arith.addf %256, %260 : vector<12x96xf32>
    %c4_290 = arith.constant 4 : index
    %c12_291 = arith.constant 12 : index
    %262 = vector.load %arg16[%c4_290, %c12_291] : memref<16x64xf32, #tpu.memory_space<vmem>>, vector<12x48xf32>
    %c23_292 = arith.constant 23 : index
    %c0_293 = arith.constant 0 : index
    %c0_294 = arith.constant 0 : index
    %263 = vector.load %arg3[%c23_292, %c0_293, %c0_294] : memref<25x48x96xf32, #tpu.memory_space<vmem>>, vector<1x48x96xf32>
    %264 = vector.shape_cast %263 : vector<1x48x96xf32> to vector<48x96xf32>
    %cst_295 = arith.constant dense<0.000000e+00> : vector<12x96xf32>
    %265 = tpu.matmul %262, %264, %cst_295 {dimension_numbers = #tpu.dot_dimension_numbers<[1], [0], [0], [1], [0, 0, 1, 1], [], []>} : vector<12x48xf32>, vector<48x96xf32>, vector<12x96xf32> -> vector<12x96xf32>
    %266 = arith.addf %261, %265 : vector<12x96xf32>
    %c4_296 = arith.constant 4 : index
    %c16_297 = arith.constant 16 : index
    %267 = vector.load %arg16[%c4_296, %c16_297] : memref<16x64xf32, #tpu.memory_space<vmem>>, vector<12x48xf32>
    %c24_298 = arith.constant 24 : index
    %c0_299 = arith.constant 0 : index
    %c0_300 = arith.constant 0 : index
    %268 = vector.load %arg3[%c24_298, %c0_299, %c0_300] : memref<25x48x96xf32, #tpu.memory_space<vmem>>, vector<1x48x96xf32>
    %269 = vector.shape_cast %268 : vector<1x48x96xf32> to vector<48x96xf32>
    %cst_301 = arith.constant dense<0.000000e+00> : vector<12x96xf32>
    %270 = tpu.matmul %267, %269, %cst_301 {dimension_numbers = #tpu.dot_dimension_numbers<[1], [0], [0], [1], [0, 0, 1, 1], [], []>} : vector<12x48xf32>, vector<48x96xf32>, vector<12x96xf32> -> vector<12x96xf32>
    %271 = arith.addf %266, %270 : vector<12x96xf32>
    %cst_302 = arith.constant 0.000000e+00 : f32
    %272 = vector.broadcast %cst_302 : f32 to vector<12x96xf32>
    %273 = arith.maximumf %271, %272 : vector<12x96xf32>
    %c0_303 = arith.constant 0 : index
    %c0_304 = arith.constant 0 : index
    %274 = vector.load %arg8[%c0_303, %c0_304] : memref<96x56xf32, #tpu.memory_space<vmem>>, vector<96x56xf32>
    %cst_305 = arith.constant dense<0.000000e+00> : vector<12x56xf32>
    %275 = tpu.matmul %273, %274, %cst_305 {dimension_numbers = #tpu.dot_dimension_numbers<[1], [0], [0], [1], [0, 0, 1, 1], [], []>} : vector<12x96xf32>, vector<96x56xf32>, vector<12x56xf32> -> vector<12x56xf32>
    %c0_306 = arith.constant 0 : index
    %c0_307 = arith.constant 0 : index
    %276 = vector.load %arg9[%c0_306, %c0_307] : memref<96x56xf32, #tpu.memory_space<vmem>>, vector<96x56xf32>
    %cst_308 = arith.constant dense<0.000000e+00> : vector<12x56xf32>
    %277 = tpu.matmul %273, %276, %cst_308 {dimension_numbers = #tpu.dot_dimension_numbers<[1], [0], [0], [1], [0, 0, 1, 1], [], []>} : vector<12x96xf32>, vector<96x56xf32>, vector<12x56xf32> -> vector<12x56xf32>
    %278 = arith.maximumf %275, %277 : vector<12x56xf32>
    %c0_309 = arith.constant 0 : index
    %c0_310 = arith.constant 0 : index
    %279 = vector.load %arg10[%c0_309, %c0_310] : memref<7x12xf32, #tpu.memory_space<vmem>>, vector<7x12xf32>
    %cst_311 = arith.constant dense<0.000000e+00> : vector<7x56xf32>
    %280 = tpu.matmul %279, %278, %cst_311 {dimension_numbers = #tpu.dot_dimension_numbers<[1], [0], [0], [1], [0, 0, 1, 1], [], []>} : vector<7x12xf32>, vector<12x56xf32>, vector<7x56xf32> -> vector<7x56xf32>
    %c0_312 = arith.constant 0 : index
    %c0_313 = arith.constant 0 : index
    %281 = vector.load %arg11[%c0_312, %c0_313] : memref<7x12xf32, #tpu.memory_space<vmem>>, vector<7x12xf32>
    %cst_314 = arith.constant dense<0.000000e+00> : vector<7x56xf32>
    %282 = tpu.matmul %281, %278, %cst_314 {dimension_numbers = #tpu.dot_dimension_numbers<[1], [0], [0], [1], [0, 0, 1, 1], [], []>} : vector<7x12xf32>, vector<12x56xf32>, vector<7x56xf32> -> vector<7x56xf32>
    %283 = arith.maximumf %280, %282 : vector<7x56xf32>
    %284 = vector.extract_strided_slice %283 {offsets = [0, 0], sizes = [1, 56], strides = [1, 1]} : vector<7x56xf32> to vector<1x56xf32>
    %c0_315 = arith.constant 0 : index
    %c0_316 = arith.constant 0 : index
    %c0_317 = arith.constant 0 : index
    %285 = vector.load %arg12[%c0_315, %c0_316, %c0_317] : memref<7x56x32xf32, #tpu.memory_space<vmem>>, vector<1x56x32xf32>
    %286 = vector.shape_cast %285 : vector<1x56x32xf32> to vector<56x32xf32>
    %cst_318 = arith.constant dense<0.000000e+00> : vector<1x32xf32>
    %287 = tpu.matmul %284, %286, %cst_318 {dimension_numbers = #tpu.dot_dimension_numbers<[1], [0], [0], [1], [0, 0, 1, 1], [], []>} : vector<1x56xf32>, vector<56x32xf32>, vector<1x32xf32> -> vector<1x32xf32>
    %288 = vector.extract_strided_slice %283 {offsets = [1, 0], sizes = [1, 56], strides = [1, 1]} : vector<7x56xf32> to vector<1x56xf32>
    %c1_319 = arith.constant 1 : index
    %c0_320 = arith.constant 0 : index
    %c0_321 = arith.constant 0 : index
    %289 = vector.load %arg12[%c1_319, %c0_320, %c0_321] : memref<7x56x32xf32, #tpu.memory_space<vmem>>, vector<1x56x32xf32>
    %290 = vector.shape_cast %289 : vector<1x56x32xf32> to vector<56x32xf32>
    %cst_322 = arith.constant dense<0.000000e+00> : vector<1x32xf32>
    %291 = tpu.matmul %288, %290, %cst_322 {dimension_numbers = #tpu.dot_dimension_numbers<[1], [0], [0], [1], [0, 0, 1, 1], [], []>} : vector<1x56xf32>, vector<56x32xf32>, vector<1x32xf32> -> vector<1x32xf32>
    %292 = arith.addf %287, %291 : vector<1x32xf32>
    %293 = vector.extract_strided_slice %283 {offsets = [2, 0], sizes = [1, 56], strides = [1, 1]} : vector<7x56xf32> to vector<1x56xf32>
    %c2_323 = arith.constant 2 : index
    %c0_324 = arith.constant 0 : index
    %c0_325 = arith.constant 0 : index
    %294 = vector.load %arg12[%c2_323, %c0_324, %c0_325] : memref<7x56x32xf32, #tpu.memory_space<vmem>>, vector<1x56x32xf32>
    %295 = vector.shape_cast %294 : vector<1x56x32xf32> to vector<56x32xf32>
    %cst_326 = arith.constant dense<0.000000e+00> : vector<1x32xf32>
    %296 = tpu.matmul %293, %295, %cst_326 {dimension_numbers = #tpu.dot_dimension_numbers<[1], [0], [0], [1], [0, 0, 1, 1], [], []>} : vector<1x56xf32>, vector<56x32xf32>, vector<1x32xf32> -> vector<1x32xf32>
    %297 = arith.addf %292, %296 : vector<1x32xf32>
    %298 = vector.extract_strided_slice %283 {offsets = [3, 0], sizes = [1, 56], strides = [1, 1]} : vector<7x56xf32> to vector<1x56xf32>
    %c3_327 = arith.constant 3 : index
    %c0_328 = arith.constant 0 : index
    %c0_329 = arith.constant 0 : index
    %299 = vector.load %arg12[%c3_327, %c0_328, %c0_329] : memref<7x56x32xf32, #tpu.memory_space<vmem>>, vector<1x56x32xf32>
    %300 = vector.shape_cast %299 : vector<1x56x32xf32> to vector<56x32xf32>
    %cst_330 = arith.constant dense<0.000000e+00> : vector<1x32xf32>
    %301 = tpu.matmul %298, %300, %cst_330 {dimension_numbers = #tpu.dot_dimension_numbers<[1], [0], [0], [1], [0, 0, 1, 1], [], []>} : vector<1x56xf32>, vector<56x32xf32>, vector<1x32xf32> -> vector<1x32xf32>
    %302 = arith.addf %297, %301 : vector<1x32xf32>
    %303 = vector.extract_strided_slice %283 {offsets = [4, 0], sizes = [1, 56], strides = [1, 1]} : vector<7x56xf32> to vector<1x56xf32>
    %c4_331 = arith.constant 4 : index
    %c0_332 = arith.constant 0 : index
    %c0_333 = arith.constant 0 : index
    %304 = vector.load %arg12[%c4_331, %c0_332, %c0_333] : memref<7x56x32xf32, #tpu.memory_space<vmem>>, vector<1x56x32xf32>
    %305 = vector.shape_cast %304 : vector<1x56x32xf32> to vector<56x32xf32>
    %cst_334 = arith.constant dense<0.000000e+00> : vector<1x32xf32>
    %306 = tpu.matmul %303, %305, %cst_334 {dimension_numbers = #tpu.dot_dimension_numbers<[1], [0], [0], [1], [0, 0, 1, 1], [], []>} : vector<1x56xf32>, vector<56x32xf32>, vector<1x32xf32> -> vector<1x32xf32>
    %307 = arith.addf %302, %306 : vector<1x32xf32>
    %308 = vector.extract_strided_slice %283 {offsets = [5, 0], sizes = [1, 56], strides = [1, 1]} : vector<7x56xf32> to vector<1x56xf32>
    %c5_335 = arith.constant 5 : index
    %c0_336 = arith.constant 0 : index
    %c0_337 = arith.constant 0 : index
    %309 = vector.load %arg12[%c5_335, %c0_336, %c0_337] : memref<7x56x32xf32, #tpu.memory_space<vmem>>, vector<1x56x32xf32>
    %310 = vector.shape_cast %309 : vector<1x56x32xf32> to vector<56x32xf32>
    %cst_338 = arith.constant dense<0.000000e+00> : vector<1x32xf32>
    %311 = tpu.matmul %308, %310, %cst_338 {dimension_numbers = #tpu.dot_dimension_numbers<[1], [0], [0], [1], [0, 0, 1, 1], [], []>} : vector<1x56xf32>, vector<56x32xf32>, vector<1x32xf32> -> vector<1x32xf32>
    %312 = arith.addf %307, %311 : vector<1x32xf32>
    %313 = vector.extract_strided_slice %283 {offsets = [6, 0], sizes = [1, 56], strides = [1, 1]} : vector<7x56xf32> to vector<1x56xf32>
    %c6_339 = arith.constant 6 : index
    %c0_340 = arith.constant 0 : index
    %c0_341 = arith.constant 0 : index
    %314 = vector.load %arg12[%c6_339, %c0_340, %c0_341] : memref<7x56x32xf32, #tpu.memory_space<vmem>>, vector<1x56x32xf32>
    %315 = vector.shape_cast %314 : vector<1x56x32xf32> to vector<56x32xf32>
    %cst_342 = arith.constant dense<0.000000e+00> : vector<1x32xf32>
    %316 = tpu.matmul %313, %315, %cst_342 {dimension_numbers = #tpu.dot_dimension_numbers<[1], [0], [0], [1], [0, 0, 1, 1], [], []>} : vector<1x56xf32>, vector<56x32xf32>, vector<1x32xf32> -> vector<1x32xf32>
    %317 = arith.addf %312, %316 : vector<1x32xf32>
    %cst_343 = arith.constant 0.000000e+00 : f32
    %318 = vector.broadcast %cst_343 : f32 to vector<1x32xf32>
    %319 = arith.maximumf %317, %318 : vector<1x32xf32>
    %c0_344 = arith.constant 0 : index
    %c0_345 = arith.constant 0 : index
    %320 = vector.load %arg13[%c0_344, %c0_345] : memref<32x10xf32, #tpu.memory_space<vmem>>, vector<32x10xf32>
    %cst_346 = arith.constant dense<0.000000e+00> : vector<1x10xf32>
    %321 = tpu.matmul %319, %320, %cst_346 {dimension_numbers = #tpu.dot_dimension_numbers<[1], [0], [0], [1], [0, 0, 1, 1], [], []>} : vector<1x32xf32>, vector<32x10xf32>, vector<1x10xf32> -> vector<1x10xf32>
    %c0_347 = arith.constant 0 : index
    %c0_348 = arith.constant 0 : index
    %c0_349 = arith.constant 0 : index
    %322 = vector.load %arg14[%c0_347, %c0_348, %c0_349] : memref<1x1x10xf32, #tpu.memory_space<vmem>>, vector<1x1x10xf32>
    %323 = vector.shape_cast %322 : vector<1x1x10xf32> to vector<1x10xf32>
    %324 = vector.shape_cast %321 : vector<1x10xf32> to vector<1x1x10xf32>
    tpu.vector_store %arg14[%c0_347, %c0_348, %c0_349], %324 {strides = array<i32>} : memref<1x1x10xf32, #tpu.memory_space<vmem>>, vector<1x1x10xf32>,
    return
  }
  func.func @transform_0(%arg0: i32) -> (i32, i32, i32) {
    %c0_i32 = arith.constant 0 : i32
    %c0_i32_0 = arith.constant 0 : i32
    %c0_i32_1 = arith.constant 0 : i32
    return %arg0, %c0_i32, %c0_i32_0 : i32, i32, i32
  }
  func.func @transform_1(%arg0: i32) -> (i32, i32, i32) {
    %c0_i32 = arith.constant 0 : i32
    %c0_i32_0 = arith.constant 0 : i32
    %c0_i32_1 = arith.constant 0 : i32
    %c0_i32_2 = arith.constant 0 : i32
    return %c0_i32, %c0_i32_0, %c0_i32_1 : i32, i32, i32
  }
  func.func @transform_2(%arg0: i32) -> (i32, i32, i32) {
    %c0_i32 = arith.constant 0 : i32
    %c0_i32_0 = arith.constant 0 : i32
    %c0_i32_1 = arith.constant 0 : i32
    %c0_i32_2 = arith.constant 0 : i32
    return %c0_i32, %c0_i32_0, %c0_i32_1 : i32, i32, i32
  }
  func.func @transform_3(%arg0: i32) -> (i32, i32) {
    %c0_i32 = arith.constant 0 : i32
    %c0_i32_0 = arith.constant 0 : i32
    %c0_i32_1 = arith.constant 0 : i32
    return %c0_i32, %c0_i32_0 : i32, i32
  }
  func.func @transform_4(%arg0: i32) -> (i32, i32) {
    %c0_i32 = arith.constant 0 : i32
    %c0_i32_0 = arith.constant 0 : i32
    %c0_i32_1 = arith.constant 0 : i32
    return %c0_i32, %c0_i32_0 : i32, i32
  }
  func.func @transform_5(%arg0: i32) -> (i32, i32) {
    %c0_i32 = arith.constant 0 : i32
    %c0_i32_0 = arith.constant 0 : i32
    %c0_i32_1 = arith.constant 0 : i32
    return %c0_i32, %c0_i32_0 : i32, i32
  }
  func.func @transform_6(%arg0: i32) -> (i32, i32) {
    %c0_i32 = arith.constant 0 : i32
    %c0_i32_0 = arith.constant 0 : i32
    %c0_i32_1 = arith.constant 0 : i32
    return %c0_i32, %c0_i32_0 : i32, i32
  }
  func.func @transform_7(%arg0: i32) -> (i32, i32) {
    %c0_i32 = arith.constant 0 : i32
    %c0_i32_0 = arith.constant 0 : i32
    %c0_i32_1 = arith.constant 0 : i32
    return %c0_i32, %c0_i32_0 : i32, i32
  }
  func.func @transform_8(%arg0: i32) -> (i32, i32) {
    %c0_i32 = arith.constant 0 : i32
    %c0_i32_0 = arith.constant 0 : i32
    %c0_i32_1 = arith.constant 0 : i32
    return %c0_i32, %c0_i32_0 : i32, i32
  }
  func.func @transform_9(%arg0: i32) -> (i32, i32) {
    %c0_i32 = arith.constant 0 : i32
    %c0_i32_0 = arith.constant 0 : i32
    %c0_i32_1 = arith.constant 0 : i32
    return %c0_i32, %c0_i32_0 : i32, i32
  }
  func.func @transform_10(%arg0: i32) -> (i32, i32) {
    %c0_i32 = arith.constant 0 : i32
    %c0_i32_0 = arith.constant 0 : i32
    %c0_i32_1 = arith.constant 0 : i32
    return %c0_i32, %c0_i32_0 : i32, i32
  }
  func.func @transform_11(%arg0: i32) -> (i32, i32, i32) {
    %c0_i32 = arith.constant 0 : i32
    %c0_i32_0 = arith.constant 0 : i32
    %c0_i32_1 = arith.constant 0 : i32
    %c0_i32_2 = arith.constant 0 : i32
    return %c0_i32, %c0_i32_0, %c0_i32_1 : i32, i32, i32
  }
  func.func @transform_12(%arg0: i32) -> (i32, i32) {
    %c0_i32 = arith.constant 0 : i32
    %c0_i32_0 = arith.constant 0 : i32
    %c0_i32_1 = arith.constant 0 : i32
    return %c0_i32, %c0_i32_0 : i32, i32
  }
  func.func @transform_13(%arg0: i32) -> (i32, i32, i32) {
    %c0_i32 = arith.constant 0 : i32
    %c0_i32_0 = arith.constant 0 : i32
    %c0_i32_1 = arith.constant 0 : i32
    return %arg0, %c0_i32, %c0_i32_0 : i32, i32, i32
  }
}

</mosaic_0001>

<bundles_post_ra>
// kernel: cnn_forward.1
= control target key start
LH: loop header
LB: loop body
LE: loop exit
PB: predicated region body
PF: predicated region fallthrough
CT: control target
= control target key end

     0   :  { %s5547_s0 = inlined_call_operand.vmem [shape: f32[2,28,28], index: 0, kind: input, shape index: {}]   ;;  %s5548_s1 = inlined_call_operand.vmem [shape: f32[25,26,104], index: 1, kind: input, shape index: {}]   ;;  %s5549_s2 = inlined_call_operand.hbm [shape: f32[25,48,96], index: 2, kind: input, shape index: {}]   ;;  %s5550_s3 = inlined_call_operand.vmem [shape: f32[104,56], index: 3, kind: input, shape index: {}]   ;;  %s5551_s4 = inlined_call_operand.vmem [shape: f32[104,56], index: 4, kind: input, shape index: {}]   ;;  %s5552_s5 = inlined_call_operand.vmem [shape: f32[14,26], index: 5, kind: input, shape index: {}]   ;;  %s5553_s6 = inlined_call_operand.vmem [shape: f32[14,26], index: 6, kind: input, shape index: {}]   ;;  %s5554_s7 = inlined_call_operand.vmem [shape: f32[96,56], index: 7, kind: input, shape index: {}]   ;;  %s5555_s8 = inlined_call_operand.vmem [shape: f32[96,56], index: 8, kind: input, shape index: {}]   ;;  %s5556_s9 = inlined_call_operand.vmem [shape: f32[7,12], index: 9, kind: input, shape index: {}]   ;;  %s5557_s10 = inlined_call_operand.vmem [shape: f32[7,12], index: 10, kind: input, shape index: {}]   ;;  %s5558_s11 = inlined_call_operand.vmem [shape: f32[7,56,32], index: 11, kind: input, shape index: {}]   ;;  %s5559_s12 = inlined_call_operand.vmem [shape: f32[32,10], index: 12, kind: input, shape index: {}]   ;;  %s5560_s13 = inlined_call_operand.hbm [shape: f32[2,1,10], index: 13, kind: output, shape index: {}]  }
   0x1   :  { %5572 = sst [smem:[#allocation15_spill]] %s5547_s0 }
   0x2   :  { %5573 = sst [smem:[#allocation16_spill]] %s5549_s2 }
   0x3   :  { %18 = vsyncpa [#allocation5], 0 }
   0x4   :  { %19 = vsyncpa [#allocation6], 0 }
   0x5   :  { %21 = vsyncpa [#allocation6 + $0x1], 0  ;;  %s4153_s25 = smov 0   ;;  %s4155_s26 = smov 0  }
   0x6   :  { %s4157_s27 = smov 0   ;;  %s4159_s28 = smov 0  }
   0x7 LB: > { %5574 = sst [smem:[#allocation10_spill]] %s4064_s27  ;;  %s4174_s29 = sadd.s32 4294967295, %s4068_s28   ;;  %s4068_s28 = sphi %s4159_s28, %s5595_s28   ;;  %s4064_s27 = sphi %s4157_s27, %s5592_s27   ;;  %s4060_s26 = sphi %s4155_s26, %s5594_s26   ;;  %s4056_s25 = sphi %s4153_s25, %s5593_s25  }
   0x8   : > { %s3556_s30 = sadd.s32 4294967294, %s4068_s28   ;;  %s4178_s14 = sadd.s32 1, %s4068_s28  }
   0x9   : > { %s312_s15 = sadd.s32 1, %s4064_s27  ;;  %s309_s16 = ssub.s32 %s4068_s28, %s4178_s14 }
   0xa   : > { %p322_p0 = scmp.ne.s32.totalorder %s4064_s27, %s4060_s26  ;;  %p310_p1 = scmp.eq.s32.totalorder %s309_s16, 0 }
   0xb   : > { %p323_p2 = scmp.eq.s32.totalorder %s4174_s29, 1  ;;  %p328_p3 = scmp.ne.s32.totalorder %s4060_s26, %s4056_s25 }
   0xc   : > { %p329_p4 = scmp.eq.s32.totalorder %s3556_s30, 1  ;;  %p3557_p7 = scmp.ge.s32.totalorder %s4068_s28, 1 }
   0xd   : > { %s4189_s17 = scalar_select %p310_p1, %s4064_s27, %s312_s15  }
   0xe   : > { %p4191_p5 = por %p323_p2, %p322_p0  ;;  %p4195_p6 = por %p329_p4, %p328_p3 }
   0xf   : > { %5575 = sst [smem:[#allocation11_spill]] %s4189_s17  ;;  %p336_p8 = scmp.lt.s32.totalorder %s4068_s28, 3 }
  0x10   : > { %p3924_p9 = scmp.eq.s32.totalorder %s4174_s29, 0  ;;  %s5578_s2 = sld [smem:[#allocation16_spill]] }
  0x11   : > { %p337_p10 = pnand %p3557_p7, %p336_p8  ;;  %s4070_s23 = smov [#allocation4]  }
  0x12   : > { %s352_s24 = sshll.u32 %s4070_s23, 4  ;;  %s4071_s30 = smov 128   ;;  %s353_s24 = int_to_ptr.vmem [resolvable:$true] %s352_s24 }
  0x13   : > { %p3916_p11 = pneg %p337_p10  ;;  %s4072_s15 = smov 8  }
  0x14   : > { %406 = sbr.rel (%p337_p10) target bundleno = 1950 (0x79e), region = 72 }
  0x15   : > { %p3917_p12 = pnand %p3924_p9, %p3916_p11 }
  0x16   : > { %s350_s22 = sshll.u32 %s5578_s2, 4  ;;  %s351_s22 = int_to_ptr.hbm [resolvable:$true] %s350_s22 }
  0x17   : > { %3919 = dma.hbm_to_vmem [thread:$0]  (!%p3917_p12), %s351_s22, 19200, %s353_s24, [#allocation5], %s4071_s30, %s4071_s30, %s4072_s15  }
  0x19   : > { %4047 = dma.done.wait (%p3924_p9), [#allocation5], 19200  }
  0x1a   : > { %4049 = vsyncadd (%p3924_p9), [#allocation5], 4294948096  ;;  %p450_p13 = scmp.lt.s32.totalorder %s4174_s29, 1  ;;  %vm455_vm0 = vcmask 244736   ;;  %vm459_vm1 = vcmask 242688   ;;  %v5570_v0 = vmov 0.0  }
  0x1b   : > { %458 = vst.msk [vmem:[#allocation2 + $0x10] sm:$0xff] %vm455_vm0, %v5570_v0  ;;  %s5579_s0 = sld [smem:[#allocation15_spill]]  ;;  %s4074_s24 = smov 1   ;;  %v494_v5 = vld [vmem:[%s5548_s1 + $0x18] sm:$0x3]  ;;  %vm521_vm2 = vcmask 1041408  }
  0x1c   : > { %s451_s16 = scalar_select %p450_p13, %s4174_s29, 1  ;;  %460 = vst.msk [vmem:[#allocation2 + $0x18] sm:$0x3f] %vm459_vm1, %v5570_v0  ;;  %v493_v6 = vld [vmem:[%s5548_s1 + $0x10] sm:$0xff]  ;;  %3573 = vmatpush.msk.msra.mxu1 %vm521_vm2, %v494_v5  ;;  %v492_v7 = vld [vmem:[%s5548_s1 + $0x8] sm:$0xff]  ;;  %v491_v8 = vld [vmem:[%s5548_s1] sm:$0xff] }
  0x1d   : > { %456 = vst.msk [vmem:[#allocation2] sm:$0xff] %vm455_vm0, %v5570_v0  ;;  %vm481_vm3 = vcmask 236552   ;;  %v3608_v11 = vld [vmem:[%s5548_s1 + $0xb8] sm:$0x3]  ;;  %v3607_v12 = vld [vmem:[%s5548_s1 + $0xb0] sm:$0xff]  ;;  %v3606_v13 = vld [vmem:[%s5548_s1 + $0xa8] sm:$0xff] }
  0x1e   : > { %s3909_s20 = sshll.u32 %s451_s16, 5  ;;  %457 = vst.msk [vmem:[#allocation2 + $0x8] sm:$0xff] %vm455_vm0, %v5570_v0  ;;  %578 = vmatpush.msra.mxu1 %v493_v6  ;;  %vm485_vm4 = vcmask 232456   ;;  %vm512_vm5 = vcmask 211968   ;;  %v3605_v17 = vld [vmem:[%s5548_s1 + $0xa0] sm:$0xff]  ;;  %s5565_s2 = smov 127  }
  0x1f   : > { %s5563_s30 = smov 124   ;;  %v3567_v24 = vld [vmem:[%s5548_s1 + $0x38] sm:$0x3]  ;;  %v3566_v25 = vld [vmem:[%s5548_s1 + $0x30] sm:$0xff]  ;;  %v3565_v26 = vld [vmem:[%s5548_s1 + $0x28] sm:$0xff]  ;;  %s5583_s21 = smov 126  }
  0x20   : > { %579 = vmatpush.msra.mxu1 %v492_v7  ;;  %3568 = vmatpush.msk.msra.mxu0 %vm521_vm2, %v3567_v24  ;;  %v3564_v28 = vld [vmem:[%s5548_s1 + $0x20] sm:$0xff]  ;;  %v3581_v30 = vld [vmem:[%s5548_s1 + $0x58] sm:$0x3]  ;;  %v3580_v31 = vld [vmem:[%s5548_s1 + $0x50] sm:$0xff]  ;;  %vm1922_vm6 = vcmask 850944   ;;  %vm2077_vm7 = vcmask 523264  }
  0x21   : > { %s454_s23 = scalar_lea.vmem %s5579_s0, %s3909_s20  ;;  %3582 = vmatpush.msk.msra.mxu2 %vm521_vm2, %v3581_v30  ;;  %v3579_v32 = vld [vmem:[%s5548_s1 + $0x48] sm:$0xff]  ;;  %v3578_v35 = vld [vmem:[%s5548_s1 + $0x40] sm:$0xff]  ;;  %v3590_v38 = vld [vmem:[%s5548_s1 + $0x78] sm:$0x3]  ;;  %s4079_s0 = smov 4   ;;  %vm2088_vm8 = vcmask 490528  }
  0x22   : > { %v463_v1 = vld [vmem:[%s454_s23 + $0x10] sm:$0xff]  ;;  %v461_v2 = vld [vmem:[%s454_s23] sm:$0xff]  ;;  %v464_v3 = vld [vmem:[%s454_s23 + $0x18] sm:$0xf]  ;;  %580 = vmatpush.msra.mxu1 %v491_v8  ;;  %538 = vmatpush.msra.mxu0 %v3566_v25  ;;  %vm2090_vm9 = vcmask 488480   ;;  %vm2113_vm10 = vcmask 392192   ;;  %s3485_s20 = scalar_lea.hbm %s5560_s13, %s4174_s29 }
  0x23   : > { %473 = vrot.lane.b32.xlu1 %v463_v1, %s4074_s24  ;;  %469 = vrot.lane.b32.xlu0 %v461_v2, %s4074_s24  ;;  %v462_v4 = vld [vmem:[%s454_s23 + $0x8] sm:$0xff]  ;;  %s5567_s23 = smov 126   ;;  %v3589_v39 = vld [vmem:[%s5548_s1 + $0x70] sm:$0xff]  ;;  %s4080_s16 = smov 120   ;;  %vm3102_vm11 = vcmask 785408   ;;  %vm3174_vm12 = vcmask 1043456  }
  0x24   : > { %3609 = vmatpush.msk.msrb.mxu1 %vm521_vm2, %v3608_v11  ;;  %539 = vmatpush.msra.mxu0 %v3565_v26  ;;  %v3588_v40 = vld [vmem:[%s5548_s1 + $0x68] sm:$0xff]  ;;  %v3587_v41 = vld [vmem:[%s5548_s1 + $0x60] sm:$0xff]  ;;  %v3599_v43 = vld [vmem:[%s5548_s1 + $0x98] sm:$0x3]  ;;  %s4081_s27 = smov 116   ;;  %s4082_s17 = smov 112  }
  0x25   : > { %631 = vmatpush.msra.mxu2 %v3580_v31  ;;  %3591 = vmatpush.msk.msra.mxu3 %vm521_vm2, %v3590_v38  ;;  %v3598_v44 = vld [vmem:[%s5548_s1 + $0x90] sm:$0xff]  ;;  %v3597_v45 = vld [vmem:[%s5548_s1 + $0x88] sm:$0xff]  ;;  %v3596_v46 = vld [vmem:[%s5548_s1 + $0x80] sm:$0xff]  ;;  %vm3170_vm13 = vcmask 97280   ;;  %vm3240_vm14 = vcmask 457728   ;;  %vm3450_vm15 = vcmask 261120  }
  0x26   : > { %802 = vmatpush.msrb.mxu1 %v3607_v12  ;;  %540 = vmatpush.msra.mxu0 %v3564_v28  ;;  %v3617_v48 = vld [vmem:[%s5548_s1 + $0xd8] sm:$0x3]  ;;  %v3616_v49 = vld [vmem:[%s5548_s1 + $0xd0] sm:$0xff]  ;;  %v3615_v50 = vld [vmem:[%s5548_s1 + $0xc8] sm:$0xff]  ;;  %vm3474_vm0 = vcmask 73728   ;;  %s4022_s29 = scalar_lea.hbm %s5560_s13, 2 }
  0x27   : > { %632 = vmatpush.msra.mxu2 %v3579_v32  ;;  %688 = vmatpush.msra.mxu3 %v3589_v39  ;;  %v3614_v51 = vld [vmem:[%s5548_s1 + $0xc0] sm:$0xff]  ;;  %v3626_v58 = vld [vmem:[%s5548_s1 + $0xf8] sm:$0x3]  ;;  %v3625_v59 = vld [vmem:[%s5548_s1 + $0xf0] sm:$0xff] }
  0x28   : > { %803 = vmatpush.msrb.mxu1 %v3606_v13  ;;  %3600 = vmatpush.msk.msrb.mxu0 %vm521_vm2, %v3599_v43  ;;  %v3624_v60 = vld [vmem:[%s5548_s1 + $0xe8] sm:$0xff]  ;;  %v3623_v1 = vld [vmem:[%s5548_s1 + $0xe0] sm:$0xff]  ;;  %v3653_v11 = vld [vmem:[%s5548_s1 + $0x158] sm:$0x3] }
  0x29   : > { %633 = vmatpush.msra.mxu2 %v3578_v35  ;;  %689 = vmatpush.msra.mxu3 %v3588_v40  ;;  %v3633_v6 = vld [vmem:[%s5548_s1 + $0x108] sm:$0xff]  ;;  %v3652_v12 = vld [vmem:[%s5548_s1 + $0x150] sm:$0xff]  ;;  %v3659_v31 = vld [vmem:[%s5548_s1 + $0x160] sm:$0xff] }
  0x2a   : > { %804 = vmatpush.msrb.mxu1 %v3605_v17  ;;  %745 = vmatpush.msrb.mxu0 %v3598_v44  ;;  %v3650_v17 = vld [vmem:[%s5548_s1 + $0x140] sm:$0xff]  ;;  %v3643_v24 = vld [vmem:[%s5548_s1 + $0x130] sm:$0xff]  ;;  %v3660_v26 = vld [vmem:[%s5548_s1 + $0x168] sm:$0xff] }
  0x2b   : > { %475 = vrot.lane.b32.xlu1 %v464_v3, %s4074_s24  ;;  %471 = vrot.lane.b32.xlu0 %v462_v4, %s4074_s24  ;;  %s5561_s24 = smov 125   ;;  %v3635_v3 = vld [vmem:[%s5548_s1 + $0x118] sm:$0x3]  ;;  %v3634_v4 = vld [vmem:[%s5548_s1 + $0x110] sm:$0xff] }
  0x2c   : > { %690 = vmatpush.msra.mxu3 %v3587_v41  ;;  %746 = vmatpush.msrb.mxu0 %v3597_v45  ;;  %v3661_v25 = vld [vmem:[%s5548_s1 + $0x170] sm:$0xff]  ;;  %v3641_v35 = vld [vmem:[%s5548_s1 + $0x120] sm:$0xff]  ;;  %v3669_v40 = vld [vmem:[%s5548_s1 + $0x188] sm:$0xff] }
  0x2d   : > { %3618 = vmatpush.msk.msrb.mxu2 %vm521_vm2, %v3617_v48  ;;  %v3670_v38 = vld [vmem:[%s5548_s1 + $0x190] sm:$0xff]  ;;  %v3668_v43 = vld [vmem:[%s5548_s1 + $0x180] sm:$0xff]  ;;  %v3689_v45 = vld [vmem:[%s5548_s1 + $0x1d8] sm:$0x3] }
  0x2e   : > { %747 = vmatpush.msrb.mxu0 %v3596_v46  ;;  %3627 = vmatpush.msk.msrb.mxu3 %vm521_vm2, %v3626_v58  ;;  %v3688_v46 = vld [vmem:[%s5548_s1 + $0x1d0] sm:$0xff]  ;;  %v3698_v58 = vld [vmem:[%s5548_s1 + $0x1f8] sm:$0x3] }
  0x2f   : > { %859 = vmatpush.msrb.mxu2 %v3616_v49 }
  0x30   : > { %916 = vmatpush.msrb.mxu3 %v3625_v59  ;;  %v3679_v59 = vld [vmem:[%s5548_s1 + $0x1b0] sm:$0xff] }
  0x31   : > { %860 = vmatpush.msrb.mxu2 %v3615_v50  ;;  %v3686_v50 = vld [vmem:[%s5548_s1 + $0x1c0] sm:$0xff] }
  0x32   : > { %917 = vmatpush.msrb.mxu3 %v3624_v60 }
  0x33   : > { %861 = vmatpush.msrb.mxu2 %v3614_v51 }
  0x34   : > { %918 = vmatpush.msrb.mxu3 %v3623_v1  ;;  %v3678_v1 = vld [vmem:[%s5548_s1 + $0x1a8] sm:$0xff] }
  0x95   : > { %v474_v9 = vpop.permute.xlu1 %473  ;;  %v470_v10 = vpop.permute.xlu0 %469 }
  0x96   : > { %484 = vst.msk [vmem:[#allocation2 + $0x11] sm:$0xff] %vm481_vm3, %v474_v9  ;;  %v3632_v9 = vld [vmem:[%s5548_s1 + $0x100] sm:$0xff] }
  0x97   : > { %482 = vst.msk [vmem:[#allocation2 + $0x1] sm:$0xff] %vm481_vm3, %v470_v10 }
  0x9d   : > { %v476_v14 = vpop.permute.xlu1 %475  ;;  %v472_v15 = vpop.permute.xlu0 %471  ;;  %v767_v23 = vld [vmem:[#allocation2 + $0x11] sm:$0xff] }
  0x9e   : > { %486 = vst.msk [vmem:[#allocation2 + $0x19] sm:$0xf] %vm485_vm4, %v476_v14  ;;  %v487_v16 = vld [vmem:[#allocation2] sm:$0xff]  ;;  %v3651_v14 = vld [vmem:[%s5548_s1 + $0x148] sm:$0xff] }
  0x9f   : > { %483 = vst.msk [vmem:[#allocation2 + $0x9] sm:$0xff] %vm481_vm3, %v472_v15  ;;  %599 = vrot.lane.b32.xlu1 %v487_v16, %s5567_s23  ;;  %504 = vrot.lane.b32.xlu2 %v487_v16, %s5565_s2  ;;  %v765_v21 = vld [vmem:[#allocation2 + $0x1] sm:$0xff] }
  0xa0   : > { %3574 = vmatmul.msk.f32.vlgmr.msra.gmra.mxu1 %vm512_vm5, %v487_v16 }
  0xa5   : > { %v490_v20 = vld [vmem:[#allocation2 + $0x18] sm:$0x3]  ;;  %v4324_v36 = vld [vmem:[#allocation2 + $0x1a] sm:$0x3]  ;;  %v4590_v60 = vld [vmem:[#allocation2 + $0x1c] sm:$0x3] }
  0xa6   : > { %v489_v18 = vld [vmem:[#allocation2 + $0x10] sm:$0xff]  ;;  %v488_v19 = vld [vmem:[#allocation2 + $0x8] sm:$0xff]  ;;  %v768_v27 = vld [vmem:[#allocation2 + $0x19] sm:$0x3] }
  0xa7   : > { %508 = vrot.lane.b32.xlu0 %v489_v18, %s5565_s2  ;;  %601 = vrot.lane.b32.xlu1 %v488_v19, %s5567_s23  ;;  %v766_v22 = vld [vmem:[#allocation2 + $0x9] sm:$0xff]  ;;  %v4312_v33 = vld [vmem:[#allocation2 + $0x12] sm:$0xff]  ;;  %v4458_v13 = vld [vmem:[#allocation2 + $0x1b] sm:$0x3] }
  0xa8   : > { %506 = vrot.lane.b32.xlu2 %v488_v19, %s5565_s2  ;;  %3575 = vmatmul.msk.f32.gmra.mxu1 %vm512_vm5, %v488_v19  ;;  %v4296_v29 = vld [vmem:[#allocation2 + $0xa] sm:$0xff]  ;;  %v4317_v34 = vld [vmem:[#allocation2 + $0x2] sm:$0xff]  ;;  %v4434_v5 = vld [vmem:[#allocation2 + $0x13] sm:$0xff] }
  0xa9   : > { %v4393_v54 = vld [vmem:[#allocation2 + $0x3] sm:$0xff]  ;;  %v4413_v61 = vld [vmem:[#allocation2 + $0xb] sm:$0xff] }
  0xaa   : > { %v4522_v39 = vld [vmem:[#allocation2 + $0x4] sm:$0xff] }
  0xaf   : > { %656 = vrot.lane.b32.xlu0 %v487_v16, %s5561_s24  ;;  %603 = vrot.lane.b32.xlu1 %v489_v18, %s5567_s23 }
  0xb0   : > { %510 = vrot.lane.b32.xlu2 %v490_v20, %s5565_s2  ;;  %3576 = vmatmul.msk.f32.gmra.mxu1 %vm512_vm5, %v489_v18 }
  0xb7   : > { %713 = vrot.lane.b32.xlu0 %v487_v16, %s5563_s30  ;;  %605 = vrot.lane.b32.xlu1 %v490_v20, %s5567_s23 }
  0xb8   : > { %658 = vrot.lane.b32.xlu2 %v488_v19, %s5561_s24  ;;  %3577 = vmatmul.msk.f32.gmra.mxu1 %vm512_vm5, %v490_v20 }
  0xbf   : > { %715 = vrot.lane.b32.xlu0 %v488_v19, %s5563_s30  ;;  %827 = vrot.lane.b32.xlu1 %v765_v21, %s5565_s2 }
  0xc0   : > { %660 = vrot.lane.b32.xlu2 %v489_v18, %s5561_s24  ;;  %3610 = vmatmul.msk.f32.vlgmr.msrb.gmra.mxu1 %vm512_vm5, %v765_v21 }
  0xc7   : > { %717 = vrot.lane.b32.xlu0 %v489_v18, %s5563_s30  ;;  %829 = vrot.lane.b32.xlu1 %v766_v22, %s5565_s2 }
  0xc8   : > { %662 = vrot.lane.b32.xlu2 %v490_v20, %s5561_s24  ;;  %3611 = vmatmul.msk.f32.gmra.mxu1 %vm512_vm5, %v766_v22 }
  0xcf   : > { %884 = vrot.lane.b32.xlu0 %v765_v21, %s5567_s23  ;;  %831 = vrot.lane.b32.xlu1 %v767_v23, %s5565_s2 }
  0xd0   : > { %719 = vrot.lane.b32.xlu2 %v490_v20, %s5563_s30  ;;  %3612 = vmatmul.msk.f32.gmra.mxu1 %vm512_vm5, %v767_v23  ;;  %s5580_s30 = smov 125  }
  0xd7   : > { %941 = vrot.lane.b32.xlu0 %v765_v21, %s5580_s30  ;;  %833 = vrot.lane.b32.xlu1 %v768_v27, %s5565_s2 }
  0xd8   : > { %886 = vrot.lane.b32.xlu2 %v766_v22, %s5567_s23  ;;  %3613 = vmatmul.msk.f32.gmra.mxu1 %vm512_vm5, %v768_v27 }
  0xdf   : > { %943 = vrot.lane.b32.xlu0 %v766_v22, %s5580_s30  ;;  %947 = vrot.lane.b32.xlu1 %v768_v27, %s5580_s30 }
  0xe0   : > { %888 = vrot.lane.b32.xlu2 %v767_v23, %s5567_s23 }
  0xe7   : > { %945 = vrot.lane.b32.xlu0 %v767_v23, %s5580_s30  ;;  %1114 = vrot.lane.b32.xlu1 %v4296_v29, %s5565_s2  ;;  %s5581_s2 = smov 124  }
  0xe8   : > { %890 = vrot.lane.b32.xlu2 %v768_v27, %s5567_s23  ;;  %s5582_s23 = smov 127  }
  0xef   : > { %998 = vrot.lane.b32.xlu0 %v765_v21, %s5581_s2  ;;  %1116 = vrot.lane.b32.xlu1 %v4312_v33, %s5582_s23 }
  0xf0   : > { %1112 = vrot.lane.b32.xlu2 %v4317_v34, %s5582_s23 }
  0xf7   : > { %1000 = vrot.lane.b32.xlu0 %v766_v22, %s5581_s2  ;;  %1118 = vrot.lane.b32.xlu1 %v4324_v36, %s5582_s23  ;;  %v3644_v22 = vld [vmem:[%s5548_s1 + $0x138] sm:$0x3] }
  0xf8   : > { %1169 = vrot.lane.b32.xlu2 %v4317_v34, %s5583_s21  ;;  %3645 = vmatpush.msk.msra.mxu1 %vm521_vm2, %v3644_v22 }
  0xf9   : > { %v505_v37 = vpop.permute.xlu2 %504 }
  0xfa   : > { %3569 = vmatmul.msk.f32.vlgmr.msra.gmra.mxu0 %vm512_vm5, %v505_v37  ;;  %1030 = vmatpush.msra.mxu1 %v3643_v24  ;;  %v3671_v37 = vld [vmem:[%s5548_s1 + $0x198] sm:$0x3] }
  0xfb   : > { %3636 = vmatpush.msk.msra.mxu0 %vm521_vm2, %v3635_v3  ;;  %v3734_v24 = vld [vmem:[%s5548_s1 + $0x278] sm:$0x3] }
  0xfd   : > { %973 = vmatpush.msra.mxu0 %v3634_v4  ;;  %v3695_v4 = vld [vmem:[%s5548_s1 + $0x1e0] sm:$0xff] }
  0xff   : > { %1002 = vrot.lane.b32.xlu0 %v767_v23, %s5581_s2  ;;  %1283 = vrot.lane.b32.xlu1 %v4317_v34, %s5581_s2  ;;  %v3662_v23 = vld [vmem:[%s5548_s1 + $0x178] sm:$0x3] }
 0x100   : > { %1171 = vrot.lane.b32.xlu2 %v4296_v29, %s5583_s21  ;;  %974 = vmatpush.msra.mxu0 %v3633_v6  ;;  %v3677_v6 = vld [vmem:[%s5548_s1 + $0x1a0] sm:$0xff] }
 0x102   : > { %v507_v42 = vpop.permute.xlu2 %506  ;;  %975 = vmatpush.msra.mxu0 %v3632_v9 }
 0x103   : > { %3570 = vmatmul.msk.f32.gmra.mxu0 %vm512_vm5, %v507_v42 }
 0x107   : > { %1004 = vrot.lane.b32.xlu0 %v768_v27, %s5581_s2  ;;  %1285 = vrot.lane.b32.xlu1 %v4296_v29, %s5581_s2  ;;  %v3642_v27 = vld [vmem:[%s5548_s1 + $0x128] sm:$0xff] }
 0x108   : > { %1173 = vrot.lane.b32.xlu2 %v4312_v33, %s5583_s21  ;;  %1031 = vmatpush.msra.mxu1 %v3642_v27  ;;  %v3714_v27 = vld [vmem:[%s5548_s1 + $0x228] sm:$0xff] }
 0x10a   : > { %v511_v47 = vpop.permute.xlu2 %510  ;;  %1032 = vmatpush.msra.mxu1 %v3641_v35 }
 0x10f   : > { %1226 = vrot.lane.b32.xlu0 %v4317_v34, %s5580_s30  ;;  %1287 = vrot.lane.b32.xlu1 %v4312_v33, %s5581_s2 }
 0x110   : > { %1175 = vrot.lane.b32.xlu2 %v4324_v36, %s5583_s21 }
 0x111   : > { %v600_v52 = vpop.permute.xlu1 %599 }
 0x112   : > { %v659_v53 = vpop.permute.xlu2 %658  ;;  %3583 = vmatmul.msk.f32.vlgmr.msra.gmra.mxu2 %vm512_vm5, %v600_v52  ;;  %v4562_v52 = vld [vmem:[#allocation2 + $0xc] sm:$0xff] }
 0x113   : > { %3654 = vmatpush.msk.msra.mxu2 %vm521_vm2, %v3653_v11 }
 0x115   : > { %1087 = vmatpush.msra.mxu2 %v3652_v12  ;;  %v3704_v12 = vld [vmem:[%s5548_s1 + $0x200] sm:$0xff] }
 0x117   : > { %1228 = vrot.lane.b32.xlu0 %v4296_v29, %s5580_s30  ;;  %1289 = vrot.lane.b32.xlu1 %v4324_v36, %s5581_s2 }
 0x118   : > { %1397 = vrot.lane.b32.xlu2 %v4393_v54, %s5582_s23  ;;  %1088 = vmatpush.msra.mxu2 %v3651_v14  ;;  %v3725_v14 = vld [vmem:[%s5548_s1 + $0x258] sm:$0x3] }
 0x119   : > { %v509_v55 = vpop.permute.xlu0 %508  ;;  %v602_v56 = vpop.permute.xlu1 %601 }
 0x11a   : > { %v661_v57 = vpop.permute.xlu2 %660  ;;  %3571 = vmatmul.msk.f32.gmra.mxu0 %vm512_vm5, %v509_v55  ;;  %3584 = vmatmul.msk.f32.gmra.mxu2 %vm512_vm5, %v602_v56 }
 0x11b   : > { %1089 = vmatpush.msra.mxu2 %v3650_v17 }
 0x11f   : > { %1230 = vrot.lane.b32.xlu0 %v4312_v33, %s5580_s30  ;;  %1511 = vrot.lane.b32.xlu1 %v4393_v54, %s5580_s30 }
 0x120   : > { %1399 = vrot.lane.b32.xlu2 %v4413_v61, %s5582_s23 }
 0x121   : > { %v657_v62 = vpop.permute.xlu0 %656  ;;  %v604_v63 = vpop.permute.xlu1 %603 }
 0x122   : > { %v663_v2 = vpop.permute.xlu2 %662  ;;  %3572 = vmatmul.msk.f32.gmra.mxu0 %vm512_vm5, %v511_v47  ;;  %3585 = vmatmul.msk.f32.gmra.mxu2 %vm512_vm5, %v604_v63  ;;  %v3687_v47 = vld [vmem:[%s5548_s1 + $0x1c8] sm:$0xff] }
 0x123   : > { %3592 = vmatmul.msk.f32.vlgmr.msra.gmra.mxu3 %vm512_vm5, %v657_v62 }
 0x124   : > { %3663 = vmatpush.msk.msra.mxu3 %vm521_vm2, %v3662_v23  ;;  %v3716_v23 = vld [vmem:[%s5548_s1 + $0x238] sm:$0x3] }
 0x126   : > { %1144 = vmatpush.msra.mxu3 %v3661_v25  ;;  %v3715_v25 = vld [vmem:[%s5548_s1 + $0x230] sm:$0xff] }
 0x127   : > { %1232 = vrot.lane.b32.xlu0 %v4324_v36, %s5580_s30  ;;  %1454 = vrot.lane.b32.xlu1 %v4393_v54, %s5583_s21 }
 0x128   : > { %1401 = vrot.lane.b32.xlu2 %v4434_v5, %s5582_s23  ;;  %1145 = vmatpush.msra.mxu3 %v3660_v26  ;;  %v3733_v26 = vld [vmem:[%s5548_s1 + $0x270] sm:$0xff] }
 0x129   : > { %v714_v7 = vpop.permute.xlu0 %713  ;;  %v606_v8 = vpop.permute.xlu1 %605 }
 0x12a   : > { %v720_v10 = vpop.permute.xlu2 %719  ;;  %3586 = vmatmul.msk.f32.gmra.mxu2 %vm512_vm5, %v606_v8  ;;  %3601 = vmatmul.msk.f32.vlgmr.msrb.gmra.mxu0 %vm512_vm5, %v714_v7  ;;  %v3707_v7 = vld [vmem:[%s5548_s1 + $0x218] sm:$0x3] }
 0x12b   : > { %3593 = vmatmul.msk.f32.gmra.mxu3 %vm512_vm5, %v659_v53  ;;  %3672 = vmatpush.msk.msrb.mxu0 %vm521_vm2, %v3671_v37  ;;  %v4564_v53 = vld [vmem:[#allocation2 + $0x14] sm:$0xff]  ;;  %v3713_v37 = vld [vmem:[%s5548_s1 + $0x220] sm:$0xff] }
 0x12c   : > { %1146 = vmatpush.msra.mxu3 %v3659_v31 }
 0x12d   : > { %1201 = vmatpush.msrb.mxu0 %v3670_v38  ;;  %v3743_v38 = vld [vmem:[%s5548_s1 + $0x298] sm:$0x3] }
 0x12f   : > { %1568 = vrot.lane.b32.xlu0 %v4393_v54, %s5581_s2  ;;  %1456 = vrot.lane.b32.xlu1 %v4413_v61, %s5583_s21 }
 0x130   : > { %1403 = vrot.lane.b32.xlu2 %v4458_v13, %s5582_s23  ;;  %1202 = vmatpush.msrb.mxu0 %v3669_v40 }
 0x131   : > { %v716_v15 = vpop.permute.xlu0 %715  ;;  %v828_v16 = vpop.permute.xlu1 %827 }
 0x132   : > { %v887_v18 = vpop.permute.xlu2 %886  ;;  %3602 = vmatmul.msk.f32.gmra.mxu0 %vm512_vm5, %v716_v15  ;;  %3619 = vmatmul.msk.f32.vlgmr.msrb.gmra.mxu2 %vm512_vm5, %v828_v16  ;;  %v3724_v15 = vld [vmem:[%s5548_s1 + $0x250] sm:$0xff] }
 0x133   : > { %3594 = vmatmul.msk.f32.gmra.mxu3 %vm512_vm5, %v661_v57  ;;  %1203 = vmatpush.msrb.mxu0 %v3668_v43 }
 0x134   : > { %3690 = vmatpush.msk.msrb.mxu2 %vm521_vm2, %v3689_v45  ;;  %v3740_v45 = vld [vmem:[%s5548_s1 + $0x280] sm:$0xff] }
 0x136   : > { %1315 = vmatpush.msrb.mxu2 %v3688_v46  ;;  %v3761_v46 = vld [vmem:[%s5548_s1 + $0x2d8] sm:$0x3] }
 0x137   : > { %1570 = vrot.lane.b32.xlu0 %v4413_v61, %s5581_s2  ;;  %1458 = vrot.lane.b32.xlu1 %v4434_v5, %s5583_s21 }
 0x138   : > { %1513 = vrot.lane.b32.xlu2 %v4413_v61, %s5580_s30  ;;  %1316 = vmatpush.msrb.mxu2 %v3687_v47 }
 0x139   : > { %v718_v19 = vpop.permute.xlu0 %717  ;;  %v830_v20 = vpop.permute.xlu1 %829 }
 0x13a   : > { %v889_v21 = vpop.permute.xlu2 %888  ;;  %3603 = vmatmul.msk.f32.gmra.mxu0 %vm512_vm5, %v718_v19  ;;  %3620 = vmatmul.msk.f32.gmra.mxu2 %vm512_vm5, %v830_v20 }
 0x13b   : > { %3595 = vmatmul.msk.f32.gmra.mxu3 %vm512_vm5, %v663_v2  ;;  %1317 = vmatpush.msrb.mxu2 %v3686_v50  ;;  %v3696_v2 = vld [vmem:[%s5548_s1 + $0x1e8] sm:$0xff] }
 0x13f   : > { %1572 = vrot.lane.b32.xlu0 %v4434_v5, %s5581_s2  ;;  %1460 = vrot.lane.b32.xlu1 %v4458_v13, %s5583_s21 }
 0x140   : > { %1515 = vrot.lane.b32.xlu2 %v4434_v5, %s5580_s30 }
 0x141   : > { %v885_v28 = vpop.permute.xlu0 %884  ;;  %v832_v30 = vpop.permute.xlu1 %831 }
 0x142   : > { %v891_v32 = vpop.permute.xlu2 %890  ;;  %3604 = vmatmul.msk.f32.gmra.mxu0 %vm512_vm5, %v720_v10  ;;  %3621 = vmatmul.msk.f32.gmra.mxu2 %vm512_vm5, %v832_v30  ;;  %v3705_v10 = vld [vmem:[%s5548_s1 + $0x208] sm:$0xff] }
 0x143   : > { %3628 = vmatmul.msk.f32.vlgmr.msrb.gmra.mxu3 %vm512_vm5, %v885_v28  ;;  %v3732_v28 = vld [vmem:[%s5548_s1 + $0x268] sm:$0xff] }
 0x144   : > { %3699 = vmatpush.msk.msrb.mxu3 %vm521_vm2, %v3698_v58 }
 0x147   : > { %1574 = vrot.lane.b32.xlu0 %v4458_v13, %s5581_s2  ;;  %1682 = vrot.lane.b32.xlu1 %v4522_v39, %s5582_s23 }
 0x148   : > { %1517 = vrot.lane.b32.xlu2 %v4458_v13, %s5580_s30 }
 0x149   : > { %v942_v41 = vpop.permute.xlu0 %941  ;;  %v834_v42 = vpop.permute.xlu1 %833 }
 0x14a   : > { %v1113_v44 = vpop.permute.xlu2 %1112  ;;  %3622 = vmatmul.msk.f32.gmra.mxu2 %vm512_vm5, %v834_v42  ;;  %3637 = vmatmul.msk.f32.vlgmr.msra.gmra.mxu0 %vm512_vm5, %v942_v41  ;;  %v3742_v41 = vld [vmem:[%s5548_s1 + $0x290] sm:$0xff] }
 0x14b   : > { %3629 = vmatmul.msk.f32.gmra.mxu3 %vm512_vm5, %v887_v18  ;;  %3708 = vmatpush.msk.msra.mxu0 %vm521_vm2, %v3707_v7  ;;  %v3722_v18 = vld [vmem:[%s5548_s1 + $0x240] sm:$0xff]  ;;  %v3750_v7 = vld [vmem:[%s5548_s1 + $0x2a8] sm:$0xff] }
 0x14f   : > { %1796 = vrot.lane.b32.xlu0 %v4522_v39, %s5580_s30  ;;  %1853 = vrot.lane.b32.xlu1 %v4522_v39, %s5581_s2 }
 0x150   : > { %1739 = vrot.lane.b32.xlu2 %v4522_v39, %s5583_s21 }
 0x151   : > { %v944_v48 = vpop.permute.xlu0 %943  ;;  %v948_v49 = vpop.permute.xlu1 %947 }
 0x152   : > { %v1170_v51 = vpop.permute.xlu2 %1169  ;;  %3638 = vmatmul.msk.f32.gmra.mxu0 %vm512_vm5, %v944_v48  ;;  %3655 = vmatmul.msk.f32.vlgmr.msra.gmra.mxu2 %vm512_vm5, %v4317_v34  ;;  %v3680_v34 = vld [vmem:[%s5548_s1 + $0x1b8] sm:$0x3]  ;;  %v3760_v48 = vld [vmem:[%s5548_s1 + $0x2d0] sm:$0xff] }
 0x153   : > { %3630 = vmatmul.msk.f32.gmra.mxu3 %vm512_vm5, %v889_v21  ;;  %3681 = vmatpush.msk.msrb.mxu1 %vm521_vm2, %v3680_v34 }
 0x154   : > { %3726 = vmatpush.msk.msra.mxu2 %vm521_vm2, %v3725_v14 }
 0x155   : > { %1258 = vmatpush.msrb.mxu1 %v3679_v59 }
 0x156   : > { %1543 = vmatpush.msra.mxu2 %v3724_v15 }
 0x157   : > { %1798 = vrot.lane.b32.xlu0 %v4562_v52, %s5580_s30  ;;  %1800 = vrot.lane.b32.xlu1 %v4564_v53, %s5580_s30 }
 0x158   : > { %1741 = vrot.lane.b32.xlu2 %v4562_v52, %s5583_s21  ;;  %1259 = vmatpush.msrb.mxu1 %v3678_v1 }
 0x159   : > { %v946_v55 = vpop.permute.xlu0 %945  ;;  %v1115_v56 = vpop.permute.xlu1 %1114 }
 0x15a   : > { %v1172_v57 = vpop.permute.xlu2 %1171  ;;  %3639 = vmatmul.msk.f32.gmra.mxu0 %vm512_vm5, %v946_v55  ;;  %3656 = vmatmul.msk.f32.gmra.mxu2 %vm512_vm5, %v4296_v29  ;;  %v3697_v29 = vld [vmem:[%s5548_s1 + $0x1f0] sm:$0xff] }
 0x15b   : > { %3631 = vmatmul.msk.f32.gmra.mxu3 %vm512_vm5, %v891_v32  ;;  %1260 = vmatpush.msrb.mxu1 %v3677_v6  ;;  %v3731_v32 = vld [vmem:[%s5548_s1 + $0x260] sm:$0xff] }
 0x15c   : > { %1372 = vmatpush.msrb.mxu3 %v3697_v29 }
 0x15e   : > { %1373 = vmatpush.msrb.mxu3 %v3696_v2 }
 0x15f   : > { %1743 = vrot.lane.b32.xlu0 %v4564_v53, %s5583_s21  ;;  %1745 = vrot.lane.b32.xlu1 %v4590_v60, %s5583_s21 }
 0x160   : > { %1684 = vrot.lane.b32.xlu2 %v4562_v52, %s5582_s23  ;;  %1374 = vmatpush.msrb.mxu3 %v3695_v4 }
 0x161   : > { %v999_v62 = vpop.permute.xlu0 %998  ;;  %v1117_v63 = vpop.permute.xlu1 %1116 }
 0x162   : > { %v1174_v3 = vpop.permute.xlu2 %1173  ;;  %3640 = vmatmul.msk.f32.gmra.mxu0 %vm512_vm5, %v948_v49  ;;  %3646 = vmatmul.msk.f32.vlgmr.msra.gmra.mxu1 %vm512_vm5, %v999_v62  ;;  %v4726_v49 = vpop.f32.mrf.mxu1  ;;  %v3770_v62 = vld [vmem:[%s5548_s1 + $0x2f8] sm:$0x3] }
 0x163   : > { %3657 = vmatmul.msk.f32.gmra.mxu2 %vm512_vm5, %v4312_v33  ;;  %3664 = vmatmul.msk.f32.vlgmr.msra.gmra.mxu3 %vm512_vm5, %v1113_v44  ;;  %v3706_v33 = vld [vmem:[%s5548_s1 + $0x210] sm:$0xff] }
 0x164   : > { %1429 = vmatpush.msra.mxu0 %v3706_v33  ;;  %3717 = vmatpush.msk.msra.mxu1 %vm521_vm2, %v3716_v23  ;;  %v3768_v33 = vld [vmem:[%s5548_s1 + $0x2e8] sm:$0xff] }
 0x165   : > { %3735 = vmatpush.msk.msra.mxu3 %vm521_vm2, %v3734_v24 }
 0x166   : > { %1430 = vmatpush.msra.mxu0 %v3705_v10  ;;  %1486 = vmatpush.msra.mxu1 %v3715_v25  ;;  %v3779_v10 = vld [vmem:[%s5548_s1 + $0x318] sm:$0x3] }
 0x167   : > { %1686 = vrot.lane.b32.xlu0 %v4564_v53, %s5582_s23  ;;  %1688 = vrot.lane.b32.xlu1 %v4590_v60, %s5582_s23 }
 0x168   : > { %1855 = vrot.lane.b32.xlu2 %v4562_v52, %s5581_s2  ;;  %1431 = vmatpush.msra.mxu0 %v3704_v12 }
 0x169   : > { %v1001_v8 = vpop.permute.xlu0 %1000  ;;  %v1119_v9 = vpop.permute.xlu1 %1118  ;;  %1600 = vmatpush.msra.mxu3 %v3733_v26  ;;  %1487 = vmatpush.msra.mxu1 %v3714_v27 }
 0x16a   : > { %v1176_v11 = vpop.permute.xlu2 %1175  ;;  %3647 = vmatmul.msk.f32.gmra.mxu1 %vm512_vm5, %v1001_v8  ;;  %3673 = vmatmul.msk.f32.vlgmr.msrb.gmra.mxu0 %vm512_vm5, %v1170_v51  ;;  %v3759_v51 = vld [vmem:[%s5548_s1 + $0x2c8] sm:$0xff]  ;;  %v4743_v29 = vpop.f32.mrf.mxu1  ;;  %v3767_v8 = vld [vmem:[%s5548_s1 + $0x2e0] sm:$0xff] }
 0x16b   : > { %3658 = vmatmul.msk.f32.gmra.mxu2 %vm512_vm5, %v4324_v36  ;;  %3665 = vmatmul.msk.f32.gmra.mxu3 %vm512_vm5, %v1115_v56  ;;  %v3723_v36 = vld [vmem:[%s5548_s1 + $0x248] sm:$0xff]  ;;  %v3758_v56 = vld [vmem:[%s5548_s1 + $0x2c0] sm:$0xff] }
 0x16c   : > { %1544 = vmatpush.msra.mxu2 %v3723_v36  ;;  %1601 = vmatpush.msra.mxu3 %v3732_v28 }
 0x16d   : > { %1488 = vmatpush.msra.mxu1 %v3713_v37  ;;  %3744 = vmatpush.msk.msrb.mxu0 %vm521_vm2, %v3743_v38 }
 0x16e   : > { %1545 = vmatpush.msra.mxu2 %v3722_v18  ;;  %1602 = vmatpush.msra.mxu3 %v3731_v32 }
 0x16f   : > { %1857 = vrot.lane.b32.xlu0 %v4564_v53, %s5581_s2  ;;  %1657 = vmatpush.msrb.mxu0 %v3742_v41 }
 0x170   : > { %1802 = vrot.lane.b32.xlu2 %v4590_v60, %s5580_s30  ;;  %s448_s30 = sand.u32 1, %s4060_s26  }
 0x171   : > { %v1003_v16 = vpop.permute.xlu0 %1002  ;;  %v1284_v17 = vpop.permute.xlu1 %1283  ;;  %s449_s22 = scalar_lea.vmem [#allocation7], %s448_s30 }
 0x172   : > { %v1398_v19 = vpop.permute.xlu2 %1397  ;;  %3648 = vmatmul.msk.f32.gmra.mxu1 %vm512_vm5, %v1003_v16  ;;  %3674 = vmatmul.msk.f32.gmra.mxu0 %vm512_vm5, %v1172_v57  ;;  %v3778_v16 = vld [vmem:[%s5548_s1 + $0x310] sm:$0xff]  ;;  %s3487_s15 = sshll.u32 %s449_s22, 4  ;;  %s3488_s15 = int_to_ptr.vmem [resolvable:$true] %s3487_s15 }
 0x173   : > { %3666 = vmatmul.msk.f32.gmra.mxu3 %vm512_vm5, %v1117_v63  ;;  %3691 = vmatmul.msk.f32.vlgmr.msrb.gmra.mxu2 %vm512_vm5, %v1284_v17 }
 0x174   : > { %3762 = vmatpush.msk.msrb.mxu2 %vm521_vm2, %v3761_v46 }
 0x176   : > { %1771 = vmatpush.msrb.mxu2 %v3760_v48 }
 0x177   : > { %v4700_v40 = vpop.f32.mrf.mxu0 }
 0x178   : > { %1859 = vrot.lane.b32.xlu2 %v4590_v60, %s5581_s2  ;;  %1772 = vmatpush.msrb.mxu2 %v3759_v51 }
 0x179   : > { %v1005_v20 = vpop.permute.xlu0 %1004  ;;  %v1286_v21 = vpop.permute.xlu1 %1285 }
 0x17a   : > { %v1400_v22 = vpop.permute.xlu2 %1399  ;;  %3649 = vmatmul.msk.f32.gmra.mxu1 %vm512_vm5, %v1005_v20  ;;  %3675 = vmatmul.msk.f32.gmra.mxu0 %vm512_vm5, %v1174_v3  ;;  %v3769_v3 = vld [vmem:[%s5548_s1 + $0x2f0] sm:$0xff]  ;;  %v3776_v20 = vld [vmem:[%s5548_s1 + $0x300] sm:$0xff] }
 0x17b   : > { %3667 = vmatmul.msk.f32.gmra.mxu3 %vm512_vm5, %v1119_v9  ;;  %3692 = vmatmul.msk.f32.gmra.mxu2 %vm512_vm5, %v1286_v21  ;;  %v3749_v9 = vld [vmem:[%s5548_s1 + $0x2a0] sm:$0xff] }
 0x17c   : > { %1773 = vmatpush.msrb.mxu2 %v3758_v56 }
 0x180   : > { %v4721_v47 = vpop.f32.mrf.mxu0 }
 0x181   : > { %v1227_v30 = vpop.permute.xlu0 %1226  ;;  %v1288_v31 = vpop.permute.xlu1 %1287  ;;  %v586_v0 = vadd.f32 %v4743_v29, %v4721_v47 }
 0x182   : > { %v1402_v35 = vpop.permute.xlu2 %1401  ;;  %3676 = vmatmul.msk.f32.gmra.mxu0 %vm512_vm5, %v1176_v11  ;;  %3682 = vmatmul.msk.f32.vlgmr.msrb.gmra.mxu1 %vm512_vm5, %v1227_v30  ;;  %v4787_v11 = vpop.f32.mrf.mxu1 }
 0x183   : > { %3693 = vmatmul.msk.f32.gmra.mxu2 %vm512_vm5, %v1288_v31  ;;  %3700 = vmatmul.msk.f32.vlgmr.msrb.gmra.mxu3 %vm512_vm5, %v4393_v54  ;;  %v3741_v54 = vld [vmem:[%s5548_s1 + $0x288] sm:$0xff] }
 0x184   : > { %1658 = vmatpush.msrb.mxu0 %v3741_v54  ;;  %3771 = vmatpush.msk.msrb.mxu3 %vm521_vm2, %v3770_v62 }
 0x186   : > { %1659 = vmatpush.msrb.mxu0 %v3740_v45  ;;  %1828 = vmatpush.msrb.mxu3 %v3769_v3 }
 0x188   : > { %1829 = vmatpush.msrb.mxu3 %v3768_v33 }
 0x189   : > { %v1229_v42 = vpop.permute.xlu0 %1228  ;;  %v1290_v43 = vpop.permute.xlu1 %1289 }
 0x18a   : > { %v1404_v44 = vpop.permute.xlu2 %1403  ;;  %3683 = vmatmul.msk.f32.gmra.mxu1 %vm512_vm5, %v1229_v42  ;;  %3709 = vmatmul.msk.f32.vlgmr.msra.gmra.mxu0 %vm512_vm5, %v1398_v19  ;;  %v3777_v19 = vld [vmem:[%s5548_s1 + $0x308] sm:$0xff] }
 0x18b   : > { %3694 = vmatmul.msk.f32.gmra.mxu2 %vm512_vm5, %v1290_v43  ;;  %3701 = vmatmul.msk.f32.gmra.mxu3 %vm512_vm5, %v4413_v61 }
 0x18c   : > { %3780 = vmatpush.msk.msra.mxu0 %vm521_vm2, %v3779_v10  ;;  %1830 = vmatpush.msrb.mxu3 %v3767_v8 }
 0x18e   : > { %1885 = vmatpush.msra.mxu0 %v3778_v16 }
 0x190   : > { %1886 = vmatpush.msra.mxu0 %v3777_v19 }
 0x191   : > { %v1231_v61 = vpop.permute.xlu0 %1230  ;;  %v1512_v50 = vpop.permute.xlu1 %1511 }
 0x192   : > { %v1514_v55 = vpop.permute.xlu2 %1513  ;;  %3684 = vmatmul.msk.f32.gmra.mxu1 %vm512_vm5, %v1231_v61  ;;  %3710 = vmatmul.msk.f32.gmra.mxu0 %vm512_vm5, %v1400_v22  ;;  %v4812_v22 = vpop.f32.mrf.mxu1 }
 0x193   : > { %3702 = vmatmul.msk.f32.gmra.mxu3 %vm512_vm5, %v4434_v5  ;;  %3727 = vmatmul.msk.f32.vlgmr.msra.gmra.mxu2 %vm512_vm5, %v1512_v50  ;;  %v3752_v5 = vld [vmem:[%s5548_s1 + $0x2b8] sm:$0x3] }
 0x194   : > { %3753 = vmatpush.msk.msrb.mxu1 %vm521_vm2, %v3752_v5  ;;  %1887 = vmatpush.msra.mxu0 %v3776_v20 }
 0x195   : > { %v4739_v57 = vpop.f32.mrf.mxu2 }
 0x197   : > { %v4741_v34 = vpop.f32.mrf.mxu0 }
 0x199   : > { %v1233_v58 = vpop.permute.xlu0 %1232  ;;  %v1455_v59 = vpop.permute.xlu1 %1454 }
 0x19a   : > { %3685 = vmatmul.msk.f32.gmra.mxu1 %vm512_vm5, %v1233_v58  ;;  %3711 = vmatmul.msk.f32.gmra.mxu0 %vm512_vm5, %v1402_v35  ;;  %v1516_v63 = vpop.permute.xlu2 %1515  ;;  %v4829_v31 = vpop.f32.mrf.mxu1 }
 0x19b   : > { %3703 = vmatmul.msk.f32.gmra.mxu3 %vm512_vm5, %v4458_v13  ;;  %3728 = vmatmul.msk.f32.gmra.mxu2 %vm512_vm5, %v1514_v55  ;;  %v3751_v13 = vld [vmem:[%s5548_s1 + $0x2b0] sm:$0xff] }
 0x19c   : > { %1714 = vmatpush.msrb.mxu1 %v3751_v13 }
 0x19d   : > { %v4758_v1 = vpop.f32.mrf.mxu2 }
 0x19e   : > { %1715 = vmatpush.msrb.mxu1 %v3750_v7 }
 0x19f   : > { %v4760_v2 = vpop.f32.mrf.mxu0 }
 0x1a0   : > { %1716 = vmatpush.msrb.mxu1 %v3749_v9 }
 0x1a1   : > { %v1569_v4 = vpop.permute.xlu0 %1568  ;;  %v1457_v6 = vpop.permute.xlu1 %1456 }
 0x1a2   : > { %3712 = vmatmul.msk.f32.gmra.mxu0 %vm512_vm5, %v1404_v44  ;;  %3718 = vmatmul.msk.f32.vlgmr.msra.gmra.mxu1 %vm512_vm5, %v1455_v59  ;;  %v1518_v14 = vpop.permute.xlu2 %1517  ;;  %v4842_v43 = vpop.f32.mrf.mxu1 }
 0x1a3   : > { %3729 = vmatmul.msk.f32.gmra.mxu2 %vm512_vm5, %v1516_v63  ;;  %3736 = vmatmul.msk.f32.vlgmr.msra.gmra.mxu3 %vm512_vm5, %v1569_v4 }
 0x1a5   : > { %v4789_v12 = vpop.f32.mrf.mxu2 }
 0x1a6   : > { %v4792_v15 = vpop.f32.mrf.mxu3 }
 0x1a7   : > { %v4794_v36 = vpop.f32.mrf.mxu0 }
 0x1a9   : > { %v1571_v17 = vpop.permute.xlu0 %1570  ;;  %v1459_v18 = vpop.permute.xlu1 %1458 }
 0x1aa   : > { %3719 = vmatmul.msk.f32.gmra.mxu1 %vm512_vm5, %v1457_v6  ;;  %3745 = vmatmul.msk.f32.vlgmr.msrb.gmra.mxu0 %vm512_vm5, %v4522_v39  ;;  %v1740_v25 = vpop.permute.xlu2 %1739 }
 0x1ab   : > { %3730 = vmatmul.msk.f32.gmra.mxu2 %vm512_vm5, %v1518_v14  ;;  %3737 = vmatmul.msk.f32.gmra.mxu3 %vm512_vm5, %v1571_v17 }
 0x1ad   : > { %v4810_v21 = vpop.f32.mrf.mxu2 }
 0x1ae   : > { %v4814_v23 = vpop.f32.mrf.mxu3 }
 0x1af   : > { %v4816_v24 = vpop.f32.mrf.mxu0 }
 0x1b1   : > { %v1573_v39 = vpop.permute.xlu0 %1572  ;;  %v1461_v26 = vpop.permute.xlu1 %1460 }
 0x1b2   : > { %3720 = vmatmul.msk.f32.gmra.mxu1 %vm512_vm5, %v1459_v18  ;;  %3746 = vmatmul.msk.f32.gmra.mxu0 %vm512_vm5, %v4562_v52  ;;  %v1742_v37 = vpop.permute.xlu2 %1741 }
 0x1b3   : > { %3738 = vmatmul.msk.f32.gmra.mxu3 %vm512_vm5, %v1573_v39  ;;  %3763 = vmatmul.msk.f32.vlgmr.msrb.gmra.mxu2 %vm512_vm5, %v1740_v25 }
 0x1b5   : > { %v4823_v27 = vpop.f32.mrf.mxu2 }
 0x1b6   : > { %v4825_v28 = vpop.f32.mrf.mxu3 }
 0x1b7   : > { %v4827_v30 = vpop.f32.mrf.mxu0 }
 0x1b9   : > { %v1575_v32 = vpop.permute.xlu0 %1574  ;;  %v1683_v35 = vpop.permute.xlu1 %1682 }
 0x1ba   : > { %3721 = vmatmul.msk.f32.gmra.mxu1 %vm512_vm5, %v1461_v26  ;;  %3747 = vmatmul.msk.f32.gmra.mxu0 %vm512_vm5, %v4564_v53  ;;  %v1685_v44 = vpop.permute.xlu2 %1684 }
 0x1bb   : > { %3739 = vmatmul.msk.f32.gmra.mxu3 %vm512_vm5, %v1575_v32  ;;  %3764 = vmatmul.msk.f32.gmra.mxu2 %vm512_vm5, %v1742_v37 }
 0x1bd   : > { %v4836_v52 = vpop.f32.mrf.mxu2 }
 0x1be   : > { %v4838_v38 = vpop.f32.mrf.mxu3 }
 0x1bf   : > { %v4840_v41 = vpop.f32.mrf.mxu0 }
 0x1c1   : > { %v1797_v42 = vpop.permute.xlu0 %1796  ;;  %v1854_v54 = vpop.permute.xlu1 %1853 }
 0x1c2   : > { %3748 = vmatmul.msk.f32.gmra.mxu0 %vm512_vm5, %v4590_v60  ;;  %3754 = vmatmul.msk.f32.vlgmr.msrb.gmra.mxu1 %vm512_vm5, %v1683_v35  ;;  %v4857_v60 = vpop.f32.mrf.mxu1  ;;  %v1856_v56 = vpop.permute.xlu2 %1855 }
 0x1c3   : > { %3772 = vmatmul.msk.f32.vlgmr.msrb.gmra.mxu3 %vm512_vm5, %v1797_v42 }
 0x1c5   : > { %v4848_v53 = vpop.f32.mrf.mxu2 }
 0x1c6   : > { %v4850_v45 = vpop.f32.mrf.mxu3 }
 0x1c7   : > { %v4852_v46 = vpop.f32.mrf.mxu0 }
 0x1c9   : > { %v1799_v48 = vpop.permute.xlu0 %1798  ;;  %v1801_v61 = vpop.permute.xlu1 %1800 }
 0x1ca   : > { %3755 = vmatmul.msk.f32.gmra.mxu1 %vm512_vm5, %v1685_v44  ;;  %3781 = vmatmul.msk.f32.vlgmr.msra.gmra.mxu0 %vm512_vm5, %v1854_v54  ;;  %v4870_v5 = vpop.f32.mrf.mxu1  ;;  %v1803_v4 = vpop.permute.xlu2 %1802 }
 0x1cb   : > { %3773 = vmatmul.msk.f32.gmra.mxu3 %vm512_vm5, %v1799_v48 }
 0x1cd   : > { %v4859_v50 = vpop.f32.mrf.mxu2 }
 0x1ce   : > { %v4861_v51 = vpop.f32.mrf.mxu3 }
 0x1cf   : > { %v4863_v55 = vpop.f32.mrf.mxu0 }
 0x1d1   : > { %v1744_v58 = vpop.permute.xlu0 %1743  ;;  %v1746_v63 = vpop.permute.xlu1 %1745 }
 0x1d2   : > { %3765 = vmatmul.msk.f32.gmra.mxu2 %vm512_vm5, %v1744_v58  ;;  %3782 = vmatmul.msk.f32.gmra.mxu0 %vm512_vm5, %v1856_v56  ;;  %v1860_v19 = vpop.permute.xlu2 %1859 }
 0x1d3   : > { %3774 = vmatmul.msk.f32.gmra.mxu3 %vm512_vm5, %v1801_v61 }
 0x1d5   : > { %v4868_v59 = vpop.f32.mrf.mxu2 }
 0x1d6   : > { %v4872_v62 = vpop.f32.mrf.mxu3 }
 0x1d7   : > { %v4874_v13 = vpop.f32.mrf.mxu0 }
 0x1d9   : > { %v1687_v3 = vpop.permute.xlu0 %1686  ;;  %v1689_v9 = vpop.permute.xlu1 %1688 }
 0x1da   : > { %3756 = vmatmul.msk.f32.gmra.mxu1 %vm512_vm5, %v1687_v3  ;;  %3766 = vmatmul.msk.f32.gmra.mxu2 %vm512_vm5, %v1746_v63  ;;  %v583_v63 = vadd.f32 %v4726_v49, %v4700_v40  ;;  %v648_v49 = vadd.f32 %v4758_v1, %v586_v0 }
 0x1db   : > { %3775 = vmatmul.msk.f32.gmra.mxu3 %vm512_vm5, %v1803_v4 }
 0x1dc   : > { %v705_v47 = vadd.f32 %v4814_v23, %v648_v49  ;;  %v1975_v23 = vld [vmem:[%s5551_s4 + $0x58] sm:$0xff] }
 0x1dd   : > { %v4879_v6 = vpop.f32.mrf.mxu2 }
 0x1de   : > { %v4881_v7 = vpop.f32.mrf.mxu3  ;;  %v762_v0 = vadd.f32 %v4816_v24, %v705_v47  ;;  %v1919_v24 = vld [vmem:[%s5550_s3 + $0x50] sm:$0xff]  ;;  %v1917_v47 = vld [vmem:[%s5550_s3 + $0x40] sm:$0xff] }
 0x1df   : > { %v4883_v33 = vpop.f32.mrf.mxu0  ;;  %v4885_v8 = vpop.f32.mrf.mxu1 }
 0x1e0   : > { %v819_v49 = vadd.f32 %v4842_v43, %v762_v0 }
 0x1e1   : > { %v1858_v10 = vpop.permute.xlu0 %1857 }
 0x1e2   : > { %3757 = vmatmul.msk.f32.gmra.mxu1 %vm512_vm5, %v1689_v9  ;;  %3783 = vmatmul.msk.f32.gmra.mxu0 %vm512_vm5, %v1858_v10  ;;  %v647_v9 = vadd.f32 %v4739_v57, %v583_v63  ;;  %v1921_v57 = vld [vmem:[%s5550_s3 + $0x60] sm:$0xff] }
 0x1e3   : > { %1938 = vmatpush.msra.mxu1 %v1921_v57  ;;  %v1920_v57 = vld [vmem:[%s5550_s3 + $0x58] sm:$0xff] }
 0x1e4   : > { %v704_v10 = vadd.f32 %v4792_v15, %v647_v9  ;;  %v1976_v15 = vld [vmem:[%s5551_s4 + $0x60] sm:$0xff] }
 0x1e5   : > { %1980 = vmatpush.msra.mxu2 %v1976_v15  ;;  %1939 = vmatpush.msra.mxu1 %v1920_v57 }
 0x1e6   : > { %v4889_v14 = vpop.f32.mrf.mxu2  ;;  %v4891_v16 = vpop.f32.mrf.mxu3 }
 0x1e7   : > { %v4893_v17 = vpop.f32.mrf.mxu1  ;;  %v4895_v18 = vpop.f32.mrf.mxu0  ;;  %1981 = vmatpush.msra.mxu2 %v1975_v23  ;;  %1940 = vmatpush.msra.mxu1 %v1919_v24  ;;  %v589_v23 = vadd.f32 %v4787_v11, %v4741_v34  ;;  %v1916_v24 = vld [vmem:[%s5550_s3 + $0x38] sm:$0xff] }
 0x1e9   : > { %v649_v34 = vadd.f32 %v4789_v12, %v589_v23  ;;  %v1969_v12 = vld [vmem:[%s5551_s4 + $0x28] sm:$0xff] }
 0x1ea   : > { %3784 = vmatmul.msk.f32.gmra.mxu0 %vm512_vm5, %v1860_v19 }
 0x1ee   : > { %v4898_v20 = vpop.f32.mrf.mxu2  ;;  %v4900_v25 = vpop.f32.mrf.mxu3 }
 0x1ef   : > { %v4902_v39 = vpop.f32.mrf.mxu1  ;;  %v4904_v26 = vpop.f32.mrf.mxu0 }
 0x1f6   : > { %v4906_v32 = vpop.f32.mrf.mxu3  ;;  %v4908_v35 = vpop.f32.mrf.mxu2 }
 0x1f7   : > { %v4910_v37 = vpop.f32.mrf.mxu1  ;;  %v4912_v42 = vpop.f32.mrf.mxu0 }
 0x1fe   : > { %v4914_v54 = vpop.f32.mrf.mxu3  ;;  %v4916_v44 = vpop.f32.mrf.mxu2 }
 0x1ff   : > { %5584 = vst [vmem:[#allocation12_spill] sm:$0xff] %v4914_v54  ;;  %v4918_v48 = vpop.f32.mrf.mxu0  ;;  %v4920_v61 = vpop.f32.mrf.mxu1 }
 0x200   : > { %5585 = vst [vmem:[#allocation13_spill] sm:$0xff] %v4918_v48  ;;  %v761_v48 = vadd.f32 %v4794_v36, %v704_v10 }
 0x202   : > { %v818_v29 = vadd.f32 %v4829_v31, %v761_v48  ;;  %v1918_v31 = vld [vmem:[%s5550_s3 + $0x48] sm:$0xff] }
 0x203   : > { %v1973_v48 = vld [vmem:[%s5551_s4 + $0x48] sm:$0xff]  ;;  %1941 = vmatpush.msra.mxu1 %v1918_v31  ;;  %v706_v31 = vadd.f32 %v4825_v28, %v649_v34  ;;  %v1966_v34 = vld [vmem:[%s5551_s4 + $0x10] sm:$0xff] }
 0x204   : > { %v875_v36 = vadd.f32 %v4823_v27, %v818_v29  ;;  %v1974_v27 = vld [vmem:[%s5551_s4 + $0x50] sm:$0xff]  ;;  %v1972_v29 = vld [vmem:[%s5551_s4 + $0x40] sm:$0xff] }
 0x205   : > { %1982 = vmatpush.msra.mxu2 %v1974_v27  ;;  %1942 = vmatpush.msra.mxu1 %v1917_v47  ;;  %v1914_v27 = vld [vmem:[%s5550_s3 + $0x28] sm:$0xff] }
 0x206   : > { %v4922_v56 = vpop.f32.mrf.mxu2  ;;  %v4924_v58 = vpop.f32.mrf.mxu3  ;;  %v932_v1 = vadd.f32 %v4850_v45, %v875_v36  ;;  %v876_v36 = vadd.f32 %v4836_v52, %v819_v49  ;;  %v1971_v52 = vld [vmem:[%s5551_s4 + $0x38] sm:$0xff]  ;;  %v1913_v49 = vld [vmem:[%s5550_s3 + $0x20] sm:$0xff] }
 0x207   : > { %5586 = vst [vmem:[#allocation14_spill] sm:$0xff] %v4922_v56  ;;  %v4928_v3 = vpop.f32.mrf.mxu1  ;;  %v4930_v4 = vpop.f32.mrf.mxu0  ;;  %1983 = vmatpush.msra.mxu2 %v1973_v48  ;;  %1943 = vmatpush.msra.mxu1 %v1916_v24 }
 0x208   : > { %v989_v15 = vadd.f32 %v4852_v46, %v932_v1  ;;  %v933_v46 = vadd.f32 %v4861_v51, %v876_v36  ;;  %v1915_v51 = vld [vmem:[%s5550_s3 + $0x30] sm:$0xff] }
 0x209   : > { %1984 = vmatpush.msra.mxu2 %v1972_v29  ;;  %1944 = vmatpush.msra.mxu1 %v1915_v51  ;;  %v592_v29 = vadd.f32 %v4812_v22, %v4760_v2 }
 0x20a   : > { %v1046_v57 = vadd.f32 %v4885_v8, %v989_v15  ;;  %v1970_v8 = vld [vmem:[%s5551_s4 + $0x30] sm:$0xff]  ;;  %v1968_v15 = vld [vmem:[%s5551_s4 + $0x20] sm:$0xff] }
 0x20b   : > { %1985 = vmatpush.msra.mxu2 %v1971_v52  ;;  %1945 = vmatpush.msra.mxu1 %v1914_v27  ;;  %v650_v24 = vadd.f32 %v4810_v21, %v592_v29  ;;  %v1911_v52 = vld [vmem:[%s5550_s3 + $0x10] sm:$0xff] }
 0x20c   : > { %v1103_v11 = vadd.f32 %v4868_v59, %v1046_v57  ;;  %v990_v59 = vadd.f32 %v4863_v55, %v933_v46  ;;  %v763_v55 = vadd.f32 %v4827_v30, %v706_v31  ;;  %v1912_v46 = vld [vmem:[%s5550_s3 + $0x18] sm:$0xff] }
 0x20d   : > { %1986 = vmatpush.msra.mxu2 %v1970_v8  ;;  %1946 = vmatpush.msra.mxu1 %v1913_v49  ;;  %v707_v30 = vadd.f32 %v4838_v38, %v650_v24  ;;  %v1965_v38 = vld [vmem:[%s5551_s4 + $0x8] sm:$0xff] }
 0x20e   : > { %v4934_v19 = vpop.f32.mrf.mxu3  ;;  %v4943_v40 = vpop.f32.mrf.mxu2  ;;  %v1160_v48 = vadd.f32 %v4891_v16, %v1103_v11  ;;  %v1047_v28 = vadd.f32 %v4893_v17, %v990_v59  ;;  %v1967_v17 = vld [vmem:[%s5551_s4 + $0x18] sm:$0xff] }
 0x20f   : > { %v4939_v56 = vpop.f32.mrf.mxu1  ;;  %v4941_v54 = vpop.f32.mrf.mxu0  ;;  %1987 = vmatpush.msra.mxu2 %v1969_v12  ;;  %1947 = vmatpush.msra.mxu1 %v1912_v46  ;;  %v764_v51 = vadd.f32 %v4840_v41, %v707_v30 }
 0x210   : > { %v1217_v36 = vadd.f32 %v4895_v18, %v1160_v48  ;;  %v1104_v2 = vadd.f32 %v4879_v6, %v1047_v28  ;;  %v820_v18 = vadd.f32 %v4857_v60, %v763_v55  ;;  %v1910_v6 = vld [vmem:[%s5550_s3 + $0x8] sm:$0xff] }
 0x211   : > { %1988 = vmatpush.msra.mxu2 %v1968_v15  ;;  %1948 = vmatpush.msra.mxu1 %v1911_v52 }
 0x212   : > { %v1274_v22 = vadd.f32 %v4920_v61, %v1217_v36  ;;  %v1161_v21 = vadd.f32 %v4900_v25, %v1104_v2  ;;  %v877_v60 = vadd.f32 %v4848_v53, %v820_v18  ;;  %v1909_v61 = vld [vmem:[%s5550_s3] sm:$0xff] }
 0x213   : > { %1989 = vmatpush.msra.mxu2 %v1967_v17  ;;  %v1964_v25 = vld [vmem:[%s5551_s4] sm:$0xff]  ;;  %1949 = vmatpush.msra.mxu1 %v1910_v6 }
 0x214   : > { %v1331_v11 = vadd.f32 %v4908_v35, %v1274_v22  ;;  %v934_v8 = vadd.f32 %v4872_v62, %v877_v60  ;;  %v1218_v53 = vadd.f32 %v4904_v26, %v1161_v21  ;;  %v821_v35 = vadd.f32 %v4870_v5, %v764_v51  ;;  %v5589_v21 = vld [vmem:[#allocation13_spill] sm:$0xff] }
 0x215   : > { %1990 = vmatpush.msra.mxu2 %v1966_v34  ;;  %1950 = vmatpush.msra.mxu1 %v1909_v61  ;;  %v5588_v34 = vld [vmem:[#allocation14_spill] sm:$0xff] }
 0x216   : > { %v4955_v63 = vpop.f32.mrf.mxu3  ;;  %v4978_v45 = vpop.f32.mrf.mxu2  ;;  %v1388_v12 = vadd.f32 %v4924_v58, %v1331_v11  ;;  %v1275_v49 = vadd.f32 %v4928_v3, %v1218_v53  ;;  %v991_v15 = vadd.f32 %v4874_v13, %v934_v8  ;;  %v878_v62 = vadd.f32 %v4859_v50, %v821_v35 }
 0x217   : > { %v4959_v9 = vpop.f32.mrf.mxu1  ;;  %v4961_v10 = vpop.f32.mrf.mxu0  ;;  %1991 = vmatpush.msra.mxu2 %v1965_v38 }
 0x218   : > { %v1445_v41 = vadd.f32 %v4930_v4, %v1388_v12  ;;  %v1048_v28 = vadd.f32 %v4902_v39, %v991_v15  ;;  %v1332_v26 = vadd.f32 %v4916_v44, %v1275_v49  ;;  %v935_v29 = vadd.f32 %v4881_v7, %v878_v62 }
 0x219   : > { %1992 = vmatpush.msra.mxu2 %v1964_v25 }
 0x21a   : > { %v1389_v36 = vadd.f32 %v4934_v19, %v1332_v26  ;;  %v1105_v5 = vadd.f32 %v4889_v14, %v1048_v28  ;;  %v992_v50 = vadd.f32 %v4883_v33, %v935_v29 }
 0x21c   : > { %v1162_v39 = vadd.f32 %v4906_v32, %v1105_v5  ;;  %v1446_v44 = vadd.f32 %v4941_v54, %v1389_v36  ;;  %v5587_v32 = vld [vmem:[#allocation12_spill] sm:$0xff] }
 0x21e   : > { %v4995_v43 = vpop.f32.mrf.mxu3  ;;  %v5031_v47 = vpop.f32.mrf.mxu2  ;;  %v1219_v24 = vadd.f32 %v4912_v42, %v1162_v39 }
 0x21f   : > { %v4998_v0 = vpop.f32.mrf.mxu0  ;;  %v5000_v1 = vpop.f32.mrf.mxu1 }
 0x220   : > { %v1502_v58 = vadd.f32 %v5000_v1, %v1445_v41  ;;  %v1049_v1 = vadd.f32 %v4910_v37, %v992_v50 }
 0x222   : > { %v1559_v4 = vadd.f32 %v4978_v45, %v1502_v58  ;;  %v1106_v14 = vadd.f32 %v4898_v20, %v1049_v1  ;;  %v1276_v45 = vadd.f32 %v4939_v56, %v1219_v24 }
 0x224   : > { %v1163_v52 = vadd.f32 %v5587_v32, %v1106_v14  ;;  %v1333_v37 = vadd.f32 %v5588_v34, %v1276_v45  ;;  %v2010_v34 = vld [vmem:[%s5552_s5] sm:$0xff] }
 0x226   : > { %v1604_v16 = vpop.f32.mrf.mxu3  ;;  %v5072_v27 = vpop.f32.mrf.mxu2  ;;  %v1220_v42 = vadd.f32 %v5589_v21, %v1163_v52  ;;  %v2045_v21 = vld [vmem:[%s5553_s6 + $0x8] sm:$0x3f] }
 0x227   : > { %v1493_v57 = vpop.f32.mrf.mxu1  ;;  %v1661_v23 = vpop.f32.mrf.mxu0  ;;  %v1616_v17 = vadd.f32 %v1604_v16, %v1559_v4 }
 0x228   : > { %v1503_v7 = vadd.f32 %v1493_v57, %v1446_v44  ;;  %v1277_v56 = vadd.f32 %v4959_v9, %v1220_v42  ;;  %v2099_v42 = vld [vmem:[#allocation4 + $0x28] sm:$0xff] }
 0x229   : > { %v1673_v2 = vadd.f32 %v1661_v23, %v1616_v17  ;;  %v1390_v23 = vadd.f32 %v4955_v63, %v1333_v37  ;;  %v2011_v37 = vld [vmem:[%s5552_s5 + $0x8] sm:$0x3f]  ;;  %2155 = vmatpush.msrb.mxu1 %v2099_v42 }
 0x22a   : > { %v1560_v33 = vadd.f32 %v5031_v47, %v1503_v7  ;;  %v1334_v8 = vadd.f32 %v4943_v40, %v1277_v56  ;;  %v2450_v42 = vld [vmem:[#allocation4 + $0x1b8] sm:$0xff] }
 0x22b   : > { %v1447_v11 = vadd.f32 %v4961_v10, %v1390_v23  ;;  %v2098_v23 = vld [vmem:[#allocation4 + $0x20] sm:$0xff] }
 0x22c   : > { %v1391_v12 = vadd.f32 %v4995_v43, %v1334_v8  ;;  %2156 = vmatpush.msrb.mxu1 %v2098_v23  ;;  %v2094_v8 = vld [vmem:[#allocation4] sm:$0xff]  ;;  %v2374_v23 = vld [vmem:[#allocation4 + $0x178] sm:$0xff] }
 0x22e   : > { %v1607_v31 = vpop.f32.mrf.mxu3  ;;  %v1556_v13 = vpop.f32.mrf.mxu2  ;;  %v1448_v10 = vadd.f32 %v4998_v0, %v1391_v12  ;;  %v2293_v12 = vld [vmem:[#allocation4 + $0x100] sm:$0xff] }
 0x22f   : > { %v1496_v59 = vpop.f32.mrf.mxu1  ;;  %v1664_v48 = vpop.f32.mrf.mxu0  ;;  %v1617_v16 = vadd.f32 %v1607_v31, %v1560_v33 }
 0x230   : > { %v1504_v31 = vadd.f32 %v1496_v59, %v1447_v11  ;;  %v2096_v11 = vld [vmem:[#allocation4 + $0x10] sm:$0xff] }
 0x231   : > { %v1674_v38 = vadd.f32 %v1664_v48, %v1617_v16 }
 0x232   : > { %v1561_v35 = vadd.f32 %v5072_v27, %v1504_v31  ;;  %v2296_v31 = vld [vmem:[#allocation4 + $0x118] sm:$0xff] }
 0x236   : > { %v1610_v55 = vpop.f32.mrf.mxu3  ;;  %v1775_v54 = vpop.f32.mrf.mxu2 }
 0x237   : > { %v1499_v3 = vpop.f32.mrf.mxu1  ;;  %v1667_v46 = vpop.f32.mrf.mxu0  ;;  %v1618_v41 = vadd.f32 %v1610_v55, %v1561_v35 }
 0x238   : > { %v1505_v40 = vadd.f32 %v1499_v3, %v1448_v10 }
 0x239   : > { %v1675_v59 = vadd.f32 %v1667_v46, %v1618_v41 }
 0x23a   : > { %v1562_v58 = vadd.f32 %v1556_v13, %v1505_v40 }
 0x23e   : > { %v1613_v19 = vpop.f32.mrf.mxu3  ;;  %v1778_v53 = vpop.f32.mrf.mxu2 }
 0x23f   : > { %v1670_v22 = vpop.f32.mrf.mxu0  ;;  %v1718_v30 = vpop.f32.mrf.mxu1  ;;  %v1619_v29 = vadd.f32 %v1613_v19, %v1562_v58  ;;  %v2104_v58 = vld [vmem:[#allocation4 + $0x48] sm:$0xff] }
 0x240   : > { %v1730_v18 = vadd.f32 %v1718_v30, %v1673_v2 }
 0x241   : > { %v1676_v4 = vadd.f32 %v1670_v22, %v1619_v29  ;;  %v2103_v29 = vld [vmem:[#allocation4 + $0x40] sm:$0xff] }
 0x242   : > { %v1787_v57 = vadd.f32 %v1775_v54, %v1730_v18 }
 0x246   : > { %v1832_v6 = vpop.f32.mrf.mxu3 }
 0x247   : > { %v1844_v60 = vadd.f32 %v1832_v6, %v1787_v57  ;;  %v1721_v20 = vpop.f32.mrf.mxu1  ;;  %v1889_v61 = vpop.f32.mrf.mxu0  ;;  %v2044_v57 = vld [vmem:[%s5553_s6] sm:$0xff]  ;;  %v5590_v6 = vmov 0.0  }
 0x248   : > { %v1731_v47 = vadd.f32 %v1721_v20, %v1674_v38  ;;  %2078 = vst.msk [vmem:[#allocation3] sm:$0xff] %vm2077_vm7, %v5590_v6 }
 0x249   : > { %v1901_v25 = vadd.f32 %v1889_v61, %v1844_v60  ;;  %2079 = vst.msk [vmem:[#allocation3 + $0x8] sm:$0xff] %vm2077_vm7, %v5590_v6  ;;  %v2249_v6 = vld [vmem:[#allocation4 + $0xc0] sm:$0xff] }
 0x24a   : > { %v1788_v63 = vadd.f32 %v1778_v53, %v1731_v47  ;;  %v2295_v53 = vld [vmem:[#allocation4 + $0x110] sm:$0xff] }
 0x24b   : > { %v1905_v51 = vmax.f32 %v1901_v25, 0.0  ;;  %v2097_v25 = vld [vmem:[#allocation4 + $0x18] sm:$0xff] }
 0x24c   : > { %2157 = vmatpush.msrb.mxu1 %v2097_v25  ;;  %v2371_v25 = vld [vmem:[#allocation4 + $0x160] sm:$0xff] }
 0x24d   : > { %3785 = vmatmul.msk.f32.vlgmr.msra.gmra.mxu1 %vm1922_vm6, %v1905_v51  ;;  %3789 = vmatmul.msk.f32.vlgmr.msra.gmra.mxu2 %vm1922_vm6, %v1905_v51  ;;  %v2095_v51 = vld [vmem:[#allocation4 + $0x8] sm:$0xff] }
 0x24e   : > { %v1835_v48 = vpop.f32.mrf.mxu3  ;;  %2158 = vmatpush.msrb.mxu1 %v2096_v11  ;;  %v2614_v11 = vld [vmem:[#allocation4 + $0x298] sm:$0xff] }
 0x24f   : > { %v1845_v49 = vadd.f32 %v1835_v48, %v1788_v63  ;;  %v1892_v9 = vpop.f32.mrf.mxu0  ;;  %v2294_v63 = vld [vmem:[#allocation4 + $0x108] sm:$0xff]  ;;  %v2292_v48 = vld [vmem:[#allocation4 + $0xf8] sm:$0xff] }
 0x250   : > { %2159 = vmatpush.msrb.mxu1 %v2095_v51  ;;  %v2413_v51 = vld [vmem:[#allocation4 + $0x1a0] sm:$0xff] }
 0x251   : > { %v1902_v15 = vadd.f32 %v1892_v9, %v1845_v49  ;;  %v2291_v49 = vld [vmem:[#allocation4 + $0xf0] sm:$0xff] }
 0x252   : > { %2160 = vmatpush.msrb.mxu1 %v2094_v8  ;;  %v2370_v8 = vld [vmem:[#allocation4 + $0x158] sm:$0xff] }
 0x253   : > { %v1906_v62 = vmax.f32 %v1902_v15, 0.0 }
 0x254   : > { %2313 = vmatpush.msra.mxu1 %v2296_v31 }
 0x255   : > { %3786 = vmatmul.msk.f32.gmra.mxu1 %vm1922_vm6, %v1906_v62  ;;  %3790 = vmatmul.msk.f32.gmra.mxu2 %vm1922_vm6, %v1906_v62  ;;  %v1781_v28 = vpop.f32.mrf.mxu2 }
 0x256   : > { %v1838_v5 = vpop.f32.mrf.mxu3  ;;  %2314 = vmatpush.msra.mxu1 %v2295_v53  ;;  %v2369_v53 = vld [vmem:[#allocation4 + $0x150] sm:$0xff] }
 0x257   : > { %v1724_v26 = vpop.f32.mrf.mxu1 }
 0x258   : > { %v1732_v43 = vadd.f32 %v1724_v26, %v1675_v59  ;;  %2315 = vmatpush.msra.mxu1 %v2294_v63  ;;  %v2105_v26 = vld [vmem:[#allocation4 + $0x50] sm:$0xff] }
 0x259   : > { %v2613_v63 = vld [vmem:[#allocation4 + $0x290] sm:$0xff] }
 0x25a   : > { %v1789_v36 = vadd.f32 %v1781_v28, %v1732_v43  ;;  %2316 = vmatpush.msra.mxu1 %v2293_v12  ;;  %v2106_v28 = vld [vmem:[#allocation4 + $0x58] sm:$0xff] }
 0x25b   : > { %2128 = vmatpush.msrb.mxu0 %v2106_v28  ;;  %v2214_v43 = vld [vmem:[#allocation4 + $0xb8] sm:$0xff]  ;;  %v2533_v28 = vld [vmem:[#allocation4 + $0x230] sm:$0xff] }
 0x25c   : > { %v1846_v27 = vadd.f32 %v1838_v5, %v1789_v36  ;;  %2317 = vmatpush.msra.mxu1 %v2292_v48  ;;  %v2102_v36 = vld [vmem:[#allocation4 + $0x38] sm:$0xff]  ;;  %v2101_v5 = vld [vmem:[#allocation4 + $0x30] sm:$0xff]  ;;  %v2612_v48 = vld [vmem:[#allocation4 + $0x288] sm:$0xff] }
 0x25d   : > { %v1784_v44 = vpop.f32.mrf.mxu2  ;;  %2129 = vmatpush.msrb.mxu0 %v2105_v26  ;;  %v2412_v12 = vld [vmem:[#allocation4 + $0x198] sm:$0xff] }
 0x25e   : > { %v1841_v46 = vpop.f32.mrf.mxu3  ;;  %2318 = vmatpush.msra.mxu1 %v2291_v49  ;;  %v2411_v49 = vld [vmem:[#allocation4 + $0x190] sm:$0xff] }
 0x25f   : > { %v1727_v50 = vpop.f32.mrf.mxu1  ;;  %v1895_v39 = vpop.f32.mrf.mxu0  ;;  %2130 = vmatpush.msrb.mxu0 %v2104_v58 }
 0x260   : > { %v1733_v0 = vadd.f32 %v1727_v50, %v1676_v4  ;;  %v1903_v55 = vadd.f32 %v1895_v39, %v1846_v27  ;;  %v2213_v4 = vld [vmem:[#allocation4 + $0xb0] sm:$0xff]  ;;  %v2212_v27 = vld [vmem:[#allocation4 + $0xa8] sm:$0xff]  ;;  %v2211_v50 = vld [vmem:[#allocation4 + $0xa0] sm:$0xff] }
 0x261   : > { %2131 = vmatpush.msrb.mxu0 %v2103_v29  ;;  %v2210_v39 = vld [vmem:[#allocation4 + $0x98] sm:$0xff]  ;;  %v2609_v29 = vld [vmem:[#allocation4 + $0x270] sm:$0xff] }
 0x262   : > { %v1790_v3 = vadd.f32 %v1784_v44, %v1733_v0  ;;  %v1907_v17 = vmax.f32 %v1903_v55, 0.0  ;;  %v2209_v55 = vld [vmem:[#allocation4 + $0x90] sm:$0xff]  ;;  %v2174_v44 = vld [vmem:[#allocation4 + $0x88] sm:$0xff] }
 0x263   : > { %2132 = vmatpush.msrb.mxu0 %v2102_v36  ;;  %2193 = vmatpush.msrb.mxu2 %v2174_v44  ;;  %v2532_v36 = vld [vmem:[#allocation4 + $0x228] sm:$0xff] }
 0x264   : > { %3787 = vmatmul.msk.f32.gmra.mxu1 %vm1922_vm6, %v1907_v17  ;;  %3791 = vmatmul.msk.f32.gmra.mxu2 %vm1922_vm6, %v1907_v17  ;;  %v1847_v1 = vadd.f32 %v1841_v46, %v1790_v3  ;;  %v2173_v17 = vld [vmem:[#allocation4 + $0x80] sm:$0xff]  ;;  %v2172_v46 = vld [vmem:[#allocation4 + $0x78] sm:$0xff] }
 0x265   : > { %2133 = vmatpush.msrb.mxu0 %v2101_v5  ;;  %2194 = vmatpush.msrb.mxu2 %v2173_v17  ;;  %v2494_v5 = vld [vmem:[#allocation4 + $0x1f8] sm:$0xff] }
 0x267   : > { %v1898_v13 = vpop.f32.mrf.mxu0  ;;  %2195 = vmatpush.msrb.mxu2 %v2172_v46 }
 0x268   : > { %v1904_v7 = vadd.f32 %v1898_v13, %v1847_v1  ;;  %v2171_v1 = vld [vmem:[#allocation4 + $0x70] sm:$0xff]  ;;  %v2170_v13 = vld [vmem:[#allocation4 + $0x68] sm:$0xff] }
 0x269   : > { %2196 = vmatpush.msrb.mxu2 %v2171_v1  ;;  %v2491_v1 = vld [vmem:[#allocation4 + $0x1e0] sm:$0xff] }
 0x26a   : > { %v1908_v24 = vmax.f32 %v1904_v7, 0.0  ;;  %v2169_v7 = vld [vmem:[#allocation4 + $0x60] sm:$0xff] }
 0x26b   : > { %2197 = vmatpush.msrb.mxu2 %v2170_v13 }
 0x26c   : > { %3788 = vmatmul.msk.f32.gmra.mxu1 %vm1922_vm6, %v1908_v24  ;;  %3792 = vmatmul.msk.f32.gmra.mxu2 %vm1922_vm6, %v1908_v24  ;;  %v2254_v24 = vld [vmem:[#allocation4 + $0xe8] sm:$0xff] }
 0x26d   : > { %2198 = vmatpush.msrb.mxu2 %v2169_v7  ;;  %2273 = vmatpush.msra.mxu0 %v2254_v24  ;;  %v2574_v24 = vld [vmem:[#allocation4 + $0x268] sm:$0xff] }
 0x2ca   : > { %v1952_v19 = vpop.f32.mrf.mxu1 }
 0x2d0   : > { %v1994_v2 = vpop.f32.mrf.mxu2 }
 0x2d1   : > { %v2006_v16 = vmax.f32 %v1952_v19, %v1994_v2  ;;  %v2334_v19 = vld [vmem:[#allocation4 + $0x148] sm:$0xff]  ;;  %v2454_v2 = vld [vmem:[#allocation4 + $0x1d8] sm:$0xff] }
 0x2d2   : > { %v1955_v22 = vpop.f32.mrf.mxu1  ;;  %2353 = vmatpush.msra.mxu2 %v2334_v19  ;;  %v2654_v19 = vld [vmem:[#allocation4 + $0x2c8] sm:$0xff] }
 0x2d8   : > { %v1997_v30 = vpop.f32.mrf.mxu2 }
 0x2d9   : > { %v2007_v54 = vmax.f32 %v1955_v22, %v1997_v30  ;;  %v2253_v22 = vld [vmem:[#allocation4 + $0xe0] sm:$0xff] }
 0x2da   : > { %v2333_v30 = vld [vmem:[#allocation4 + $0x140] sm:$0xff]  ;;  %2274 = vmatpush.msra.mxu0 %v2253_v22 }
 0x2db   : > { %2354 = vmatpush.msra.mxu2 %v2333_v30  ;;  %v2653_v22 = vld [vmem:[#allocation4 + $0x2c0] sm:$0xff] }
 0x2dc   : > { %v2573_v30 = vld [vmem:[#allocation4 + $0x260] sm:$0xff] }
 0x2e1   : > { %v1958_v14 = vpop.f32.mrf.mxu1 }
 0x2e7   : > { %v2000_v45 = vpop.f32.mrf.mxu2 }
 0x2e8   : > { %v2008_v52 = vmax.f32 %v1958_v14, %v2000_v45 }
 0x2e9   : > { %v1961_v33 = vpop.f32.mrf.mxu1 }
 0x2ef   : > { %v2003_v18 = vpop.f32.mrf.mxu2 }
 0x2f0   : > { %v2009_v32 = vmax.f32 %v1961_v33, %v2003_v18  ;;  %v2453_v33 = vld [vmem:[#allocation4 + $0x1d0] sm:$0xff]  ;;  %v2252_v18 = vld [vmem:[#allocation4 + $0xd8] sm:$0xff] }
 0x2f1   : > { %2275 = vmatpush.msra.mxu0 %v2252_v18 }
 0x2f2   : > { %3793 = vmatpush.msk.msra.mxu3 %vm521_vm2, %v2009_v32 }
 0x2f4   : > { %2034 = vmatpush.msra.mxu3 %v2008_v52 }
 0x2f6   : > { %2035 = vmatpush.msra.mxu3 %v2007_v54 }
 0x2f8   : > { %2036 = vmatpush.msra.mxu3 %v2006_v16 }
 0x2f9   : > { %3794 = vmatmul.msk.f32.vlgmr.msra.gmra.mxu3 %vm512_vm5, %v2010_v34  ;;  %v2451_v34 = vld [vmem:[#allocation4 + $0x1c0] sm:$0xff] }
 0x2fa   : > { %3796 = vmatpush.msk.msrb.mxu3 %vm521_vm2, %v2009_v32  ;;  %v2332_v32 = vld [vmem:[#allocation4 + $0x138] sm:$0xff] }
 0x2fb   : > { %2355 = vmatpush.msra.mxu2 %v2332_v32 }
 0x2fc   : > { %2065 = vmatpush.msrb.mxu3 %v2008_v52  ;;  %v2452_v52 = vld [vmem:[#allocation4 + $0x1c8] sm:$0xff] }
 0x2fe   : > { %2066 = vmatpush.msrb.mxu3 %v2007_v54  ;;  %v2251_v54 = vld [vmem:[#allocation4 + $0xd0] sm:$0xff] }
 0x2ff   : > { %2276 = vmatpush.msra.mxu0 %v2251_v54  ;;  %v2651_v54 = vld [vmem:[#allocation4 + $0x2b0] sm:$0xff] }
 0x300   : > { %2067 = vmatpush.msrb.mxu3 %v2006_v16  ;;  %v2331_v16 = vld [vmem:[#allocation4 + $0x130] sm:$0xff] }
 0x301   : > { %3795 = vmatmul.msk.f32.gmra.mxu3 %vm512_vm5, %v2011_v37  ;;  %2356 = vmatpush.msra.mxu2 %v2331_v16 }
 0x302   : > { %2233 = vmatpush.msra.mxu3 %v2214_v43  ;;  %v2495_v43 = vld [vmem:[#allocation4 + $0x200] sm:$0xff] }
 0x304   : > { %2234 = vmatpush.msra.mxu3 %v2213_v4  ;;  %v2531_v4 = vld [vmem:[#allocation4 + $0x220] sm:$0xff] }
 0x306   : > { %2235 = vmatpush.msra.mxu3 %v2212_v27  ;;  %v2530_v27 = vld [vmem:[#allocation4 + $0x218] sm:$0xff] }
 0x308   : > { %2236 = vmatpush.msra.mxu3 %v2211_v50  ;;  %v2493_v50 = vld [vmem:[#allocation4 + $0x1f0] sm:$0xff] }
 0x309   : > { %3797 = vmatmul.msk.f32.vlgmr.msrb.gmra.mxu3 %vm512_vm5, %v2044_v57  ;;  %v2250_v57 = vld [vmem:[#allocation4 + $0xc8] sm:$0xff] }
 0x30a   : > { %2237 = vmatpush.msra.mxu3 %v2210_v39  ;;  %2277 = vmatpush.msra.mxu0 %v2250_v57  ;;  %v2529_v39 = vld [vmem:[#allocation4 + $0x210] sm:$0xff]  ;;  %v2570_v57 = vld [vmem:[#allocation4 + $0x248] sm:$0xff] }
 0x30c   : > { %2238 = vmatpush.msra.mxu3 %v2209_v55  ;;  %2278 = vmatpush.msra.mxu0 %v2249_v6  ;;  %v2492_v55 = vld [vmem:[#allocation4 + $0x1e8] sm:$0xff]  ;;  %v2649_v6 = vld [vmem:[#allocation4 + $0x2a0] sm:$0xff] }
 0x30e   : > { %2393 = vmatpush.msrb.mxu3 %v2374_v23  ;;  %v2774_v23 = vld [vmem:[#allocation4 + $0x358] sm:$0xff] }
 0x311   : > { %3798 = vmatmul.msk.f32.gmra.mxu3 %vm512_vm5, %v2045_v21  ;;  %v2330_v21 = vld [vmem:[#allocation4 + $0x128] sm:$0xff] }
 0x312   : > { %2357 = vmatpush.msra.mxu2 %v2330_v21  ;;  %v2650_v21 = vld [vmem:[#allocation4 + $0x2a8] sm:$0xff] }
 0x37c   : > { %v2038_v38 = vpop.f32.mrf.mxu3 }
 0x384   : > { %v2041_v60 = vpop.f32.mrf.mxu3 }
 0x38c   : > { %v2069_v20 = vpop.f32.mrf.mxu3 }
 0x38d   : > { %v2075_v61 = vmax.f32 %v2038_v38, %v2069_v20  ;;  %v2449_v20 = vld [vmem:[#allocation4 + $0x1b0] sm:$0xff] }
 0x38f   : > { %2082 = vrot.lane.b32.xlu0 %v2075_v61, %s4079_s0  ;;  %v2373_v61 = vld [vmem:[#allocation4 + $0x170] sm:$0xff] }
 0x390   : > { %2394 = vmatpush.msrb.mxu3 %v2373_v61 }
 0x394   : > { %v2072_v56 = vpop.f32.mrf.mxu3 }
 0x395   : > { %v2076_v47 = vmax.f32 %v2041_v60, %v2072_v56  ;;  %v2329_v60 = vld [vmem:[#allocation4 + $0x120] sm:$0xff]  ;;  %v2372_v56 = vld [vmem:[#allocation4 + $0x168] sm:$0xff] }
 0x396   : > { %2358 = vmatpush.msra.mxu2 %v2329_v60  ;;  %2395 = vmatpush.msrb.mxu3 %v2372_v56  ;;  %v2694_v60 = vld [vmem:[#allocation4 + $0x2e8] sm:$0xff]  ;;  %v2693_v56 = vld [vmem:[#allocation4 + $0x2e0] sm:$0xff] }
 0x397   : > { %2084 = vrot.lane.b32.xlu1 %v2076_v47, %s4079_s0  ;;  %v2414_v47 = vld [vmem:[#allocation4 + $0x1a8] sm:$0xff]  ;;  %s3489_s0 = sshll.u32 %s3485_s20, 4  ;;  %s3490_s0 = int_to_ptr.hbm [resolvable:$true] %s3489_s0 }
 0x398   : > { %2396 = vmatpush.msrb.mxu3 %v2371_v25 }
 0x39a   : > { %2397 = vmatpush.msrb.mxu3 %v2370_v8  ;;  %v2692_v8 = vld [vmem:[#allocation4 + $0x2d8] sm:$0xff] }
 0x39c   : > { %2398 = vmatpush.msrb.mxu3 %v2369_v53  ;;  %v2813_v53 = vld [vmem:[#allocation4 + $0x380] sm:$0xff] }
 0x401   : > { %v2083_v9 = vpop.permute.xlu0 %2082 }
 0x402   : > { %2089 = vst.msk [vmem:[#allocation3 + $0x1] sm:$0xff] %vm2088_vm8, %v2083_v9  ;;  %v2611_v9 = vld [vmem:[#allocation4 + $0x280] sm:$0xff] }
 0x409   : > { %v2085_v35 = vpop.permute.xlu1 %2084  ;;  %v2092_v15 = vld [vmem:[#allocation3] sm:$0xff] }
 0x40a   : > { %2091 = vst.msk [vmem:[#allocation3 + $0x9] sm:$0x3f] %vm2090_vm9, %v2085_v35  ;;  %2175 = vrot.lane.b32.xlu0 %v2092_v15, %s4080_s16  ;;  %2109 = vrot.lane.b32.xlu2 %v2092_v15, %s5581_s2  ;;  %v2288_v41 = vld [vmem:[#allocation3 + $0x1] sm:$0xff]  ;;  %v2410_v35 = vld [vmem:[#allocation4 + $0x188] sm:$0xff] }
 0x40b   : > { %3801 = vmatmul.msk.f32.vlgmr.msrb.gmra.mxu1 %vm2113_vm10, %v2092_v15 }
 0x40c   : > { %2473 = vmatpush.msrb.mxu1 %v2454_v2 }
 0x40e   : > { %2474 = vmatpush.msrb.mxu1 %v2453_v33  ;;  %v2652_v33 = vld [vmem:[#allocation4 + $0x2b8] sm:$0xff] }
 0x410   : > { %2475 = vmatpush.msrb.mxu1 %v2452_v52  ;;  %v2571_v52 = vld [vmem:[#allocation4 + $0x250] sm:$0xff] }
 0x411   : > { %v2093_v10 = vld [vmem:[#allocation3 + $0x8] sm:$0xf]  ;;  %v5203_v37 = vld [vmem:[#allocation3 + $0xc] sm:$0xf] }
 0x412   : > { %2215 = vrot.lane.b32.xlu2 %v2092_v15, %s4081_s27  ;;  %2177 = vrot.lane.b32.xlu0 %v2093_v10, %s4080_s16  ;;  %v2289_v62 = vld [vmem:[#allocation3 + $0x9] sm:$0xf] }
 0x413   : > { %2111 = vrot.lane.b32.xlu1 %v2093_v10, %s5581_s2  ;;  %3802 = vmatmul.msk.f32.gmra.mxu1 %vm2113_vm10, %v2093_v10  ;;  %v5152_v40 = vld [vmem:[#allocation3 + $0xa] sm:$0xf]  ;;  %v5157_v59 = vld [vmem:[#allocation3 + $0x2] sm:$0xff] }
 0x414   : > { %v5172_v0 = vld [vmem:[#allocation3 + $0x3] sm:$0xff]  ;;  %v5184_v3 = vld [vmem:[#allocation3 + $0xb] sm:$0xf]  ;;  %2476 = vmatpush.msrb.mxu1 %v2451_v34 }
 0x415   : > { %v5194_v14 = vld [vmem:[#allocation3 + $0x4] sm:$0xff] }
 0x416   : > { %2477 = vmatpush.msrb.mxu1 %v2450_v42  ;;  %v2696_v34 = vld [vmem:[#allocation4 + $0x2f8] sm:$0xff]  ;;  %v2695_v42 = vld [vmem:[#allocation4 + $0x2f0] sm:$0xff] }
 0x418   : > { %2478 = vmatpush.msrb.mxu1 %v2449_v20 }
 0x41a   : > { %2255 = vrot.lane.b32.xlu2 %v2092_v15, %s4082_s17  ;;  %2335 = vrot.lane.b32.xlu0 %v2288_v41, %s5581_s2  ;;  %v2534_v15 = vld [vmem:[#allocation4 + $0x238] sm:$0xff] }
 0x41b   : > { %2217 = vrot.lane.b32.xlu1 %v2093_v10, %s4081_s27  ;;  %3809 = vmatmul.msk.f32.vlgmr.msra.gmra.mxu1 %vm2113_vm10, %v2288_v41 }
 0x41c   : > { %2633 = vmatpush.msra.mxu1 %v2614_v11  ;;  %v2814_v11 = vld [vmem:[#allocation4 + $0x388] sm:$0xff] }
 0x41e   : > { %2634 = vmatpush.msra.mxu1 %v2613_v63  ;;  %v2772_v63 = vld [vmem:[#allocation4 + $0x348] sm:$0xff] }
 0x420   : > { %2635 = vmatpush.msra.mxu1 %v2612_v48  ;;  %v2732_v48 = vld [vmem:[#allocation4 + $0x318] sm:$0xff] }
 0x422   : > { %2375 = vrot.lane.b32.xlu2 %v2288_v41, %s4080_s16  ;;  %2337 = vrot.lane.b32.xlu0 %v2289_v62, %s5581_s2 }
 0x423   : > { %2257 = vrot.lane.b32.xlu1 %v2093_v10, %s4082_s17  ;;  %3810 = vmatmul.msk.f32.gmra.mxu1 %vm2113_vm10, %v2289_v62  ;;  %v2610_v10 = vld [vmem:[#allocation4 + $0x278] sm:$0xff] }
 0x424   : > { %2636 = vmatpush.msra.mxu1 %v2611_v9 }
 0x426   : > { %2637 = vmatpush.msra.mxu1 %v2610_v10  ;;  %v2811_v10 = vld [vmem:[#allocation4 + $0x370] sm:$0xff] }
 0x428   : > { %2638 = vmatpush.msra.mxu1 %v2609_v29  ;;  %v2769_v29 = vld [vmem:[#allocation4 + $0x330] sm:$0xff] }
 0x42a   : > { %2415 = vrot.lane.b32.xlu2 %v2288_v41, %s4081_s27  ;;  %2417 = vrot.lane.b32.xlu0 %v2289_v62, %s4081_s27 }
 0x42b   : > { %2377 = vrot.lane.b32.xlu1 %v2289_v62, %s4080_s16 }
 0x432   : > { %2455 = vrot.lane.b32.xlu2 %v2288_v41, %s4082_s17  ;;  %2537 = vrot.lane.b32.xlu0 %v5152_v40, %s5581_s2  ;;  %v2409_v41 = vld [vmem:[#allocation4 + $0x180] sm:$0xff] }
 0x433   : > { %2535 = vrot.lane.b32.xlu1 %v5157_v59, %s5581_s2 }
 0x43a   : > { %2457 = vrot.lane.b32.xlu2 %v2289_v62, %s4082_s17  ;;  %2655 = vrot.lane.b32.xlu0 %v5157_v59, %s4082_s17  ;;  %v2496_v62 = vld [vmem:[#allocation4 + $0x208] sm:$0xff] }
 0x43b   : > { %2575 = vrot.lane.b32.xlu1 %v5157_v59, %s4080_s16 }
 0x442   : > { %2615 = vrot.lane.b32.xlu2 %v5157_v59, %s4081_s27  ;;  %2657 = vrot.lane.b32.xlu0 %v5152_v40, %s4082_s17 }
 0x443   : > { %2577 = vrot.lane.b32.xlu1 %v5152_v40, %s4080_s16 }
 0x44a   : > { %2617 = vrot.lane.b32.xlu2 %v5152_v40, %s4081_s27  ;;  %2815 = vrot.lane.b32.xlu0 %v5172_v0, %s4081_s27 }
 0x44b   : > { %2735 = vrot.lane.b32.xlu1 %v5172_v0, %s5581_s2 }
 0x452   : > { %2855 = vrot.lane.b32.xlu2 %v5172_v0, %s4082_s17  ;;  %2775 = vrot.lane.b32.xlu0 %v5172_v0, %s4080_s16 }
 0x453   : > { %2737 = vrot.lane.b32.xlu1 %v5184_v3, %s5581_s2 }
 0x45a   : > { %2857 = vrot.lane.b32.xlu2 %v5184_v3, %s4082_s17  ;;  %2777 = vrot.lane.b32.xlu0 %v5184_v3, %s4080_s16 }
 0x45b   : > { %2817 = vrot.lane.b32.xlu1 %v5184_v3, %s4081_s27 }
 0x462   : > { %3015 = vrot.lane.b32.xlu2 %v5194_v14, %s4081_s27  ;;  %2935 = vrot.lane.b32.xlu0 %v5194_v14, %s5581_s2 }
 0x463   : > { %2975 = vrot.lane.b32.xlu1 %v5194_v14, %s4080_s16 }
 0x464   : > { %v2110_v45 = vpop.permute.xlu2 %2109 }
 0x465   : > { %3799 = vmatmul.msk.f32.vlgmr.msrb.gmra.mxu0 %vm2113_vm10, %v2110_v45  ;;  %v2572_v45 = vld [vmem:[#allocation4 + $0x258] sm:$0xff] }
 0x466   : > { %2433 = vmatpush.msrb.mxu0 %v2414_v47  ;;  %v2734_v47 = vld [vmem:[#allocation4 + $0x328] sm:$0xff] }
 0x468   : > { %2434 = vmatpush.msrb.mxu0 %v2413_v51  ;;  %v2773_v51 = vld [vmem:[#allocation4 + $0x350] sm:$0xff] }
 0x46a   : > { %3017 = vrot.lane.b32.xlu2 %v5203_v37, %s4081_s27  ;;  %3055 = vrot.lane.b32.xlu0 %v5194_v14, %s4082_s17  ;;  %s4016_s27 = sshra.s32 %s3490_s0, 4  ;;  %s4017_s27 = int_to_ptr.hbm [resolvable:$true] %s4016_s27 }
 0x46b   : > { %2977 = vrot.lane.b32.xlu1 %v5203_v37, %s4080_s16  ;;  %2435 = vmatpush.msrb.mxu0 %v2412_v12  ;;  %v2691_v12 = vld [vmem:[#allocation4 + $0x2d0] sm:$0xff]  ;;  %s3477_s16 = scalar_lea.sflag [#allocation6], %s448_s30  ;;  %p4023_p3 = scmp.lt.s32.totalorder %s4017_s27, %s5560_s13 }
 0x46c   : > { %v2216_v38 = vpop.permute.xlu2 %2215 }
 0x46d   : > { %3805 = vmatmul.msk.f32.vlgmr.msra.gmra.mxu3 %vm2113_vm10, %v2216_v38  ;;  %2436 = vmatpush.msrb.mxu0 %v2411_v49  ;;  %v2569_v38 = vld [vmem:[#allocation4 + $0x240] sm:$0xff] }
 0x46e   : > { %2553 = vmatpush.msra.mxu3 %v2534_v15  ;;  %v2771_v49 = vld [vmem:[#allocation4 + $0x340] sm:$0xff]  ;;  %v2731_v15 = vld [vmem:[#allocation4 + $0x310] sm:$0xff] }
 0x46f   : > { %2437 = vmatpush.msrb.mxu0 %v2410_v35 }
 0x470   : > { %2554 = vmatpush.msra.mxu3 %v2533_v28  ;;  %v2770_v28 = vld [vmem:[#allocation4 + $0x338] sm:$0xff] }
 0x471   : > { %2438 = vmatpush.msrb.mxu0 %v2409_v41 }
 0x472   : > { %3057 = vrot.lane.b32.xlu2 %v5203_v37, %s4082_s17  ;;  %2555 = vmatpush.msra.mxu3 %v2532_v36  ;;  %v2809_v36 = vld [vmem:[#allocation4 + $0x360] sm:$0xff]  ;;  %s4018_s17 = scalar_lea.hbm %s4017_s27, 1 }
 0x473   : > { %2937 = vrot.lane.b32.xlu1 %v5203_v37, %s5581_s2  ;;  %p4019_p0 = scmp.ne.s32.totalorder %s4017_s27, %s4018_s17  ;;  %p4024_p4 = scmp.lt.s32.totalorder %s4022_s29, %s4018_s17 }
 0x474   : > { %v5216_v31 = vpop.permute.xlu2 %2255  ;;  %2556 = vmatpush.msra.mxu3 %v2531_v4  ;;  %v2934_v4 = vld [vmem:[#allocation4 + $0x418] sm:$0xff] }
 0x475   : > { %p4020_p1 = pnand %p4019_p0, %p4191_p5  ;;  %p4025_p7 = por %p4024_p4, %p4023_p3 }
 0x476   : > { %2557 = vmatpush.msra.mxu3 %v2530_v27 }
 0x477   : > { %p4021_p2 = pneg %p4020_p1 }
 0x478   : > { %2558 = vmatpush.msra.mxu3 %v2529_v39  ;;  %v2896_v39 = vld [vmem:[#allocation4 + $0x3e8] sm:$0xff] }
 0x479   : > { %p4026_p8 = pnand %p4025_p7, %p4021_p2 }
 0x47c   : > { %v2176_v26 = vpop.permute.xlu0 %2175  ;;  %v2376_v58 = vpop.permute.xlu2 %2375 }
 0x47d   : > { %3803 = vmatmul.msk.f32.vlgmr.msrb.gmra.mxu2 %vm2113_vm10, %v2176_v26  ;;  %v2730_v26 = vld [vmem:[#allocation4 + $0x308] sm:$0xff] }
 0x47e   : > { %2513 = vmatpush.msrb.mxu2 %v2496_v62  ;;  %v2854_v62 = vld [vmem:[#allocation4 + $0x3b8] sm:$0xff] }
 0x480   : > { %2514 = vmatpush.msrb.mxu2 %v2495_v43  ;;  %v2853_v43 = vld [vmem:[#allocation4 + $0x3b0] sm:$0xff] }
 0x482   : > { %2515 = vmatpush.msrb.mxu2 %v2494_v5  ;;  %v2729_v5 = vld [vmem:[#allocation4 + $0x300] sm:$0xff] }
 0x484   : > { %v5219_v44 = vpop.permute.xlu2 %2415  ;;  %v2178_v17 = vpop.permute.xlu0 %2177  ;;  %2516 = vmatpush.msrb.mxu2 %v2493_v50  ;;  %v2851_v50 = vld [vmem:[#allocation4 + $0x3a0] sm:$0xff] }
 0x485   : > { %v2112_v46 = vpop.permute.xlu1 %2111  ;;  %3804 = vmatmul.msk.f32.gmra.mxu2 %vm2113_vm10, %v2178_v17  ;;  %v2933_v17 = vld [vmem:[#allocation4 + $0x410] sm:$0xff] }
 0x486   : > { %3800 = vmatmul.msk.f32.gmra.mxu0 %vm2113_vm10, %v2112_v46  ;;  %2517 = vmatpush.msrb.mxu2 %v2492_v55  ;;  %v2850_v46 = vld [vmem:[#allocation4 + $0x398] sm:$0xff] }
 0x488   : > { %2518 = vmatpush.msrb.mxu2 %v2491_v1  ;;  %v2895_v1 = vld [vmem:[#allocation4 + $0x3e0] sm:$0xff] }
 0x48c   : > { %v2456_v13 = vpop.permute.xlu2 %2455  ;;  %v2336_v7 = vpop.permute.xlu0 %2335 }
 0x48d   : > { %v2218_v2 = vpop.permute.xlu1 %2217  ;;  %3811 = vmatmul.msk.f32.vlgmr.msra.gmra.mxu2 %vm2113_vm10, %v2336_v7  ;;  %3817 = vmatmul.msk.f32.vlgmr.msrb.gmra.mxu1 %vm2113_vm10, %v2456_v13  ;;  %v2973_v13 = vld [vmem:[#allocation4 + $0x440] sm:$0xff]  ;;  %v2932_v7 = vld [vmem:[#allocation4 + $0x408] sm:$0xff] }
 0x48e   : > { %3806 = vmatmul.msk.f32.gmra.mxu3 %vm2113_vm10, %v2218_v2  ;;  %3807 = vmatmul.msk.f32.vlgmr.msra.gmra.mxu0 %vm2113_vm10, %v5216_v31  ;;  %v2733_v31 = vld [vmem:[#allocation4 + $0x320] sm:$0xff]  ;;  %v2972_v2 = vld [vmem:[#allocation4 + $0x438] sm:$0xff] }
 0x48f   : > { %2593 = vmatpush.msra.mxu0 %v2574_v24  ;;  %2673 = vmatpush.msra.mxu2 %v2654_v19  ;;  %v2849_v24 = vld [vmem:[#allocation4 + $0x390] sm:$0xff]  ;;  %v2894_v19 = vld [vmem:[#allocation4 + $0x3d8] sm:$0xff] }
 0x490   : > { %2793 = vmatpush.msrb.mxu1 %v2774_v23  ;;  %v2969_v23 = vld [vmem:[#allocation4 + $0x420] sm:$0xff] }
 0x491   : > { %2674 = vmatpush.msra.mxu2 %v2653_v22  ;;  %2594 = vmatpush.msra.mxu0 %v2573_v30  ;;  %v2931_v22 = vld [vmem:[#allocation4 + $0x400] sm:$0xff]  ;;  %v2893_v30 = vld [vmem:[#allocation4 + $0x3d0] sm:$0xff] }
 0x492   : > { %2794 = vmatpush.msrb.mxu1 %v2773_v51 }
 0x493   : > { %2595 = vmatpush.msra.mxu0 %v2572_v45  ;;  %2675 = vmatpush.msra.mxu2 %v2652_v33  ;;  %v2892_v33 = vld [vmem:[#allocation4 + $0x3c8] sm:$0xff] }
 0x494   : > { %v2458_v18 = vpop.permute.xlu2 %2457  ;;  %v2338_v32 = vpop.permute.xlu0 %2337  ;;  %2795 = vmatpush.msrb.mxu1 %v2772_v63 }
 0x495   : > { %v2258_v16 = vpop.permute.xlu1 %2257  ;;  %3812 = vmatmul.msk.f32.gmra.mxu2 %vm2113_vm10, %v2338_v32  ;;  %3818 = vmatmul.msk.f32.gmra.mxu1 %vm2113_vm10, %v2458_v18  ;;  %v3014_v18 = vld [vmem:[#allocation4 + $0x478] sm:$0xff] }
 0x496   : > { %3808 = vmatmul.msk.f32.gmra.mxu0 %vm2113_vm10, %v2258_v16  ;;  %3813 = vmatmul.msk.f32.vlgmr.msrb.gmra.mxu3 %vm2113_vm10, %v2376_v58  ;;  %v2810_v58 = vld [vmem:[#allocation4 + $0x368] sm:$0xff]  ;;  %v2891_v16 = vld [vmem:[#allocation4 + $0x3c0] sm:$0xff] }
 0x497   : > { %2596 = vmatpush.msra.mxu0 %v2571_v52  ;;  %2676 = vmatpush.msra.mxu2 %v2651_v54  ;;  %v2971_v52 = vld [vmem:[#allocation4 + $0x430] sm:$0xff]  ;;  %v2930_v54 = vld [vmem:[#allocation4 + $0x3f8] sm:$0xff] }
 0x498   : > { %2713 = vmatpush.msrb.mxu3 %v2696_v34  ;;  %2796 = vmatpush.msrb.mxu1 %v2771_v49  ;;  %v3013_v34 = vld [vmem:[#allocation4 + $0x470] sm:$0xff] }
 0x499   : > { %2597 = vmatpush.msra.mxu0 %v2570_v57  ;;  %2677 = vmatpush.msra.mxu2 %v2650_v21  ;;  %v2970_v57 = vld [vmem:[#allocation4 + $0x428] sm:$0xff]  ;;  %v2929_v21 = vld [vmem:[#allocation4 + $0x3f0] sm:$0xff] }
 0x49a   : > { %2714 = vmatpush.msrb.mxu3 %v2695_v42  ;;  %2797 = vmatpush.msrb.mxu1 %v2770_v28  ;;  %v3012_v42 = vld [vmem:[#allocation4 + $0x468] sm:$0xff] }
 0x49b   : > { %2678 = vmatpush.msra.mxu2 %v2649_v6  ;;  %2598 = vmatpush.msra.mxu0 %v2569_v38  ;;  %v3011_v6 = vld [vmem:[#allocation4 + $0x460] sm:$0xff] }
 0x49c   : > { %v2616_v20 = vpop.permute.xlu2 %2615  ;;  %v2418_v61 = vpop.permute.xlu0 %2417  ;;  %2715 = vmatpush.msrb.mxu3 %v2694_v60  ;;  %2798 = vmatpush.msrb.mxu1 %v2769_v29  ;;  %v3010_v60 = vld [vmem:[#allocation4 + $0x458] sm:$0xff] }
 0x49d   : > { %v2378_v25 = vpop.permute.xlu1 %2377  ;;  %3819 = vmatmul.msk.f32.vlgmr.msrb.gmra.mxu2 %vm2113_vm10, %v5157_v59  ;;  %3825 = vmatmul.msk.f32.vlgmr.msra.gmra.mxu1 %vm2113_vm10, %v2616_v20  ;;  %v2812_v59 = vld [vmem:[#allocation4 + $0x378] sm:$0xff]  ;;  %v3054_v20 = vld [vmem:[#allocation4 + $0x4a8] sm:$0xff] }
 0x49e   : > { %3814 = vmatmul.msk.f32.gmra.mxu3 %vm2113_vm10, %v2378_v25  ;;  %3815 = vmatmul.msk.f32.vlgmr.msrb.gmra.mxu0 %vm2113_vm10, %v5219_v44  ;;  %v2974_v44 = vld [vmem:[#allocation4 + $0x448] sm:$0xff]  ;;  %v3052_v25 = vld [vmem:[#allocation4 + $0x498] sm:$0xff] }
 0x49f   : > { %2716 = vmatpush.msrb.mxu3 %v2693_v56  ;;  %2753 = vmatpush.msrb.mxu0 %v2734_v47  ;;  %v3009_v56 = vld [vmem:[#allocation4 + $0x450] sm:$0xff]  ;;  %v3053_v47 = vld [vmem:[#allocation4 + $0x4a0] sm:$0xff] }
 0x4a0   : > { %2833 = vmatpush.msrb.mxu2 %v2814_v11  ;;  %2953 = vmatpush.msra.mxu1 %v2934_v4  ;;  %v3051_v11 = vld [vmem:[#allocation4 + $0x490] sm:$0xff] }
 0x4a1   : > { %2717 = vmatpush.msrb.mxu3 %v2692_v8  ;;  %2754 = vmatpush.msrb.mxu0 %v2733_v31  ;;  %v3050_v8 = vld [vmem:[#allocation4 + $0x488] sm:$0xff] }
 0x4a2   : > { %2834 = vmatpush.msrb.mxu2 %v2813_v53  ;;  %2954 = vmatpush.msra.mxu1 %v2933_v17 }
 0x4a3   : > { %2718 = vmatpush.msrb.mxu3 %v2691_v12  ;;  %2755 = vmatpush.msrb.mxu0 %v2732_v48 }
 0x4a4   : > { %v2618_v9 = vpop.permute.xlu2 %2617  ;;  %v2538_v35 = vpop.permute.xlu0 %2537  ;;  %2835 = vmatpush.msrb.mxu2 %v2812_v59  ;;  %2955 = vmatpush.msra.mxu1 %v2932_v7 }
 0x4a5   : > { %v2536_v41 = vpop.permute.xlu1 %2535  ;;  %3820 = vmatmul.msk.f32.gmra.mxu2 %vm2113_vm10, %v5152_v40  ;;  %3826 = vmatmul.msk.f32.gmra.mxu1 %vm2113_vm10, %v2618_v9  ;;  %v2852_v40 = vld [vmem:[#allocation4 + $0x3a8] sm:$0xff] }
 0x4a6   : > { %3816 = vmatmul.msk.f32.gmra.mxu0 %vm2113_vm10, %v2418_v61  ;;  %3821 = vmatmul.msk.f32.vlgmr.msra.gmra.mxu3 %vm2113_vm10, %v2536_v41  ;;  %v2162_v41 = vpop.f32.mrf.mxu1 }
 0x4a7   : > { %2756 = vmatpush.msrb.mxu0 %v2731_v15  ;;  %2836 = vmatpush.msrb.mxu2 %v2811_v10 }
 0x4a8   : > { %2873 = vmatpush.msra.mxu3 %v2854_v62  ;;  %2956 = vmatpush.msra.mxu1 %v2931_v22 }
 0x4a9   : > { %2757 = vmatpush.msrb.mxu0 %v2730_v26  ;;  %2837 = vmatpush.msrb.mxu2 %v2810_v58 }
 0x4aa   : > { %2874 = vmatpush.msra.mxu3 %v2853_v43  ;;  %2957 = vmatpush.msra.mxu1 %v2930_v54  ;;  %v3101_v54 = vld [vmem:[%s5554_s7 + $0x58] sm:$0xff] }
 0x4ab   : > { %2838 = vmatpush.msrb.mxu2 %v2809_v36  ;;  %2758 = vmatpush.msrb.mxu0 %v2729_v5 }
 0x4ac   : > { %v2656_v27 = vpop.permute.xlu0 %2655  ;;  %2875 = vmatpush.msra.mxu3 %v2852_v40  ;;  %2958 = vmatpush.msra.mxu1 %v2929_v21  ;;  %v2856_v61 = vpop.permute.xlu2 %2855 }
 0x4ad   : > { %v2576_v55 = vpop.permute.xlu1 %2575  ;;  %3827 = vmatmul.msk.f32.vlgmr.msra.gmra.mxu2 %vm2113_vm10, %v2656_v27 }
 0x4ae   : > { %3822 = vmatmul.msk.f32.gmra.mxu3 %vm2113_vm10, %v2538_v35  ;;  %3823 = vmatmul.msk.f32.vlgmr.msra.gmra.mxu0 %vm2113_vm10, %v2576_v55  ;;  %v2165_v28 = vpop.f32.mrf.mxu1 }
 0x4af   : > { %2876 = vmatpush.msra.mxu3 %v2851_v50  ;;  %2913 = vmatpush.msra.mxu0 %v2896_v39 }
 0x4b0   : > { %2993 = vmatpush.msra.mxu2 %v2974_v44 }
 0x4b1   : > { %2877 = vmatpush.msra.mxu3 %v2850_v46  ;;  %2914 = vmatpush.msra.mxu0 %v2895_v1 }
 0x4b2   : > { %2994 = vmatpush.msra.mxu2 %v2973_v13 }
 0x4b3   : > { %2878 = vmatpush.msra.mxu3 %v2849_v24  ;;  %2915 = vmatpush.msra.mxu0 %v2894_v19 }
 0x4b4   : > { %v2658_v45 = vpop.permute.xlu0 %2657  ;;  %2995 = vmatpush.msra.mxu2 %v2972_v2  ;;  %v2858_v53 = vpop.permute.xlu2 %2857 }
 0x4b5   : > { %v2578_v32 = vpop.permute.xlu1 %2577  ;;  %3828 = vmatmul.msk.f32.gmra.mxu2 %vm2113_vm10, %v2658_v45  ;;  %2916 = vmatpush.msra.mxu0 %v2893_v30 }
 0x4b6   : > { %3824 = vmatmul.msk.f32.gmra.mxu0 %vm2113_vm10, %v2578_v32  ;;  %3829 = vmatmul.msk.f32.vlgmr.msrb.gmra.mxu3 %vm2113_vm10, %v5172_v0  ;;  %v2320_v29 = vpop.f32.mrf.mxu1 }
 0x4b7   : > { %2917 = vmatpush.msra.mxu0 %v2892_v33  ;;  %3033 = vmatpush.msrb.mxu3 %v3014_v18 }
 0x4b8   : > { %2996 = vmatpush.msra.mxu2 %v2971_v52 }
 0x4b9   : > { %2918 = vmatpush.msra.mxu0 %v2891_v16  ;;  %3034 = vmatpush.msrb.mxu3 %v3013_v34  ;;  %v3143_v16 = vld [vmem:[%s5555_s8 + $0x58] sm:$0xff]  ;;  %v3100_v34 = vld [vmem:[%s5554_s7 + $0x50] sm:$0xff] }
 0x4ba   : > { %2997 = vmatpush.msra.mxu2 %v2970_v57 }
 0x4bb   : > { %3035 = vmatpush.msrb.mxu3 %v3012_v42  ;;  %v3142_v42 = vld [vmem:[%s5555_s8 + $0x50] sm:$0xff] }
 0x4bc   : > { %v2816_v38 = vpop.permute.xlu0 %2815  ;;  %2998 = vmatpush.msra.mxu2 %v2969_v23  ;;  %v3016_v48 = vpop.permute.xlu2 %3015  ;;  %v3099_v23 = vld [vmem:[%s5554_s7 + $0x48] sm:$0xff] }
 0x4bd   : > { %v2736_v0 = vpop.permute.xlu1 %2735  ;;  %3835 = vmatmul.msk.f32.vlgmr.msrb.gmra.mxu2 %vm2113_vm10, %v2816_v38  ;;  %3036 = vmatpush.msrb.mxu3 %v3011_v6  ;;  %v3141_v6 = vld [vmem:[%s5555_s8 + $0x48] sm:$0xff] }
 0x4be   : > { %3830 = vmatmul.msk.f32.gmra.mxu3 %vm2113_vm10, %v5184_v3  ;;  %3831 = vmatmul.msk.f32.vlgmr.msrb.gmra.mxu0 %vm2113_vm10, %v2736_v0  ;;  %v3049_v3 = vld [vmem:[#allocation4 + $0x480] sm:$0xff]  ;;  %v2323_v27 = vpop.f32.mrf.mxu1 }
 0x4bf   : > { %3037 = vmatpush.msrb.mxu3 %v3010_v60  ;;  %3073 = vmatpush.msrb.mxu0 %v3054_v20 }
 0x4c0   : > { %3148 = vmatpush.msrb.mxu2 %v3143_v16 }
 0x4c1   : > { %3038 = vmatpush.msrb.mxu3 %v3009_v56  ;;  %3074 = vmatpush.msrb.mxu0 %v3053_v47  ;;  %v3098_v56 = vld [vmem:[%s5554_s7 + $0x40] sm:$0xff] }
 0x4c2   : > { %3149 = vmatpush.msrb.mxu2 %v3142_v42  ;;  %v3140_v47 = vld [vmem:[%s5555_s8 + $0x40] sm:$0xff] }
 0x4c3   : > { %3075 = vmatpush.msrb.mxu0 %v3052_v25 }
 0x4c4   : > { %v2776_v51 = vpop.permute.xlu0 %2775  ;;  %v3018_v9 = vpop.permute.xlu2 %3017  ;;  %3150 = vmatpush.msrb.mxu2 %v3141_v6 }
 0x4c5   : > { %v2738_v31 = vpop.permute.xlu1 %2737  ;;  %3833 = vmatmul.msk.f32.vlgmr.msrb.gmra.mxu1 %vm2113_vm10, %v2776_v51  ;;  %3076 = vmatpush.msrb.mxu0 %v3051_v11  ;;  %v3097_v11 = vld [vmem:[%s5554_s7 + $0x38] sm:$0xff] }
 0x4c6   : > { %3832 = vmatmul.msk.f32.gmra.mxu0 %vm2113_vm10, %v2738_v31  ;;  %3837 = vmatmul.msk.f32.vlgmr.msra.gmra.mxu3 %vm2113_vm10, %v2856_v61  ;;  %v3139_v51 = vld [vmem:[%s5555_s8 + $0x38] sm:$0xff] }
 0x4c7   : > { %3077 = vmatpush.msrb.mxu0 %v3050_v8  ;;  %3113 = vmatpush.msrb.mxu1 %v3101_v54 }
 0x4c8   : > { %3151 = vmatpush.msrb.mxu2 %v3140_v47 }
 0x4c9   : > { %3078 = vmatpush.msrb.mxu0 %v3049_v3  ;;  %3114 = vmatpush.msrb.mxu1 %v3100_v34  ;;  %v3096_v3 = vld [vmem:[%s5554_s7 + $0x30] sm:$0xff] }
 0x4ca   : > { %3152 = vmatpush.msrb.mxu2 %v3139_v51 }
 0x4cb   : > { %3115 = vmatpush.msrb.mxu1 %v3099_v23 }
 0x4cc   : > { %v2778_v63 = vpop.permute.xlu0 %2777  ;;  %v3058_v10 = vpop.permute.xlu2 %3057 }
 0x4cd   : > { %v2818_v12 = vpop.permute.xlu1 %2817  ;;  %3834 = vmatmul.msk.f32.gmra.mxu1 %vm2113_vm10, %v2778_v63  ;;  %v3095_v63 = vld [vmem:[%s5554_s7 + $0x28] sm:$0xff] }
 0x4ce   : > { %3836 = vmatmul.msk.f32.gmra.mxu2 %vm2113_vm10, %v2818_v12  ;;  %3838 = vmatmul.msk.f32.gmra.mxu3 %vm2113_vm10, %v2858_v53  ;;  %v3138_v53 = vld [vmem:[%s5555_s8 + $0x30] sm:$0xff]  ;;  %v3137_v12 = vld [vmem:[%s5555_s8 + $0x28] sm:$0xff] }
 0x4cf   : > { %3839 = vmatmul.msk.f32.vlgmr.msra.gmra.mxu0 %vm2113_vm10, %v5194_v14  ;;  %3116 = vmatpush.msrb.mxu1 %v3098_v56 }
 0x4d0   : > { %3153 = vmatpush.msrb.mxu2 %v3138_v53 }
 0x4d1   : > { %3117 = vmatpush.msrb.mxu1 %v3097_v11 }
 0x4d2   : > { %3154 = vmatpush.msrb.mxu2 %v3137_v12 }
 0x4d3   : > { %3118 = vmatpush.msrb.mxu1 %v3096_v3 }
 0x4d4   : > { %v2936_v59 = vpop.permute.xlu0 %2935 }
 0x4d5   : > { %v2976_v49 = vpop.permute.xlu1 %2975  ;;  %3841 = vmatmul.msk.f32.vlgmr.msra.gmra.mxu1 %vm2113_vm10, %v2936_v59 }
 0x4d6   : > { %3843 = vmatmul.msk.f32.vlgmr.msra.gmra.mxu2 %vm2113_vm10, %v2976_v49  ;;  %3845 = vmatmul.msk.f32.vlgmr.msrb.gmra.mxu3 %vm2113_vm10, %v3016_v48 }
 0x4d7   : > { %3840 = vmatmul.msk.f32.gmra.mxu0 %vm2113_vm10, %v5203_v37  ;;  %3119 = vmatpush.msrb.mxu1 %v3095_v63 }
 0x4dc   : > { %v3056_v35 = vpop.permute.xlu0 %3055 }
 0x4dd   : > { %v2978_v15 = vpop.permute.xlu1 %2977 }
 0x4de   : > { %3844 = vmatmul.msk.f32.gmra.mxu2 %vm2113_vm10, %v2978_v15  ;;  %3846 = vmatmul.msk.f32.gmra.mxu3 %vm2113_vm10, %v3018_v9 }
 0x4df   : > { %3847 = vmatmul.msk.f32.vlgmr.msrb.gmra.mxu0 %vm2113_vm10, %v3056_v35 }
 0x4e2   : > { %v2135_v62 = vpop.f32.mrf.mxu0 }
 0x4e3   : > { %v2163_v17 = vadd.f32 %v2162_v41, %v2135_v62  ;;  %v3136_v41 = vld [vmem:[%s5555_s8 + $0x20] sm:$0xff]  ;;  %v3093_v62 = vld [vmem:[%s5554_s7 + $0x18] sm:$0xff] }
 0x4e4   : > { %3155 = vmatpush.msrb.mxu2 %v3136_v41 }
 0x4e5   : > { %v2938_v14 = vpop.permute.xlu1 %2937 }
 0x4e6   : > { %3842 = vmatmul.msk.f32.gmra.mxu1 %vm2113_vm10, %v2938_v14 }
 0x4e7   : > { %3848 = vmatmul.msk.f32.gmra.mxu0 %vm2113_vm10, %v3058_v10  ;;  %v3094_v10 = vld [vmem:[%s5554_s7 + $0x20] sm:$0xff] }
 0x4e8   : > { %3120 = vmatpush.msrb.mxu1 %v3094_v10 }
 0x4ea   : > { %3121 = vmatpush.msrb.mxu1 %v3093_v62 }
 0x4f0   : > { %v2240_v43 = vpop.f32.mrf.mxu3 }
 0x500   : > { %v2200_v26 = vpop.f32.mrf.mxu2 }
 0x501   : > { %v2206_v46 = vadd.f32 %v2200_v26, %v2163_v17 }
 0x503   : > { %v2138_v37 = vpop.f32.mrf.mxu0  ;;  %v2246_v24 = vadd.f32 %v2240_v43, %v2206_v46  ;;  %v3092_v43 = vld [vmem:[%s5554_s7 + $0x10] sm:$0xff] }
 0x504   : > { %v2166_v30 = vadd.f32 %v2165_v28, %v2138_v37  ;;  %v3135_v28 = vld [vmem:[%s5555_s8 + $0x18] sm:$0xff]  ;;  %3122 = vmatpush.msrb.mxu1 %v3092_v43  ;;  %v3228_v43 = vld [vmem:[%s5558_s11 + $0x28] sm:$0xff] }
 0x505   : > { %3156 = vmatpush.msrb.mxu2 %v3135_v28 }
 0x508   : > { %v2203_v58 = vpop.f32.mrf.mxu2 }
 0x509   : > { %v2207_v32 = vadd.f32 %v2203_v58, %v2166_v30 }
 0x50a   : > { %v2480_v44 = vpop.f32.mrf.mxu1 }
 0x50b   : > { %v2280_v36 = vpop.f32.mrf.mxu0 }
 0x50c   : > { %v2286_v19 = vadd.f32 %v2280_v36, %v2246_v24  ;;  %v3091_v36 = vld [vmem:[%s5554_s7 + $0x8] sm:$0xff] }
 0x50d   : > { %3123 = vmatpush.msrb.mxu1 %v3091_v36  ;;  %v3198_v36 = vld [vmem:[%s5557_s10] sm:$0x7f] }
 0x50e   : > { %v2326_v45 = vadd.f32 %v2320_v29, %v2286_v19  ;;  %v3134_v29 = vld [vmem:[%s5555_s8 + $0x10] sm:$0xff] }
 0x50f   : > { %3157 = vmatpush.msrb.mxu2 %v3134_v29  ;;  %v3227_v29 = vld [vmem:[%s5558_s11 + $0x20] sm:$0xff] }
 0x510   : > { %v2360_v5 = vpop.f32.mrf.mxu2 }
 0x511   : > { %v2243_v40 = vpop.f32.mrf.mxu3  ;;  %v2366_v52 = vadd.f32 %v2360_v5, %v2326_v45  ;;  %v3133_v5 = vld [vmem:[%s5555_s8 + $0x8] sm:$0xff] }
 0x512   : > { %v5272_v2 = vpop.f32.mrf.mxu1  ;;  %v2247_v57 = vadd.f32 %v2243_v40, %v2207_v32  ;;  %3158 = vmatpush.msrb.mxu2 %v3133_v5  ;;  %v3226_v5 = vld [vmem:[%s5558_s11 + $0x18] sm:$0xff] }
 0x513   : > { %v2283_v4 = vpop.f32.mrf.mxu0 }
 0x514   : > { %v2287_v20 = vadd.f32 %v2283_v4, %v2247_v57  ;;  %v3090_v4 = vld [vmem:[%s5554_s7] sm:$0xff] }
 0x515   : > { %3124 = vmatpush.msrb.mxu1 %v3090_v4  ;;  %v3871_v4 = vld [vmem:[%s5558_s11 + $0x98] sm:$0xff] }
 0x516   : > { %v2327_v8 = vadd.f32 %v2323_v27, %v2287_v20  ;;  %v3132_v27 = vld [vmem:[%s5555_s8] sm:$0xff] }
 0x517   : > { %3159 = vmatpush.msrb.mxu2 %v3132_v27  ;;  %v3861_v27 = vld [vmem:[%s5558_s11 + $0x58] sm:$0xff] }
 0x518   : > { %v2363_v50 = vpop.f32.mrf.mxu2 }
 0x519   : > { %v2400_v39 = vpop.f32.mrf.mxu3  ;;  %v2367_v48 = vadd.f32 %v2363_v50, %v2327_v8 }
 0x51a   : > { %v2406_v21 = vadd.f32 %v2400_v39, %v2366_v52  ;;  %v2640_v38 = vpop.f32.mrf.mxu1 }
 0x51b   : > { %v2440_v55 = vpop.f32.mrf.mxu0 }
 0x51c   : > { %v2446_v0 = vadd.f32 %v2440_v55, %v2406_v21 }
 0x51e   : > { %v2486_v31 = vadd.f32 %v2480_v44, %v2446_v0 }
 0x520   : > { %v2520_v13 = vpop.f32.mrf.mxu2 }
 0x521   : > { %v2403_v1 = vpop.f32.mrf.mxu3  ;;  %v2526_v59 = vadd.f32 %v2520_v13, %v2486_v31 }
 0x522   : > { %v2407_v9 = vadd.f32 %v2403_v1, %v2367_v48  ;;  %v2643_v35 = vpop.f32.mrf.mxu1 }
 0x523   : > { %v2443_v7 = vpop.f32.mrf.mxu0 }
 0x524   : > { %v2447_v26 = vadd.f32 %v2443_v7, %v2407_v9 }
 0x526   : > { %v2487_v50 = vadd.f32 %v5272_v2, %v2447_v26 }
 0x528   : > { %v5274_v33 = vpop.f32.mrf.mxu2 }
 0x529   : > { %v2560_v22 = vpop.f32.mrf.mxu3  ;;  %v2527_v17 = vadd.f32 %v5274_v33, %v2487_v50  ;;  %v3225_v50 = vld [vmem:[%s5558_s11 + $0x10] sm:$0xff] }
 0x52a   : > { %v2566_v15 = vadd.f32 %v2560_v22, %v2526_v59 }
 0x52b   : > { %v2600_v18 = vpop.f32.mrf.mxu0 }
 0x52c   : > { %v2606_v37 = vadd.f32 %v2600_v18, %v2566_v15  ;;  %v3862_v15 = vld [vmem:[%s5558_s11 + $0x60] sm:$0xff] }
 0x52e   : > { %v2646_v39 = vadd.f32 %v2640_v38, %v2606_v37  ;;  %v3169_v37 = vld [vmem:[%s5556_s9] sm:$0x7f] }
 0x530   : > { %v2680_v25 = vpop.f32.mrf.mxu2 }
 0x531   : > { %v2563_v60 = vpop.f32.mrf.mxu3  ;;  %v2686_v46 = vadd.f32 %v2680_v25, %v2646_v39  ;;  %v3880_v39 = vld [vmem:[%s5558_s11 + $0xd8] sm:$0xff] }
 0x532   : > { %v2567_v1 = vadd.f32 %v2563_v60, %v2527_v17  ;;  %v3879_v17 = vld [vmem:[%s5558_s11 + $0xd0] sm:$0xff]  ;;  %3337 = vmatpush.msra.mxu2 %v3880_v39 }
 0x533   : > { %v2603_v61 = vpop.f32.mrf.mxu0 }
 0x534   : > { %v2607_v19 = vadd.f32 %v2603_v61, %v2567_v1  ;;  %v3223_v1 = vld [vmem:[%s5558_s11] sm:$0xff]  ;;  %3338 = vmatpush.msra.mxu2 %v3879_v17 }
 0x536   : > { %v2647_v2 = vadd.f32 %v2643_v35, %v2607_v19  ;;  %v3863_v35 = vld [vmem:[%s5558_s11 + $0x68] sm:$0xff]  ;;  %v3858_v19 = vld [vmem:[%s5558_s11 + $0x40] sm:$0xff] }
 0x537   : > { %3252 = vmatpush.msra.mxu0 %v3863_v35 }
 0x538   : > { %v2683_v58 = vpop.f32.mrf.mxu2 }
 0x539   : > { %v2720_v49 = vpop.f32.mrf.mxu3  ;;  %v2687_v32 = vadd.f32 %v2683_v58, %v2647_v2  ;;  %3253 = vmatpush.msra.mxu0 %v3862_v15  ;;  %v3229_v58 = vld [vmem:[%s5558_s11 + $0x30] sm:$0xff]  ;;  %v3867_v2 = vld [vmem:[%s5558_s11 + $0x78] sm:$0xff] }
 0x53a   : > { %v2726_v13 = vadd.f32 %v2720_v49, %v2686_v46  ;;  %v3859_v46 = vld [vmem:[%s5558_s11 + $0x48] sm:$0xff] }
 0x53b   : > { %v2760_v14 = vpop.f32.mrf.mxu0  ;;  %3254 = vmatpush.msra.mxu0 %v3861_v27 }
 0x53c   : > { %v2766_v22 = vadd.f32 %v2760_v14, %v2726_v13  ;;  %v3870_v13 = vld [vmem:[%s5558_s11 + $0x90] sm:$0xff] }
 0x540   : > { %v2840_v7 = vpop.f32.mrf.mxu2 }
 0x541   : > { %v2723_v40 = vpop.f32.mrf.mxu3 }
 0x542   : > { %v2800_v55 = vpop.f32.mrf.mxu1  ;;  %v2727_v34 = vadd.f32 %v2723_v40, %v2687_v32  ;;  %v3872_v40 = vld [vmem:[%s5558_s11 + $0xa0] sm:$0xff] }
 0x543   : > { %v2763_v44 = vpop.f32.mrf.mxu0  ;;  %v2806_v45 = vadd.f32 %v2800_v55, %v2766_v22  ;;  %3305 = vmatpush.msra.mxu1 %v3872_v40  ;;  %v3860_v55 = vld [vmem:[%s5558_s11 + $0x50] sm:$0xff]  ;;  %v3869_v22 = vld [vmem:[%s5558_s11 + $0x88] sm:$0xff]  ;;  %v3895_v32 = vld [vmem:[%s5558_s11 + $0x140] sm:$0xff] }
 0x544   : > { %v2767_v42 = vadd.f32 %v2763_v44, %v2727_v34  ;;  %v3224_v44 = vld [vmem:[%s5558_s11 + $0x8] sm:$0xff]  ;;  %3255 = vmatpush.msra.mxu0 %v3860_v55  ;;  %v3866_v34 = vld [vmem:[%s5558_s11 + $0x70] sm:$0xff] }
 0x545   : > { %v2846_v52 = vadd.f32 %v2840_v7, %v2806_v45  ;;  %3306 = vmatpush.msra.mxu1 %v3871_v4  ;;  %v3878_v7 = vld [vmem:[%s5558_s11 + $0xc8] sm:$0xff]  ;;  %v3877_v45 = vld [vmem:[%s5558_s11 + $0xc0] sm:$0xff] }
 0x546   : > { %3256 = vmatpush.msra.mxu0 %v3859_v46  ;;  %3339 = vmatpush.msra.mxu2 %v3878_v7 }
 0x547   : > { %3307 = vmatpush.msra.mxu1 %v3870_v13 }
 0x548   : > { %3257 = vmatpush.msra.mxu0 %v3858_v19  ;;  %3340 = vmatpush.msra.mxu2 %v3877_v45 }
 0x549   : > { %v2880_v24 = vpop.f32.mrf.mxu3  ;;  %3308 = vmatpush.msra.mxu1 %v3869_v22 }
 0x54a   : > { %v2803_v30 = vpop.f32.mrf.mxu1  ;;  %v2886_v57 = vadd.f32 %v2880_v24, %v2846_v52  ;;  %v3896_v24 = vld [vmem:[%s5558_s11 + $0x148] sm:$0xff]  ;;  %v3876_v52 = vld [vmem:[%s5558_s11 + $0xb8] sm:$0xff] }
 0x54b   : > { %v2807_v6 = vadd.f32 %v2803_v30, %v2767_v42  ;;  %v3868_v30 = vld [vmem:[%s5558_s11 + $0x80] sm:$0xff]  ;;  %3341 = vmatpush.msra.mxu2 %v3876_v52  ;;  %v3874_v42 = vld [vmem:[%s5558_s11 + $0xa8] sm:$0xff] }
 0x54c   : > { %v2920_v18 = vpop.f32.mrf.mxu0  ;;  %3309 = vmatpush.msra.mxu1 %v3868_v30 }
 0x54d   : > { %v2926_v23 = vadd.f32 %v2920_v18, %v2886_v57  ;;  %v3857_v18 = vld [vmem:[%s5558_s11 + $0x38] sm:$0xff]  ;;  %v3875_v57 = vld [vmem:[%s5558_s11 + $0xb0] sm:$0xff] }
 0x54e   : > { %3258 = vmatpush.msra.mxu0 %v3857_v18  ;;  %3310 = vmatpush.msra.mxu1 %v3867_v2 }
 0x54f   : > { %3342 = vmatpush.msra.mxu2 %v3875_v57 }
 0x550   : > { %3311 = vmatpush.msra.mxu1 %v3866_v34 }
 0x551   : > { %v2843_v54 = vpop.f32.mrf.mxu2  ;;  %v2883_v16 = vpop.f32.mrf.mxu3  ;;  %3343 = vmatpush.msra.mxu2 %v3874_v42 }
 0x552   : > { %v2960_v21 = vpop.f32.mrf.mxu1  ;;  %v2847_v20 = vadd.f32 %v2843_v54, %v2807_v6  ;;  %v3888_v54 = vld [vmem:[%s5558_s11 + $0x110] sm:$0xff]  ;;  %v3904_v6 = vld [vmem:[%s5558_s11 + $0x180] sm:$0xff] }
 0x553   : > { %v2966_v38 = vadd.f32 %v2960_v21, %v2926_v23  ;;  %3369 = vmatpush.msrb.mxu0 %v3888_v54  ;;  %v3893_v21 = vld [vmem:[%s5558_s11 + $0x130] sm:$0xff]  ;;  %v3886_v23 = vld [vmem:[%s5558_s11 + $0x100] sm:$0xff] }
 0x554   : > { %v2923_v33 = vpop.f32.mrf.mxu0  ;;  %v2887_v25 = vadd.f32 %v2883_v16, %v2847_v20  ;;  %v3894_v16 = vld [vmem:[%s5558_s11 + $0x138] sm:$0xff] }
 0x555   : > { %v3903_v20 = vld [vmem:[%s5558_s11 + $0x178] sm:$0xff] }
 0x556   : > { %v2927_v8 = vadd.f32 %v2923_v33, %v2887_v25  ;;  %v3887_v33 = vld [vmem:[%s5558_s11 + $0x108] sm:$0xff] }
 0x557   : > { %3370 = vmatpush.msrb.mxu0 %v3887_v33  ;;  %v3901_v25 = vld [vmem:[%s5558_s11 + $0x168] sm:$0xff] }
 0x559   : > { %v3000_v60 = vpop.f32.mrf.mxu2  ;;  %v3040_v61 = vpop.f32.mrf.mxu3  ;;  %3371 = vmatpush.msrb.mxu0 %v3886_v23 }
 0x55a   : > { %v3006_v0 = vadd.f32 %v3000_v60, %v2966_v38  ;;  %v3892_v38 = vld [vmem:[%s5558_s11 + $0x128] sm:$0xff]  ;;  %v3885_v60 = vld [vmem:[%s5558_s11 + $0xf8] sm:$0xff] }
 0x55b   : > { %3372 = vmatpush.msrb.mxu0 %v3885_v60 }
 0x55c   : > { %v3046_v56 = vadd.f32 %v3040_v61, %v3006_v0  ;;  %v3080_v47 = vpop.f32.mrf.mxu0  ;;  %v3891_v0 = vld [vmem:[%s5558_s11 + $0x120] sm:$0xff]  ;;  %v3884_v61 = vld [vmem:[%s5558_s11 + $0xf0] sm:$0xff] }
 0x55d   : > { %3373 = vmatpush.msrb.mxu0 %v3884_v61 }
 0x55e   : > { %v3086_v11 = vadd.f32 %v3080_v47, %v3046_v56  ;;  %v3902_v56 = vld [vmem:[%s5558_s11 + $0x170] sm:$0xff]  ;;  %v3890_v47 = vld [vmem:[%s5558_s11 + $0x118] sm:$0xff] }
 0x560   : > { %v3088_v51 = vmax.f32 %v3086_v11, 0.0  ;;  %v3883_v11 = vld [vmem:[%s5558_s11 + $0xe8] sm:$0xff] }
 0x561   : > { %v3003_v53 = vpop.f32.mrf.mxu2  ;;  %v3043_v12 = vpop.f32.mrf.mxu3  ;;  %3374 = vmatpush.msrb.mxu0 %v3883_v11 }
 0x562   : > { %3849 = vmatmul.msk.f32.vlgmr.msrb.gmra.mxu1 %vm3102_vm11, %v3088_v51  ;;  %3851 = vmatmul.msk.f32.vlgmr.msrb.gmra.mxu2 %vm3102_vm11, %v3088_v51  ;;  %v3882_v51 = vld [vmem:[%s5558_s11 + $0xe0] sm:$0xff] }
 0x563   : > { %v2963_v31 = vpop.f32.mrf.mxu1  ;;  %3433 = vmatpush.msrb.mxu1 %v3904_v6  ;;  %3375 = vmatpush.msrb.mxu0 %v3882_v51 }
 0x564   : > { %v2967_v3 = vadd.f32 %v2963_v31, %v2927_v8  ;;  %v3083_v59 = vpop.f32.mrf.mxu0  ;;  %v3900_v8 = vld [vmem:[%s5558_s11 + $0x160] sm:$0xff]  ;;  %v3899_v31 = vld [vmem:[%s5558_s11 + $0x158] sm:$0xff] }
 0x565   : > { %3434 = vmatpush.msrb.mxu1 %v3903_v20 }
 0x566   : > { %v3007_v63 = vadd.f32 %v3003_v53, %v2967_v3  ;;  %v3898_v3 = vld [vmem:[%s5558_s11 + $0x150] sm:$0xff] }
 0x567   : > { %3435 = vmatpush.msrb.mxu1 %v3902_v56 }
 0x568   : > { %v3047_v48 = vadd.f32 %v3043_v12, %v3007_v63 }
 0x569   : > { %3436 = vmatpush.msrb.mxu1 %v3901_v25 }
 0x56a   : > { %v3087_v49 = vadd.f32 %v3083_v59, %v3047_v48 }
 0x56b   : > { %3437 = vmatpush.msrb.mxu1 %v3900_v8 }
 0x56c   : > { %v3089_v9 = vmax.f32 %v3087_v49, 0.0 }
 0x56d   : > { %3438 = vmatpush.msrb.mxu1 %v3899_v31 }
 0x56e   : > { %3850 = vmatmul.msk.f32.gmra.mxu1 %vm3102_vm11, %v3089_v9  ;;  %3852 = vmatmul.msk.f32.gmra.mxu2 %vm3102_vm11, %v3089_v9 }
 0x56f   : > { %3439 = vmatpush.msrb.mxu1 %v3898_v3 }
 0x5df   : > { %v3126_v14 = vpop.f32.mrf.mxu1 }
 0x5e5   : > { %v3161_v10 = vpop.f32.mrf.mxu2 }
 0x5e6   : > { %v3167_v26 = vmax.f32 %v3126_v14, %v3161_v10  ;;  %v3449_v14 = vld [vmem:[%s5559_s12 + $0x18] sm:$0xff]  ;;  %v3448_v10 = vld [vmem:[%s5559_s12 + $0x10] sm:$0xff] }
 0x5e7   : > { %3466 = vmatpush.msrb.mxu2 %v3449_v14 }
 0x5e9   : > { %3467 = vmatpush.msrb.mxu2 %v3448_v10 }
 0x5eb   : > { %v3129_v41 = vpop.f32.mrf.mxu1 }
 0x5f1   : > { %v3164_v62 = vpop.f32.mrf.mxu2 }
 0x5f2   : > { %v3168_v28 = vmax.f32 %v3129_v41, %v3164_v62  ;;  %v3447_v41 = vld [vmem:[%s5559_s12 + $0x8] sm:$0xff]  ;;  %v3446_v62 = vld [vmem:[%s5559_s12] sm:$0xff] }
 0x5f3   : > { %3468 = vmatpush.msrb.mxu2 %v3447_v41 }
 0x5f4   : > { %3853 = vmatpush.msk.msra.mxu3 %vm3174_vm12, %v3168_v28 }
 0x5f5   : > { %3469 = vmatpush.msrb.mxu2 %v3446_v62 }
 0x5f6   : > { %3193 = vmatpush.msra.mxu3 %v3167_v26 }
 0x5f7   : > { %3854 = vmatmul.msk.f32.vlgmr.msra.gmra.mxu3 %vm3170_vm13, %v3169_v37 }
 0x5f8   : > { %3855 = vmatpush.msk.msrb.mxu3 %vm3174_vm12, %v3168_v28 }
 0x5fa   : > { %3217 = vmatpush.msrb.mxu3 %v3167_v26 }
 0x5fc   : > { %3274 = vmatpush.msra.mxu3 %v3229_v58 }
 0x5fe   : > { %3275 = vmatpush.msra.mxu3 %v3228_v43 }
 0x5ff   : > { %3856 = vmatmul.msk.f32.vlgmr.msrb.gmra.mxu3 %vm3170_vm13, %v3198_v36 }
 0x600   : > { %3276 = vmatpush.msra.mxu3 %v3227_v29 }
 0x602   : > { %3277 = vmatpush.msra.mxu3 %v3226_v5 }
 0x604   : > { %3278 = vmatpush.msra.mxu3 %v3225_v50 }
 0x606   : > { %3279 = vmatpush.msra.mxu3 %v3224_v44 }
 0x608   : > { %3280 = vmatpush.msra.mxu3 %v3223_v1 }
 0x60a   : > { %3401 = vmatpush.msrb.mxu3 %v3896_v24 }
 0x60c   : > { %3402 = vmatpush.msrb.mxu3 %v3895_v32 }
 0x60e   : > { %3403 = vmatpush.msrb.mxu3 %v3894_v16 }
 0x610   : > { %3404 = vmatpush.msrb.mxu3 %v3893_v21 }
 0x612   : > { %3405 = vmatpush.msrb.mxu3 %v3892_v38 }
 0x614   : > { %3406 = vmatpush.msrb.mxu3 %v3891_v0 }
 0x616   : > { %3407 = vmatpush.msrb.mxu3 %v3890_v47 }
 0x67a   : > { %v3195_v53 = vpop.f32.mrf.mxu3 }
 0x682   : > { %v3219_v63 = vpop.f32.mrf.mxu3 }
 0x683   : > { %v3222_v12 = vmax.f32 %v3195_v53, %v3219_v63 }
 0x685   : > { %3865 = vmatmul.msk.f32.vlgmr.msra.gmra.mxu3 %vm3240_vm14, %v3222_v12  ;;  %v3239_v48 = vrot.slane %v3222_v12, 1  ;;  %v3325_v59 = vrot.slane %v3222_v12, 3  ;;  %v3293_v49 = vrot.slane %v3222_v12, 2  ;;  %v3389_v9 = vrot.slane %v3222_v12, 5 }
 0x686   : > { %v3357_v35 = vrot.slane %v3222_v12, 4  ;;  %v3421_v15 = vrot.slane %v3222_v12, 6 }
 0x687   : > { %3864 = vmatmul.msk.f32.vlgmr.msra.gmra.mxu0 %vm3240_vm14, %v3239_v48  ;;  %3881 = vmatmul.msk.f32.vlgmr.msra.gmra.mxu2 %vm3240_vm14, %v3325_v59 }
 0x688   : > { %3873 = vmatmul.msk.f32.vlgmr.msra.gmra.mxu1 %vm3240_vm14, %v3293_v49 }
 0x68d   : > { %3897 = vmatmul.msk.f32.vlgmr.msrb.gmra.mxu3 %vm3240_vm14, %v3389_v9 }
 0x68f   : > { %3889 = vmatmul.msk.f32.vlgmr.msrb.gmra.mxu0 %vm3240_vm14, %v3357_v35 }
 0x690   : > { %3905 = vmatmul.msk.f32.vlgmr.msrb.gmra.mxu1 %vm3240_vm14, %v3421_v15 }
 0x704   : > { %v3260_v28 = vpop.f32.mrf.mxu0 }
 0x705   : > { %v3313_v37 = vpop.f32.mrf.mxu1 }
 0x708   : > { %v3282_v26 = vpop.f32.mrf.mxu3 }
 0x709   : > { %v3283_v58 = vadd.f32 %v3282_v26, %v3260_v28 }
 0x70a   : > { %v3345_v29 = vpop.f32.mrf.mxu2 }
 0x70b   : > { %v3316_v43 = vadd.f32 %v3313_v37, %v3283_v58 }
 0x70c   : > { %v3377_v5 = vpop.f32.mrf.mxu0 }
 0x70d   : > { %v3348_v36 = vadd.f32 %v3345_v29, %v3316_v43  ;;  %v3441_v50 = vpop.f32.mrf.mxu1 }
 0x70f   : > { %v3380_v40 = vadd.f32 %v3377_v5, %v3348_v36 }
 0x710   : > { %v3409_v4 = vpop.f32.mrf.mxu3 }
 0x711   : > { %v3412_v27 = vadd.f32 %v3409_v4, %v3380_v40 }
 0x713   : > { %v3444_v39 = vadd.f32 %v3441_v50, %v3412_v27 }
 0x715   : > { %v3445_v55 = vmax.f32 %v3444_v39, 0.0 }
 0x717   : > { %3906 = vmatmul.msk.f32.vlgmr.msrb.gmra.mxu2 %vm3450_vm15, %v3445_v55 }
 0x79a   : > { %v3471_v44 = vpop.f32.mrf.mxu2 }
 0x79b   : > { %3475 = vst.msk [vmem:[%s449_s22] sm:$0x1] %vm3474_vm0, %v3471_v44 }
 0x79c   : > { %4029 = shalt.err (!%p4026_p8)
}
 0x79d   : > { %3914 = dma.vmem_to_hbm [thread:$0]  (%p4191_p5), %s3488_s15, 16, %s3490_s0, %s3477_s16  }
 0x79e PF: > { %p3926_p9 = scmp.ge.s32.totalorder %s4068_s28, 2  ;;  %s3501_s30 = sand.u32 1, %s4056_s25  }
 0x79f   : > { %s3502_s20 = scalar_lea.sflag [#allocation6], %s3501_s30 }
 0x7a0   : > { %p3921_p10 = pnand %p3926_p9, %p4195_p6 }
 0x7a2   : > { %p3922_p11 = pneg %p3921_p10 }
 0x7a4   : > { %4051 = dma.done.wait (%p3922_p11), %s3502_s20, 16  }
 0x7a5   : > { %4053 = vsyncadd (%p3922_p11), %s3502_s20, 4294967280  ;;  %s5591_s22 = sld [smem:[#allocation10_spill]]  ;;  %p24_p12 = scmp.ge.s32.totalorder %s4178_s14, 4  }
 0x7a6   : > { %s5592_s27 = sld [smem:[#allocation11_spill]]  ;;  %s5593_s25 = smov %s4060_s26 }
 0x7a7   : > { %s5595_s28 = smov %s4178_s14  ;;  %26 = sbr.rel (!%p24_p12) target bundleno = 7 (0x7), region = 166 }
 0x7ab   : > { %s5594_s26 = smov %s5591_s22 }
 0x7ac   :  { %3507 = vsyncpa [#allocation5], 1 }
 0x7ad   :  { %3509 = vsyncpa [#allocation5 + $0x1], 1 }
 0x7ae   :  { %3510 = vsyncpa [#allocation6], 1 }
 0x7af   :  { %3512 = vsyncpa [#allocation6 + $0x1], 1 }

</bundles_post_ra>
